<compile_context>
chip_gen: v6e
topology: v6e:2x2x1
jax: 0.10.0
libtpu: 0.0.40
codegen_flags: <defaults>
</compile_context>

<pallas_src>
import jax
import jax.numpy as jnp
import numpy as np
from jax.experimental import pallas as pl
from jax.experimental.pallas import tpu as pltpu


def multivae_kernel(x_ref,
                    qw0_ref, qb0_ref,
                    qw1m_ref, qb1m_ref, qw1v_ref, qb1v_ref,
                    pw0_ref, pb0_ref, pw1_ref, pb1_ref,
                    out_ref, mu_ref, logvar_ref):
    # ---- encode ----
    x = x_ref[...]                                        # (TB, n_items) f32
    # F.normalize(x, p=2, dim=1): x / max(||x||_2, 1e-12).  Equivalent form
    # x * rsqrt(max(sum(x^2), 1e-24)) keeps the work on the EUP.
    sq = jnp.sum(x * x, axis=1, keepdims=True)
    h = x * jax.lax.rsqrt(jnp.maximum(sq, 1e-24))

    # dropout is identity in eval mode (no-op)

    # q_layer 0 + tanh (bf16 MXU operands, f32 accumulate/epilogue)
    h1 = jnp.tanh(
        jnp.dot(h.astype(jnp.bfloat16), qw0_ref[...],
                preferred_element_type=jnp.float32)
        + qb0_ref[...]
    )
    h1b = h1.astype(jnp.bfloat16)

    # q_layer 1 split into mu / logvar halves -> lane-dense stores
    mu = (jnp.dot(h1b, qw1m_ref[...], preferred_element_type=jnp.float32)
          + qb1m_ref[...])
    logvar = (jnp.dot(h1b, qw1v_ref[...], preferred_element_type=jnp.float32)
              + qb1v_ref[...])
    mu_ref[...] = mu
    logvar_ref[...] = logvar

    # ---- reparameterize (eval mode): z = mu ----
    z = mu.astype(jnp.bfloat16)

    # ---- decode ----
    h3 = jnp.tanh(
        jnp.dot(z, pw0_ref[...], preferred_element_type=jnp.float32)
        + pb0_ref[...]
    )
    out_ref[...] = (jnp.dot(h3.astype(jnp.bfloat16), pw1_ref[...],
                            preferred_element_type=jnp.float32)
                    + pb1_ref[...])


def multivae_forward(x, params, *, batch_tile=128):
    """x: (B, n_items) float32. params: dict from init_params (bf16 weights,
    f32 biases). Returns (out, mu, logvar) in f32."""
    B, n_items = x.shape
    latent = params["pw0"].shape[0]
    hidden = params["qw0"].shape[1]

    tb = min(batch_tile, max(8, B))
    # Pad batch to a multiple of the batch tile (padded rows are all-zero;
    # they are sliced off below).
    pad = (-B) % tb
    if pad:
        x = jnp.pad(x, ((0, pad), (0, 0)))
    bp = B + pad
    grid = (bp // tb,)

    def row_spec(cols):
        return pl.BlockSpec((tb, cols), lambda i: (i, 0))

    def resident_spec(arr):
        shp = arr.shape
        return pl.BlockSpec(shp, lambda i: (0,) * len(shp))

    in_specs = [
        row_spec(n_items),                     # x
        resident_spec(params["qw0"]), resident_spec(params["qb0"]),
        resident_spec(params["qw1_mu"]), resident_spec(params["qb1_mu"]),
        resident_spec(params["qw1_lv"]), resident_spec(params["qb1_lv"]),
        resident_spec(params["pw0"]), resident_spec(params["pb0"]),
        resident_spec(params["pw1"]), resident_spec(params["pb1"]),
    ]
    out_specs = (row_spec(n_items), row_spec(latent), row_spec(latent))
    out_shapes = (
        jax.ShapeDtypeStruct((bp, n_items), jnp.float32),   # decoder output
        jax.ShapeDtypeStruct((bp, latent), jnp.float32),    # mu
        jax.ShapeDtypeStruct((bp, latent), jnp.float32),    # logvar
    )

    flops = 2 * bp * (n_items * hidden          # q_layer_0
                      + 2 * hidden * latent     # q_layer_1 (mu + logvar)
                      + latent * hidden         # p_layer_0
                      + hidden * n_items)       # p_layer_1
    transcendentals = 2 * bp * hidden + bp      # tanh x2 + rsqrt
    weight_bytes = sum(int(np.prod(params[k].shape)) * params[k].dtype.itemsize
                       for k in ("qw0", "qb0", "qw1_mu", "qb1_mu",
                                 "qw1_lv", "qb1_lv", "pw0", "pb0",
                                 "pw1", "pb1"))
    bytes_accessed = (weight_bytes
                      + 4 * bp * n_items                     # x (f32)
                      + 4 * bp * (n_items + 2 * latent))     # out, mu, logvar

    out, mu, logvar = pl.pallas_call(
        multivae_kernel,
        out_shape=out_shapes,
        grid=grid,
        in_specs=in_specs,
        out_specs=out_specs,
        compiler_params=pltpu.CompilerParams(
            dimension_semantics=("parallel",)),
        cost_estimate=pl.CostEstimate(flops=flops,
                                      transcendentals=transcendentals,
                                      bytes_accessed=bytes_accessed),
    )(x,
      params["qw0"], params["qb0"],
      params["qw1_mu"], params["qb1_mu"], params["qw1_lv"], params["qb1_lv"],
      params["pw0"], params["pb0"], params["pw1"], params["pb1"])

    if pad:
        out, mu, logvar = out[:B], mu[:B], logvar[:B]
    return out, mu, logvar


def init_params(key, p_dims):
    """Deterministic init matching MultiVAE.init_weights (xavier-ish normal).
    Weights are pre-transposed to (d_in, d_out) and stored in bf16 for the MXU;
    biases as (1, d_out) f32.  q_layer_1 is split into mu / logvar halves.
    Also returns f32 master copies for the pure-JAX reference."""
    q_dims = p_dims[::-1]
    temp_q_dims = q_dims[:-1] + [q_dims[-1] * 2]
    latent = p_dims[0]

    def make_linear(key, d_in, d_out):
        kw, kb = jax.random.split(key)
        std = np.sqrt(2.0 / (d_in + d_out))
        # torch Linear.weight is (d_out, d_in); we store the transpose.
        w = jax.random.normal(kw, (d_in, d_out), jnp.float32) * std
        b = jax.random.normal(kb, (1, d_out), jnp.float32) * 0.001
        return w, b

    keys = jax.random.split(key, 4)
    q_pairs = list(zip(temp_q_dims[:-1], temp_q_dims[1:]))
    p_pairs = list(zip(p_dims[:-1], p_dims[1:]))
    assert len(q_pairs) == 2 and len(p_pairs) == 2, "expects a 3-level dim list"

    qw0, qb0 = make_linear(keys[0], *q_pairs[0])
    qw1, qb1 = make_linear(keys[1], *q_pairs[1])
    pw0, pb0 = make_linear(keys[2], *p_pairs[0])
    pw1, pb1 = make_linear(keys[3], *p_pairs[1])

    params = {
        # bf16 weights for the kernel MXU path
        "qw0": qw0.astype(jnp.bfloat16), "qb0": qb0,
        "qw1_mu": qw1[:, :latent].astype(jnp.bfloat16), "qb1_mu": qb1[:, :latent],
        "qw1_lv": qw1[:, latent:].astype(jnp.bfloat16), "qb1_lv": qb1[:, latent:],
        "pw0": pw0.astype(jnp.bfloat16), "pb0": pb0,
        "pw1": pw1.astype(jnp.bfloat16), "pb1": pb1,
        # f32 masters for the reference
        "qw0_f32": qw0, "qw1_f32": qw1, "qb1_f32": qb1,
        "pw0_f32": pw0, "pw1_f32": pw1,
    }
    return params


def multivae_reference(x, params):
    """Pure-JAX f32 reference of the eval-mode forward."""
    sq = jnp.sum(x * x, axis=1, keepdims=True)
    h = x / jnp.maximum(jnp.sqrt(sq), 1e-12)
    h = jnp.tanh(h @ params["qw0_f32"] + params["qb0"])
    h2 = h @ params["qw1_f32"] + params["qb1_f32"]
    latent = params["pw0_f32"].shape[0]
    mu, logvar = h2[:, :latent], h2[:, latent:]
    z = mu
    h3 = jnp.tanh(z @ params["pw0_f32"] + params["pb0"])
    out = h3 @ params["pw1_f32"] + params["pb1"]
    return out, mu, logvar


if __name__ == "__main__":
    # p_dims = [latent, hidden, n_items]; q_dims = reversed(p_dims).
    # Lane-aligned small shapes; batch > tile so the grid actually iterates.
    p_dims = [128, 256, 512]
    B = 256

    key = jax.random.PRNGKey(0)
    k_param, k_x = jax.random.split(key)
    params = init_params(k_param, p_dims)

    # Multinomial-likelihood VAE input: non-negative interaction counts.
    x = (jax.random.uniform(k_x, (B, p_dims[-1]), jnp.float32) > 0.8
         ).astype(jnp.float32)

    out, mu, logvar = multivae_forward(x, params, batch_tile=128)
    jax.block_until_ready((out, mu, logvar))

    # Correctness check against the f32 pure-JAX reference (kernel uses bf16
    # MXU operands with f32 accumulation, hence looser tolerances).
    out_r, mu_r, logvar_r = multivae_reference(x, params)
    np.testing.assert_allclose(np.asarray(mu), np.asarray(mu_r),
                               rtol=3e-2, atol=3e-2)
    np.testing.assert_allclose(np.asarray(logvar), np.asarray(logvar_r),
                               rtol=3e-2, atol=3e-2)
    np.testing.assert_allclose(np.asarray(out), np.asarray(out_r),
                               rtol=3e-2, atol=3e-2)

    print("KERNEL_OK")
</pallas_src>

<mosaic_0001>
module attributes {stable_mosaic.version = 11 : i64} {
  func.func @multivae_kernel(%arg0: i32, %arg1: memref<128x512xf32, #tpu.memory_space<vmem>>, %arg2: memref<512x256xbf16, #tpu.memory_space<vmem>>, %arg3: memref<1x256xf32, #tpu.memory_space<vmem>>, %arg4: memref<256x128xbf16, #tpu.memory_space<vmem>>, %arg5: memref<1x128xf32, #tpu.memory_space<vmem>>, %arg6: memref<256x128xbf16, #tpu.memory_space<vmem>>, %arg7: memref<1x128xf32, #tpu.memory_space<vmem>>, %arg8: memref<128x256xbf16, #tpu.memory_space<vmem>>, %arg9: memref<1x256xf32, #tpu.memory_space<vmem>>, %arg10: memref<256x512xbf16, #tpu.memory_space<vmem>>, %arg11: memref<1x512xf32, #tpu.memory_space<vmem>>, %arg12: memref<128x512xf32, #tpu.memory_space<vmem>>, %arg13: memref<128x128xf32, #tpu.memory_space<vmem>>, %arg14: memref<128x128xf32, #tpu.memory_space<vmem>>) attributes {dimension_semantics = [#tpu.dimension_semantics<parallel>], iteration_bounds = array<i64: 2>, scalar_prefetch = 0 : i64, scratch_operands = 0 : i64, tpu.core_type = #tpu.core_type<tc>, window_params = [{transform_indices = @transform_0, window_bounds = array<i64: 128, 512>}, {pipeline_mode = #tpu.pipeline_mode<synchronous>, transform_indices = @transform_1, window_bounds = array<i64: 512, 256>}, {pipeline_mode = #tpu.pipeline_mode<synchronous>, transform_indices = @transform_2, window_bounds = array<i64: 1, 256>}, {pipeline_mode = #tpu.pipeline_mode<synchronous>, transform_indices = @transform_3, window_bounds = array<i64: 256, 128>}, {pipeline_mode = #tpu.pipeline_mode<synchronous>, transform_indices = @transform_4, window_bounds = array<i64: 1, 128>}, {pipeline_mode = #tpu.pipeline_mode<synchronous>, transform_indices = @transform_5, window_bounds = array<i64: 256, 128>}, {pipeline_mode = #tpu.pipeline_mode<synchronous>, transform_indices = @transform_6, window_bounds = array<i64: 1, 128>}, {pipeline_mode = #tpu.pipeline_mode<synchronous>, transform_indices = @transform_7, window_bounds = array<i64: 128, 256>}, {pipeline_mode = #tpu.pipeline_mode<synchronous>, transform_indices = @transform_8, window_bounds = array<i64: 1, 256>}, {pipeline_mode = #tpu.pipeline_mode<synchronous>, transform_indices = @transform_9, window_bounds = array<i64: 256, 512>}, {pipeline_mode = #tpu.pipeline_mode<synchronous>, transform_indices = @transform_10, window_bounds = array<i64: 1, 512>}, {transform_indices = @transform_11, window_bounds = array<i64: 128, 512>}, {transform_indices = @transform_12, window_bounds = array<i64: 128, 128>}, {transform_indices = @transform_13, window_bounds = array<i64: 128, 128>}]} {
    %c0 = arith.constant 0 : index
    %c0_0 = arith.constant 0 : index
    %0 = vector.load %arg1[%c0, %c0_0] : memref<128x512xf32, #tpu.memory_space<vmem>>, vector<128x512xf32>
    %1 = arith.mulf %0, %0 : vector<128x512xf32>
    %cst = arith.constant dense<0.000000e+00> : vector<128xf32>
    %2 = vector.multi_reduction <add>, %1, %cst [1] : vector<128x512xf32> to vector<128xf32>
    %3 = vector.shape_cast %2 : vector<128xf32> to vector<128x1xf32>
    %cst_1 = arith.constant 1.000000e-24 : f32
    %4 = vector.broadcast %cst_1 : f32 to vector<128x1xf32>
    %5 = arith.maximumf %3, %4 : vector<128x1xf32>
    %6 = math.rsqrt %5 : vector<128x1xf32>
    %7 = vector.broadcast %6 : vector<128x1xf32> to vector<128x512xf32>
    %8 = arith.mulf %0, %7 : vector<128x512xf32>
    %9 = arith.truncf %8 : vector<128x512xf32> to vector<128x512xbf16>
    %c0_2 = arith.constant 0 : index
    %c0_3 = arith.constant 0 : index
    %10 = vector.load %arg2[%c0_2, %c0_3] : memref<512x256xbf16, #tpu.memory_space<vmem>>, vector<512x256xbf16>
    %cst_4 = arith.constant dense<0.000000e+00> : vector<128x256xf32>
    %11 = tpu.matmul %9, %10, %cst_4 {dimension_numbers = #tpu.dot_dimension_numbers<[1], [0], [0], [1], [0, 0, 1, 1], [], []>} : vector<128x512xbf16>, vector<512x256xbf16>, vector<128x256xf32> -> vector<128x256xf32>
    %c0_5 = arith.constant 0 : index
    %c0_6 = arith.constant 0 : index
    %12 = vector.load %arg3[%c0_5, %c0_6] : memref<1x256xf32, #tpu.memory_space<vmem>>, vector<1x256xf32>
    %13 = vector.broadcast %12 : vector<1x256xf32> to vector<128x256xf32>
    %14 = arith.addf %11, %13 : vector<128x256xf32>
    %15 = math.tanh %14 : vector<128x256xf32>
    %16 = arith.truncf %15 : vector<128x256xf32> to vector<128x256xbf16>
    %c0_7 = arith.constant 0 : index
    %c0_8 = arith.constant 0 : index
    %17 = vector.load %arg4[%c0_7, %c0_8] : memref<256x128xbf16, #tpu.memory_space<vmem>>, vector<256x128xbf16>
    %cst_9 = arith.constant dense<0.000000e+00> : vector<128x128xf32>
    %18 = tpu.matmul %16, %17, %cst_9 {dimension_numbers = #tpu.dot_dimension_numbers<[1], [0], [0], [1], [0, 0, 1, 1], [], []>} : vector<128x256xbf16>, vector<256x128xbf16>, vector<128x128xf32> -> vector<128x128xf32>
    %c0_10 = arith.constant 0 : index
    %c0_11 = arith.constant 0 : index
    %19 = vector.load %arg5[%c0_10, %c0_11] : memref<1x128xf32, #tpu.memory_space<vmem>>, vector<1x128xf32>
    %20 = vector.broadcast %19 : vector<1x128xf32> to vector<128x128xf32>
    %21 = arith.addf %18, %20 : vector<128x128xf32>
    %c0_12 = arith.constant 0 : index
    %c0_13 = arith.constant 0 : index
    %22 = vector.load %arg6[%c0_12, %c0_13] : memref<256x128xbf16, #tpu.memory_space<vmem>>, vector<256x128xbf16>
    %cst_14 = arith.constant dense<0.000000e+00> : vector<128x128xf32>
    %23 = tpu.matmul %16, %22, %cst_14 {dimension_numbers = #tpu.dot_dimension_numbers<[1], [0], [0], [1], [0, 0, 1, 1], [], []>} : vector<128x256xbf16>, vector<256x128xbf16>, vector<128x128xf32> -> vector<128x128xf32>
    %c0_15 = arith.constant 0 : index
    %c0_16 = arith.constant 0 : index
    %24 = vector.load %arg7[%c0_15, %c0_16] : memref<1x128xf32, #tpu.memory_space<vmem>>, vector<1x128xf32>
    %25 = vector.broadcast %24 : vector<1x128xf32> to vector<128x128xf32>
    %26 = arith.addf %23, %25 : vector<128x128xf32>
    %c0_17 = arith.constant 0 : index
    %c0_18 = arith.constant 0 : index
    %27 = vector.load %arg13[%c0_17, %c0_18] : memref<128x128xf32, #tpu.memory_space<vmem>>, vector<128x128xf32>
    tpu.vector_store %arg13[%c0_17, %c0_18], %21 {strides = array<i32>} : memref<128x128xf32, #tpu.memory_space<vmem>>, vector<128x128xf32>,
    %c0_19 = arith.constant 0 : index
    %c0_20 = arith.constant 0 : index
    %28 = vector.load %arg14[%c0_19, %c0_20] : memref<128x128xf32, #tpu.memory_space<vmem>>, vector<128x128xf32>
    tpu.vector_store %arg14[%c0_19, %c0_20], %26 {strides = array<i32>} : memref<128x128xf32, #tpu.memory_space<vmem>>, vector<128x128xf32>,
    %29 = arith.truncf %21 : vector<128x128xf32> to vector<128x128xbf16>
    %c0_21 = arith.constant 0 : index
    %c0_22 = arith.constant 0 : index
    %30 = vector.load %arg8[%c0_21, %c0_22] : memref<128x256xbf16, #tpu.memory_space<vmem>>, vector<128x256xbf16>
    %cst_23 = arith.constant dense<0.000000e+00> : vector<128x256xf32>
    %31 = tpu.matmul %29, %30, %cst_23 {dimension_numbers = #tpu.dot_dimension_numbers<[1], [0], [0], [1], [0, 0, 1, 1], [], []>} : vector<128x128xbf16>, vector<128x256xbf16>, vector<128x256xf32> -> vector<128x256xf32>
    %c0_24 = arith.constant 0 : index
    %c0_25 = arith.constant 0 : index
    %32 = vector.load %arg9[%c0_24, %c0_25] : memref<1x256xf32, #tpu.memory_space<vmem>>, vector<1x256xf32>
    %33 = vector.broadcast %32 : vector<1x256xf32> to vector<128x256xf32>
    %34 = arith.addf %31, %33 : vector<128x256xf32>
    %35 = math.tanh %34 : vector<128x256xf32>
    %36 = arith.truncf %35 : vector<128x256xf32> to vector<128x256xbf16>
    %c0_26 = arith.constant 0 : index
    %c0_27 = arith.constant 0 : index
    %37 = vector.load %arg10[%c0_26, %c0_27] : memref<256x512xbf16, #tpu.memory_space<vmem>>, vector<256x512xbf16>
    %cst_28 = arith.constant dense<0.000000e+00> : vector<128x512xf32>
    %38 = tpu.matmul %36, %37, %cst_28 {dimension_numbers = #tpu.dot_dimension_numbers<[1], [0], [0], [1], [0, 0, 1, 1], [], []>} : vector<128x256xbf16>, vector<256x512xbf16>, vector<128x512xf32> -> vector<128x512xf32>
    %c0_29 = arith.constant 0 : index
    %c0_30 = arith.constant 0 : index
    %39 = vector.load %arg11[%c0_29, %c0_30] : memref<1x512xf32, #tpu.memory_space<vmem>>, vector<1x512xf32>
    %40 = vector.broadcast %39 : vector<1x512xf32> to vector<128x512xf32>
    %41 = arith.addf %38, %40 : vector<128x512xf32>
    %c0_31 = arith.constant 0 : index
    %c0_32 = arith.constant 0 : index
    %42 = vector.load %arg12[%c0_31, %c0_32] : memref<128x512xf32, #tpu.memory_space<vmem>>, vector<128x512xf32>
    tpu.vector_store %arg12[%c0_31, %c0_32], %41 {strides = array<i32>} : memref<128x512xf32, #tpu.memory_space<vmem>>, vector<128x512xf32>,
    return
  }
  func.func @transform_0(%arg0: i32) -> (i32, i32) {
    %c0_i32 = arith.constant 0 : i32
    %c0_i32_0 = arith.constant 0 : i32
    return %arg0, %c0_i32 : i32, i32
  }
  func.func @transform_1(%arg0: i32) -> (i32, i32) {
    %c0_i32 = arith.constant 0 : i32
    %c0_i32_0 = arith.constant 0 : i32
    %c0_i32_1 = arith.constant 0 : i32
    return %c0_i32, %c0_i32_0 : i32, i32
  }
  func.func @transform_2(%arg0: i32) -> (i32, i32) {
    %c0_i32 = arith.constant 0 : i32
    %c0_i32_0 = arith.constant 0 : i32
    %c0_i32_1 = arith.constant 0 : i32
    return %c0_i32, %c0_i32_0 : i32, i32
  }
  func.func @transform_3(%arg0: i32) -> (i32, i32) {
    %c0_i32 = arith.constant 0 : i32
    %c0_i32_0 = arith.constant 0 : i32
    %c0_i32_1 = arith.constant 0 : i32
    return %c0_i32, %c0_i32_0 : i32, i32
  }
  func.func @transform_4(%arg0: i32) -> (i32, i32) {
    %c0_i32 = arith.constant 0 : i32
    %c0_i32_0 = arith.constant 0 : i32
    %c0_i32_1 = arith.constant 0 : i32
    return %c0_i32, %c0_i32_0 : i32, i32
  }
  func.func @transform_5(%arg0: i32) -> (i32, i32) {
    %c0_i32 = arith.constant 0 : i32
    %c0_i32_0 = arith.constant 0 : i32
    %c0_i32_1 = arith.constant 0 : i32
    return %c0_i32, %c0_i32_0 : i32, i32
  }
  func.func @transform_6(%arg0: i32) -> (i32, i32) {
    %c0_i32 = arith.constant 0 : i32
    %c0_i32_0 = arith.constant 0 : i32
    %c0_i32_1 = arith.constant 0 : i32
    return %c0_i32, %c0_i32_0 : i32, i32
  }
  func.func @transform_7(%arg0: i32) -> (i32, i32) {
    %c0_i32 = arith.constant 0 : i32
    %c0_i32_0 = arith.constant 0 : i32
    %c0_i32_1 = arith.constant 0 : i32
    return %c0_i32, %c0_i32_0 : i32, i32
  }
  func.func @transform_8(%arg0: i32) -> (i32, i32) {
    %c0_i32 = arith.constant 0 : i32
    %c0_i32_0 = arith.constant 0 : i32
    %c0_i32_1 = arith.constant 0 : i32
    return %c0_i32, %c0_i32_0 : i32, i32
  }
  func.func @transform_9(%arg0: i32) -> (i32, i32) {
    %c0_i32 = arith.constant 0 : i32
    %c0_i32_0 = arith.constant 0 : i32
    %c0_i32_1 = arith.constant 0 : i32
    return %c0_i32, %c0_i32_0 : i32, i32
  }
  func.func @transform_10(%arg0: i32) -> (i32, i32) {
    %c0_i32 = arith.constant 0 : i32
    %c0_i32_0 = arith.constant 0 : i32
    %c0_i32_1 = arith.constant 0 : i32
    return %c0_i32, %c0_i32_0 : i32, i32
  }
  func.func @transform_11(%arg0: i32) -> (i32, i32) {
    %c0_i32 = arith.constant 0 : i32
    %c0_i32_0 = arith.constant 0 : i32
    return %arg0, %c0_i32 : i32, i32
  }
  func.func @transform_12(%arg0: i32) -> (i32, i32) {
    %c0_i32 = arith.constant 0 : i32
    %c0_i32_0 = arith.constant 0 : i32
    return %arg0, %c0_i32 : i32, i32
  }
  func.func @transform_13(%arg0: i32) -> (i32, i32) {
    %c0_i32 = arith.constant 0 : i32
    %c0_i32_0 = arith.constant 0 : i32
    return %arg0, %c0_i32 : i32, i32
  }
}

</mosaic_0001>

<bundles_post_ra>
// kernel: tpu_custom_call.1
= control target key start
LH: loop header
LB: loop body
LE: loop exit
PB: predicated region body
PF: predicated region fallthrough
CT: control target
= control target key end

     0   :  { %s5426_s0 = inlined_call_operand.hbm [shape: f32[256,512], index: 0, kind: input, shape index: {}]   ;;  %s5427_s1 = inlined_call_operand.hbm [shape: bf16[512,256], index: 1, kind: input, shape index: {}]   ;;  %s5428_s2 = inlined_call_operand.vmem [shape: f32[1,256], index: 2, kind: input, shape index: {}]   ;;  %s5429_s3 = inlined_call_operand.hbm [shape: bf16[256,128], index: 3, kind: input, shape index: {}]   ;;  %s5430_s4 = inlined_call_operand.vmem [shape: f32[1,128], index: 4, kind: input, shape index: {}]   ;;  %s5431_s5 = inlined_call_operand.hbm [shape: bf16[256,128], index: 5, kind: input, shape index: {}]   ;;  %s5432_s6 = inlined_call_operand.vmem [shape: f32[1,128], index: 6, kind: input, shape index: {}]   ;;  %s5433_s7 = inlined_call_operand.hbm [shape: bf16[128,256], index: 7, kind: input, shape index: {}]   ;;  %s5434_s8 = inlined_call_operand.vmem [shape: f32[1,256], index: 8, kind: input, shape index: {}]   ;;  %s5435_s9 = inlined_call_operand.hbm [shape: bf16[256,512], index: 9, kind: input, shape index: {}]   ;;  %s5436_s10 = inlined_call_operand.vmem [shape: f32[1,512], index: 10, kind: input, shape index: {}]   ;;  %s5437_s11 = inlined_call_operand.hbm [shape: f32[256,512], index: 11, kind: output, shape index: {0}]   ;;  %s5438_s12 = inlined_call_operand.hbm [shape: f32[256,128], index: 12, kind: output, shape index: {1}]   ;;  %s5439_s13 = inlined_call_operand.hbm [shape: f32[256,128], index: 13, kind: output, shape index: {2}]  }
   0x1   :  { %5449 = sst [smem:[#allocation24_spill]] %s5426_s0 }
   0x2   :  { %5450 = sst [smem:[#allocation25_spill]] %s5427_s1 }
   0x3   :  { %5451 = sst [smem:[#allocation26_spill]] %s5429_s3 }
   0x4   :  { %5452 = sst [smem:[#allocation27_spill]] %s5431_s5 }
   0x5   :  { %5453 = sst [smem:[#allocation28_spill]] %s5433_s7 }
   0x6   :  { %5454 = sst [smem:[#allocation29_spill]] %s5435_s9 }
   0x7   :  { %5455 = sst [smem:[#allocation30_spill]] %s5437_s11 }
   0x8   :  { %19 = vsyncpa [#allocation3], 0 }
   0x9   :  { %21 = vsyncpa [#allocation3 + $0x1], 0 }
   0xa   :  { %22 = vsyncpa [#allocation6], 0 }
   0xb   :  { %23 = vsyncpa [#allocation9], 0 }
   0xc   :  { %24 = vsyncpa [#allocation12], 0 }
   0xd   :  { %25 = vsyncpa [#allocation4], 0 }
   0xe   :  { %27 = vsyncpa [#allocation4 + $0x1], 0 }
   0xf   :  { %28 = vsyncpa [#allocation15], 0 }
  0x10   :  { %30 = vsyncpa [#allocation15 + $0x1], 0  ;;  %s4608_s25 = smov 0   ;;  %s4610_s26 = smov 0  }
  0x11   :  { %s4612_s27 = smov 0   ;;  %s4614_s28 = smov 0  }
  0x12 LB: > { %s4516_s29 = smov [#allocation5]   ;;  %s4629_s14 = sadd.s32 4294967295, %s4514_s28   ;;  %s4514_s28 = sphi %s4614_s28, %s5490_s28   ;;  %s4510_s27 = sphi %s4612_s27, %s5489_s27   ;;  %s4506_s26 = sphi %s4610_s26, %s5488_s26   ;;  %s4502_s25 = sphi %s4608_s25, %s5487_s25  }
  0x13   : > { %s367_s30 = sshll.u32 %s4516_s29, 4  ;;  %p3271_p0 = scmp.ge.s32.totalorder %s4514_s28, 1  ;;  %s368_s30 = int_to_ptr.vmem [resolvable:$true] %s367_s30 }
  0x14   : > { %p5444_p1 = scmp.eq.s32.totalorder %s4629_s14, 0  ;;  %p355_p2 = scmp.lt.s32.totalorder %s4514_s28, 3 }
  0x15   : > { %s4517_s17 = smov [#allocation8]   ;;  %s4518_s19 = smov [#allocation7]  }
  0x16   : > { %p4634_p3 = pnand %p3271_p0, %p355_p2  ;;  %s399_s18 = sshll.u32 %s4517_s17, 4  ;;  %s4647_s18 = int_to_ptr.vmem [resolvable:$true] %s399_s18 }
  0x17   : > { %s4649_s20 = sshll.u32 %s4518_s19, 4  ;;  %s4235_s22 = scalar_lea.vmem %s368_s30, 8192  ;;  %s384_s20 = int_to_ptr.vmem [resolvable:$true] %s4649_s20 }
  0x18   : > { %s5456_s15 = scalar_select %p4634_p3, 1, 0 }
  0x19   : > { %p3660_p5 = pneg %p4634_p3  ;;  %p4236_p8 = scmp.ne.s32.totalorder %s368_s30, %s4235_s22 }
  0x1a   : > { %p4243_p11 = scmp.lt.s32.totalorder %s368_s30, %s368_s30  ;;  %p4244_p12 = scmp.lt.s32.totalorder %s4235_s22, %s4235_s22 }
  0x1b   : > { %p4643_p6 = pnand %p3660_p5, %p5444_p1 }
  0x1c   : > { %p4245_p13 = por %p4244_p12, %p4243_p11 }
  0x1d   : > { %p4653_p7 = pneg %p4643_p6 }
  0x1f   : > { %p4238_p9 = pnand %p4236_p8, %p4653_p7 }
  0x21   : > { %p4239_p10 = pneg %p4238_p9 }
  0x23   : > { %p4246_p0 = pnand %p4245_p13, %p4239_p10 }
  0x25   : > { %4249 = shalt.err (!%p4246_p0)
}
  0x26   : > { %s5441_s23 = smov 128   ;;  %s5442_s24 = smov 8  }
  0x27   : > { %s5459_s1 = sld [smem:[#allocation25_spill]]  ;;  %s4261_s19 = scalar_lea.vmem %s4647_s18, 2048 }
  0x28   : > { %p4262_p2 = scmp.ne.s32.totalorder %s4647_s18, %s4261_s19  ;;  %p4269_p9 = scmp.lt.s32.totalorder %s4647_s18, %s4647_s18 }
  0x29   : > { %p4270_p10 = scmp.lt.s32.totalorder %s4261_s19, %s4261_s19 }
  0x2a   : > { %p4264_p5 = pnand %p4262_p2, %p4653_p7 }
  0x2b   : > { %p4271_p11 = por %p4270_p10, %p4269_p9 }
  0x2c   : > { %p4265_p8 = pneg %p4264_p5 }
  0x2d   : > { %3663 = dma.hbm_to_vmem [thread:$0]  (!%p4643_p6), %s5459_s1, 8192, %s368_s30, [#allocation6], %s5441_s23, %s5441_s23, %s5442_s24  }
  0x2e   : > { %p4272_p12 = pnand %p4271_p11, %p4265_p8 }
  0x30   : > { %4275 = shalt.err (!%p4272_p12)
}
  0x31   : > { %s4521_s22 = smov 64   ;;  %s4522_s11 = smov 4  }
  0x32   : > { %s5460_s5 = sld [smem:[#allocation27_spill]]  ;;  %s4287_s17 = scalar_lea.vmem %s384_s20, 2048 }
  0x33   : > { %p4288_p13 = scmp.ne.s32.totalorder %s384_s20, %s4287_s17  ;;  %p4295_p5 = scmp.lt.s32.totalorder %s384_s20, %s384_s20 }
  0x34   : > { %p4296_p8 = scmp.lt.s32.totalorder %s4287_s17, %s4287_s17 }
  0x35   : > { %p4290_p0 = pnand %p4288_p13, %p4653_p7 }
  0x36   : > { %p4297_p9 = por %p4296_p8, %p4295_p5 }
  0x37   : > { %p4291_p2 = pneg %p4290_p0 }
  0x38   : > { %3669 = dma.hbm_to_vmem [thread:$0]  (!%p4643_p6), %s5460_s5, 2048, %s4647_s18, [#allocation9], %s4521_s22, %s4521_s22, %s4522_s11  }
  0x39   : > { %p4298_p10 = pnand %p4297_p9, %p4291_p2 }
  0x3b   : > { %4301 = shalt.err (!%p4298_p10)
}
  0x3c   : > { %s5461_s3 = sld [smem:[#allocation26_spill]]  ;;  %s4523_s29 = smov [#allocation10]  }
  0x3d   : > { %s415_s18 = sshll.u32 %s4523_s29, 4  ;;  %s4524_s30 = smov [#allocation11]   ;;  %s416_s18 = int_to_ptr.vmem [resolvable:$true] %s415_s18 }
  0x3e   : > { %s431_s24 = sshll.u32 %s4524_s30, 4  ;;  %s4313_s1 = scalar_lea.vmem %s416_s18, 2048  ;;  %s432_s24 = int_to_ptr.vmem [resolvable:$true] %s431_s24 }
  0x3f   : > { %p4314_p11 = scmp.ne.s32.totalorder %s416_s18, %s4313_s1  ;;  %p4321_p0 = scmp.lt.s32.totalorder %s416_s18, %s416_s18 }
  0x40   : > { %p4322_p2 = scmp.lt.s32.totalorder %s4313_s1, %s4313_s1 }
  0x41   : > { %p4316_p12 = pnand %p4314_p11, %p4653_p7 }
  0x42   : > { %3666 = dma.hbm_to_vmem [thread:$0]  (!%p4643_p6), %s5461_s3, 2048, %s384_s20, [#allocation6], %s4521_s22, %s4521_s22, %s4522_s11  }
  0x43   : > { %p4317_p13 = pneg %p4316_p12  ;;  %p4323_p5 = por %p4322_p2, %p4321_p0 }
  0x45   : > { %p4324_p8 = pnand %p4323_p5, %p4317_p13 }
  0x47   : > { %4327 = shalt.err (!%p4324_p8)
}
  0x48   : > { %s5462_s23 = smov 8   ;;  %s5463_s17 = smov 128  }
  0x49   : > { %s5464_s7 = sld [smem:[#allocation28_spill]]  ;;  %s4339_s22 = scalar_lea.vmem %s432_s24, 8192 }
  0x4a   : > { %p4340_p9 = scmp.ne.s32.totalorder %s432_s24, %s4339_s22  ;;  %p4347_p12 = scmp.lt.s32.totalorder %s432_s24, %s432_s24 }
  0x4b   : > { %p4348_p0 = scmp.lt.s32.totalorder %s4339_s22, %s4339_s22 }
  0x4c   : > { %p4342_p10 = pnand %p4340_p9, %p4653_p7 }
  0x4d   : > { %p4349_p13 = por %p4348_p0, %p4347_p12 }
  0x4e   : > { %p4343_p11 = pneg %p4342_p10 }
  0x4f   : > { %3672 = dma.hbm_to_vmem [thread:$0]  (!%p4643_p6), %s5464_s7, 2048, %s416_s18, [#allocation9], %s5463_s17, %s5463_s17, %s5462_s23  }
  0x50   : > { %p4350_p2 = pnand %p4349_p13, %p4343_p11 }
  0x52   : > { %4353 = shalt.err (!%p4350_p2)
}
  0x53   : > { %s4525_s1 = smov 256   ;;  %s4526_s21 = smov 16  }
  0x54   : > { %s5465_s9 = sld [smem:[#allocation29_spill]]  ;;  %s5443_s18 = sadd.s32 4294967294, %s4514_s28  }
  0x55   : > { %s4706_s30 = sadd.s32 1, %s4514_s28   ;;  %s43_s23 = sadd.s32 1, %s4510_s27 }
  0x56   : > { %s40_s17 = ssub.s32 %s4514_s28, %s4706_s30  ;;  %p50_p7 = scmp.ne.s32.totalorder %s4510_s27, %s4506_s26 }
  0x57   : > { %p41_p5 = scmp.eq.s32.totalorder %s40_s17, 0  ;;  %p51_p8 = scmp.eq.s32.totalorder %s4514_s28, 0 }
  0x58   : > { %p56_p9 = scmp.ne.s32.totalorder %s4506_s26, %s4502_s25  ;;  %p290_p10 = scmp.eq.s32.totalorder %s4629_s14, 1 }
  0x59   : > { %s4718_s11 = scalar_select %p41_p5, %s4510_s27, %s43_s23  }
  0x5a   : > { %3675 = dma.hbm_to_vmem [thread:$0]  (!%p4643_p6), %s5465_s9, 8192, %s432_s24, [#allocation12], %s4525_s1, %s4525_s1, %s4526_s21  }
  0x5b   : > { %5466 = sst [smem:[#allocation23_spill]] %s4718_s11  ;;  %p52_p11 = por %p51_p8, %p50_p7 }
  0x5c   : > { %p4722_p12 = por %p5444_p1, %p56_p9  ;;  %p4726_p6 = por %p290_p10, %p50_p7 }
  0x5d   : > { %p296_p0 = scmp.eq.s32.totalorder %s5443_s18, 1  ;;  %p3695_p13 = scmp.lt.s32.totalorder %s4514_s28, 2 }
  0x5e   : > { %s5467_s16 = scalar_select %p4722_p12, 1, 0 }
  0x5f   : > { %s5468_s24 = scalar_select %p4726_p6, 1, 0 }
  0x60   : > { %s448_s20 = sand.u32 1, %s4510_s27   ;;  %p4734_p2 = por %p296_p0, %p56_p9 }
  0x61   : > { %s3278_s1 = sshll.u32 %s448_s20, 9  ;;  %s3483_s21 = sshll.u32 %s4514_s28, 13 }
  0x62   : > { %s5469_s22 = scalar_select %p4734_p2, 1, 0 }
  0x63   : > { %s5470_s0 = sld [smem:[#allocation24_spill]]  ;;  %s452_s17 = scalar_lea.vmem [#allocation2], %s3278_s1 }
  0x64   : > { %s460_s3 = sshll.u32 %s452_s17, 4  ;;  %p4744_p7 = pnand %p3695_p13, %p52_p11  ;;  %s4748_s3 = int_to_ptr.vmem [resolvable:$true] %s460_s3 }
  0x65   : > { %s4750_s5 = scalar_lea.sflag [#allocation3], %s448_s20 }
  0x66   : > { %p4356_p8 = pneg %p4744_p7 }
  0x69   : > { %s4742_s23 = scalar_lea.hbm %s5470_s0, %s3483_s21  ;;  %s4359_s1 = scalar_lea.hbm %s5470_s0, 16384 }
  0x6a   : > { %s4354_s7 = scalar_lea.hbm %s4742_s23, 8192  ;;  %p4360_p11 = scmp.lt.s32.totalorder %s4742_s23, %s5470_s0 }
  0x6b   : > { %p4355_p5 = scmp.ne.s32.totalorder %s4742_s23, %s4354_s7  ;;  %p4361_p0 = scmp.lt.s32.totalorder %s4359_s1, %s4354_s7 }
  0x6d   : > { %p4357_p9 = pnand %p4356_p8, %p4355_p5  ;;  %p4362_p13 = por %p4361_p0, %p4360_p11 }
  0x6f   : > { %p4358_p10 = pneg %p4357_p9 }
  0x71   : > { %p4363_p4 = pnand %p4362_p13, %p4358_p10 }
  0x73   : > { %4366 = shalt.err (!%p4363_p4)
}
  0x74   : > { %s4367_s20 = scalar_lea.vmem %s4748_s3, 8192  ;;  %s4527_s9 = smov [#allocation2]  }
  0x75   : > { %p4368_p1 = scmp.ne.s32.totalorder %s4748_s3, %s4367_s20  ;;  %s4372_s11 = sshll.u32 %s4527_s9, 4  ;;  %s4373_s11 = int_to_ptr.vmem [resolvable:$false] %s4372_s11 }
  0x76   : > { %s4374_s21 = scalar_lea.vmem %s4373_s11, 16384  ;;  %p4375_p9 = scmp.lt.s32.totalorder %s4748_s3, %s4373_s11 }
  0x77   : > { %p4370_p2 = pnand %p4368_p1, %p4356_p8  ;;  %p4376_p6 = scmp.lt.s32.totalorder %s4374_s21, %s4367_s20 }
  0x79   : > { %p4371_p5 = pneg %p4370_p2  ;;  %p4377_p12 = por %p4376_p6, %p4375_p9 }
  0x7b   : > { %p4378_p3 = pnand %p4377_p12, %p4371_p5 }
  0x7d   : > { %4381 = shalt.err (!%p4378_p3)
}
  0x7e   : > { %s4528_s7 = smov 512   ;;  %s4529_s19 = smov 32  }
  0x7f   : > { %3679 = dma.hbm_to_vmem [thread:$0]  (!%p4744_p7), %s4742_s23, 8192, %s4748_s3, %s4750_s5, %s4528_s7, %s4528_s7, %s4529_s19  }
  0x80   : > { %p5472_p1 = scmp.ne.s32.totalorder %s5456_s15, 0 }
  0x81   : > { %s4774_s9 = sand.u32 (!%p5472_p1), 1, %s4506_s26   ;;  %p5473_p3 = scmp.ne.s32.totalorder (!%p5472_p1), %s5467_s16, 0 }
  0x82   : > { %472 = sbr.rel (%p5472_p1) target bundleno = 1232 (0x4d0), region = 64  ;;  %s5448_s11 = sshll.u32 (!%p5472_p1), %s4774_s9, 9 }
  0x83   : > { %s475_s1 = scalar_lea.sflag (!%p5472_p1), [#allocation3], %s4774_s9  ;;  %s4780_s29 = scalar_lea.vmem (!%p5472_p1), [#allocation2], %s5448_s11 }
  0x87   : > { %4477 = dma.done.wait (%p5473_p3), %s475_s1, 8192  }
  0x88   : > { %4479 = vsyncadd (%p5473_p3), %s475_s1, 4294959104  ;;  %p5474_p4 = scmp.eq.s32.totalorder %s4629_s14, 0 }
  0x8a   : > { %4481 = dma.done.wait (%p5474_p4), [#allocation6], 10240   ;;  %p5475_p12 = pmov %p5474_p4 }
  0x8b   : > { %p5476_p6 = pmov %p5474_p4 }
  0x8c   : > { %4483 = vsyncadd (%p5475_p12), [#allocation6], 4294957056 }
  0x8d   : > { %4485 = dma.done.wait (%p5476_p6), [#allocation9], 4096   ;;  %p5477_p2 = pmov %p5474_p4 }
  0x8f   : > { %4487 = vsyncadd (%p5477_p2), [#allocation9], 4294963200  ;;  %p5478_p7 = pmov %p5477_p2 }
  0x90   : > { %p5479_p8 = pmov %p5477_p2 }
  0x91   : > { %4489 = dma.done.wait (%p5478_p7), [#allocation12], 8192  }
  0x92   : > { %4491 = vsyncadd (%p5479_p8), [#allocation12], 4294959104  ;;  %v556_v0 = vld [vmem:[%s4780_s29] sm:$0xff]  ;;  %v557_v1 = vld [vmem:[%s4780_s29 + $0x8] sm:$0xff]  ;;  %s3290_s15 = sshll.u32 %s4774_s9, 7  ;;  %s3036_s1 = sand.u32 1, %s4629_s14  }
  0x93   : > { %v558_v2 = vld [vmem:[%s4780_s29 + $0x10] sm:$0xff]  ;;  %v559_v3 = vld [vmem:[%s4780_s29 + $0x18] sm:$0xff]  ;;  %v620_v4 = vmul.f32 %v556_v0, %v556_v0  ;;  %v621_v5 = vmul.f32 %v557_v1, %v557_v1  ;;  %v564_v7 = vld [vmem:[%s4780_s29 + $0x40] sm:$0xff]  ;;  %s5039_s23 = scalar_lea.vmem [#allocation14], %s3290_s15  ;;  %s5087_s21 = scalar_lea.vmem [#allocation16], %s3290_s15 }
  0x94   : > { %v622_v6 = vmul.f32 %v558_v2, %v558_v2  ;;  %v565_v8 = vld [vmem:[%s4780_s29 + $0x48] sm:$0xff]  ;;  %v623_v9 = vmul.f32 %v559_v3, %v559_v3  ;;  %v566_v10 = vld [vmem:[%s4780_s29 + $0x50] sm:$0xff]  ;;  %v567_v11 = vld [vmem:[%s4780_s29 + $0x58] sm:$0xff]  ;;  %v628_v12 = vmul.f32 %v564_v7, %v564_v7  ;;  %s3072_s18 = sshll.u32 %s5039_s23, 4  ;;  %s5173_s16 = scalar_lea.sflag [#allocation15], %s3036_s1  ;;  %s5171_s18 = int_to_ptr.vmem [resolvable:$true] %s3072_s18 }
  0x95   : > { %v629_v13 = vmul.f32 %v565_v8, %v565_v8  ;;  %v560_v14 = vld [vmem:[%s4780_s29 + $0x20] sm:$0xff]  ;;  %v684_v15 = vadd.f32 %v621_v5, %v620_v4  ;;  %v630_v16 = vmul.f32 %v566_v10, %v566_v10  ;;  %v631_v17 = vmul.f32 %v567_v11, %v567_v11  ;;  %v561_v18 = vld [vmem:[%s4780_s29 + $0x28] sm:$0xff]  ;;  %v562_v19 = vld [vmem:[%s4780_s29 + $0x30] sm:$0xff]  ;;  %s4382_s17 = scalar_lea.vmem %s5171_s18, 2048  ;;  %p5480_p11 = scmp.ne.s32.totalorder %s5468_s24, 0 }
  0x96   : > { %v563_v20 = vld [vmem:[%s4780_s29 + $0x38] sm:$0xff]  ;;  %v624_v21 = vmul.f32 %v560_v14, %v560_v14  ;;  %v625_v23 = vmul.f32 %v561_v18, %v561_v18  ;;  %v626_v24 = vmul.f32 %v562_v19, %v562_v19  ;;  %v568_v26 = vld [vmem:[%s4780_s29 + $0x60] sm:$0xff]  ;;  %v569_v27 = vld [vmem:[%s4780_s29 + $0x68] sm:$0xff]  ;;  %p4383_p10 = scmp.ne.s32.totalorder %s5171_s18, %s4382_s17  ;;  %s4531_s20 = smov [#allocation14]  }
  0x97   : > { %v694_v22 = vadd.f32 %v629_v13, %v628_v12  ;;  %v627_v25 = vmul.f32 %v563_v20, %v563_v20  ;;  %v570_v28 = vld [vmem:[%s4780_s29 + $0x70] sm:$0xff]  ;;  %v685_v29 = vadd.f32 %v684_v15, %v622_v6  ;;  %v571_v30 = vld [vmem:[%s4780_s29 + $0x78] sm:$0xff]  ;;  %v632_v31 = vmul.f32 %v568_v26, %v568_v26  ;;  %v576_v34 = vld [vmem:[%s4780_s29 + $0xa0] sm:$0xff]  ;;  %s4386_s7 = sshll.u32 %s4531_s20, 4  ;;  %s4387_s7 = int_to_ptr.vmem [resolvable:$false] %s4386_s7 }
  0x98   : > { %v633_v32 = vmul.f32 %v569_v27, %v569_v27  ;;  %v634_v33 = vmul.f32 %v570_v28, %v570_v28  ;;  %v577_v35 = vld [vmem:[%s4780_s29 + $0xa8] sm:$0xff]  ;;  %v689_v37 = vadd.f32 %v625_v23, %v624_v21  ;;  %v635_v38 = vmul.f32 %v571_v30, %v571_v30  ;;  %v578_v39 = vld [vmem:[%s4780_s29 + $0xb0] sm:$0xff]  ;;  %v579_v40 = vld [vmem:[%s4780_s29 + $0xb8] sm:$0xff]  ;;  %p4384_p0 = pnand %p4383_p10, %p5480_p11  ;;  %s4388_s19 = scalar_lea.vmem %s4387_s7, 4096 }
  0x99   : > { %v695_v36 = vadd.f32 %v694_v22, %v630_v16  ;;  %v640_v41 = vmul.f32 %v576_v34, %v576_v34  ;;  %v572_v42 = vld [vmem:[%s4780_s29 + $0x80] sm:$0xff]  ;;  %v686_v43 = vadd.f32 %v685_v29, %v623_v9  ;;  %v641_v45 = vmul.f32 %v577_v35, %v577_v35  ;;  %v573_v47 = vld [vmem:[%s4780_s29 + $0x88] sm:$0xff]  ;;  %v574_v48 = vld [vmem:[%s4780_s29 + $0x90] sm:$0xff]  ;;  %p4389_p5 = scmp.lt.s32.totalorder %s5171_s18, %s4387_s7  ;;  %p4390_p9 = scmp.lt.s32.totalorder %s4388_s19, %s4382_s17 }
  0x9a   : > { %v699_v44 = vadd.f32 %v633_v32, %v632_v31  ;;  %v642_v46 = vmul.f32 %v578_v39, %v578_v39  ;;  %v575_v49 = vld [vmem:[%s4780_s29 + $0x98] sm:$0xff]  ;;  %v690_v51 = vadd.f32 %v689_v37, %v626_v24  ;;  %v643_v52 = vmul.f32 %v579_v40, %v579_v40  ;;  %v584_v54 = vld [vmem:[%s4780_s29 + $0xe0] sm:$0xff]  ;;  %v585_v55 = vld [vmem:[%s4780_s29 + $0xe8] sm:$0xff]  ;;  %p4385_p13 = pneg %p4384_p0 }
  0x9b   : > { %v696_v50 = vadd.f32 %v695_v36, %v631_v17  ;;  %v636_v53 = vmul.f32 %v572_v42, %v572_v42  ;;  %v586_v56 = vld [vmem:[%s4780_s29 + $0xf0] sm:$0xff]  ;;  %687 = vadd.xlane.f32.xlu0 %v686_v43  ;;  %v709_v58 = vadd.f32 %v641_v45, %v640_v41  ;;  %v637_v59 = vmul.f32 %v573_v47, %v573_v47  ;;  %v587_v61 = vld [vmem:[%s4780_s29 + $0xf8] sm:$0xff]  ;;  %v580_v62 = vld [vmem:[%s4780_s29 + $0xc0] sm:$0xff]  ;;  %p4391_p1 = por %p4390_p9, %p4389_p5 }
  0x9c   : > { %v700_v57 = vadd.f32 %v699_v44, %v634_v33  ;;  %v638_v60 = vmul.f32 %v574_v48, %v574_v48  ;;  %v581_v63 = vld [vmem:[%s4780_s29 + $0xc8] sm:$0xff]  ;;  %v691_v0 = vadd.f32 %v690_v51, %v627_v25  ;;  %v639_v1 = vmul.f32 %v575_v49, %v575_v49  ;;  %v582_v4 = vld [vmem:[%s4780_s29 + $0xd0] sm:$0xff]  ;;  %v583_v5 = vld [vmem:[%s4780_s29 + $0xd8] sm:$0xff] }
  0x9d   : > { %697 = vadd.xlane.f32.xlu1 %v696_v50  ;;  %v648_v2 = vmul.f32 %v584_v54, %v584_v54  ;;  %v649_v3 = vmul.f32 %v585_v55, %v585_v55  ;;  %v710_v7 = vadd.f32 %v709_v58, %v642_v46  ;;  %v704_v8 = vadd.f32 %v637_v59, %v636_v53  ;;  %v592_v10 = vld [vmem:[%s4780_s29 + $0x120] sm:$0xff]  ;;  %v593_v11 = vld [vmem:[%s4780_s29 + $0x128] sm:$0xff]  ;;  %v594_v16 = vld [vmem:[%s4780_s29 + $0x130] sm:$0xff]  ;;  %p4392_p3 = pnand %p4391_p1, %p4385_p13 }
  0x9e   : > { %v701_v6 = vadd.f32 %v700_v57, %v635_v38  ;;  %v650_v9 = vmul.f32 %v586_v56, %v586_v56  ;;  %v651_v12 = vmul.f32 %v587_v61, %v587_v61  ;;  %v644_v14 = vmul.f32 %v580_v62, %v580_v62  ;;  %v595_v17 = vld [vmem:[%s4780_s29 + $0x138] sm:$0xff]  ;;  %v588_v18 = vld [vmem:[%s4780_s29 + $0x100] sm:$0xff]  ;;  %v589_v23 = vld [vmem:[%s4780_s29 + $0x108] sm:$0xff] }
  0x9f   : > { %v719_v13 = vadd.f32 %v649_v3, %v648_v2  ;;  %v645_v15 = vmul.f32 %v581_v63, %v581_v63  ;;  %692 = vadd.xlane.f32.xlu0 %v691_v0  ;;  %v711_v19 = vadd.f32 %v710_v7, %v643_v52  ;;  %v705_v20 = vadd.f32 %v704_v8, %v638_v60  ;;  %v590_v24 = vld [vmem:[%s4780_s29 + $0x110] sm:$0xff]  ;;  %v591_v29 = vld [vmem:[%s4780_s29 + $0x118] sm:$0xff]  ;;  %v600_v30 = vld [vmem:[%s4780_s29 + $0x160] sm:$0xff] }
  0xa0   : > { %v646_v21 = vmul.f32 %v582_v4, %v582_v4  ;;  %v647_v22 = vmul.f32 %v583_v5, %v583_v5  ;;  %v656_v27 = vmul.f32 %v592_v10, %v592_v10  ;;  %v657_v28 = vmul.f32 %v593_v11, %v593_v11  ;;  %v601_v31 = vld [vmem:[%s4780_s29 + $0x168] sm:$0xff]  ;;  %v602_v36 = vld [vmem:[%s4780_s29 + $0x170] sm:$0xff]  ;;  %v603_v41 = vld [vmem:[%s4780_s29 + $0x178] sm:$0xff] }
  0xa1   : > { %702 = vadd.xlane.f32.xlu1 %v701_v6  ;;  %v720_v25 = vadd.f32 %v719_v13, %v650_v9  ;;  %v714_v26 = vadd.f32 %v645_v15, %v644_v14  ;;  %v706_v32 = vadd.f32 %v705_v20, %v639_v1  ;;  %v658_v33 = vmul.f32 %v594_v16, %v594_v16  ;;  %v596_v42 = vld [vmem:[%s4780_s29 + $0x140] sm:$0xff]  ;;  %v597_v43 = vld [vmem:[%s4780_s29 + $0x148] sm:$0xff]  ;;  %v598_v48 = vld [vmem:[%s4780_s29 + $0x150] sm:$0xff] }
  0xa2   : > { %v659_v34 = vmul.f32 %v595_v17, %v595_v17  ;;  %v652_v35 = vmul.f32 %v588_v18, %v588_v18  ;;  %v729_v39 = vadd.f32 %v657_v28, %v656_v27  ;;  %v653_v40 = vmul.f32 %v589_v23, %v589_v23  ;;  %v599_v49 = vld [vmem:[%s4780_s29 + $0x158] sm:$0xff]  ;;  %v608_v50 = vld [vmem:[%s4780_s29 + $0x1a0] sm:$0xff]  ;;  %v609_v55 = vld [vmem:[%s4780_s29 + $0x1a8] sm:$0xff] }
  0xa3   : > { %v721_v37 = vadd.f32 %v720_v25, %v651_v12  ;;  %v715_v38 = vadd.f32 %v714_v26, %v646_v21  ;;  %707 = vadd.xlane.f32.xlu0 %v706_v32  ;;  %v654_v44 = vmul.f32 %v590_v24, %v590_v24  ;;  %v655_v45 = vmul.f32 %v591_v29, %v591_v29  ;;  %v610_v56 = vld [vmem:[%s4780_s29 + $0x1b0] sm:$0xff]  ;;  %v611_v57 = vld [vmem:[%s4780_s29 + $0x1b8] sm:$0xff]  ;;  %v604_v61 = vld [vmem:[%s4780_s29 + $0x180] sm:$0xff] }
  0xa4   : > { %v664_v46 = vmul.f32 %v600_v30, %v600_v30  ;;  %v665_v47 = vmul.f32 %v601_v31, %v601_v31  ;;  %v730_v52 = vadd.f32 %v729_v39, %v658_v33  ;;  %v724_v53 = vadd.f32 %v653_v40, %v652_v35  ;;  %v605_v62 = vld [vmem:[%s4780_s29 + $0x188] sm:$0xff]  ;;  %v606_v63 = vld [vmem:[%s4780_s29 + $0x190] sm:$0xff]  ;;  %v607_v4 = vld [vmem:[%s4780_s29 + $0x198] sm:$0xff] }
  0xa5   : > { %712 = vadd.xlane.f32.xlu1 %v711_v19  ;;  %v716_v51 = vadd.f32 %v715_v38, %v647_v22  ;;  %v666_v54 = vmul.f32 %v602_v36, %v602_v36  ;;  %v660_v59 = vmul.f32 %v596_v42, %v596_v42  ;;  %v661_v60 = vmul.f32 %v597_v43, %v597_v43  ;;  %v616_v5 = vld [vmem:[%s4780_s29 + $0x1e0] sm:$0xff]  ;;  %v617_v6 = vld [vmem:[%s4780_s29 + $0x1e8] sm:$0xff]  ;;  %v618_v11 = vld [vmem:[%s4780_s29 + $0x1f0] sm:$0xff] }
  0xa6   : > { %v739_v58 = vadd.f32 %v665_v47, %v664_v46  ;;  %v725_v0 = vadd.f32 %v724_v53, %v654_v44  ;;  %v667_v1 = vmul.f32 %v603_v41, %v603_v41  ;;  %v662_v2 = vmul.f32 %v598_v48, %v598_v48  ;;  %v612_v12 = vld [vmem:[%s4780_s29 + $0x1c0] sm:$0xff]  ;;  %v613_v13 = vld [vmem:[%s4780_s29 + $0x1c8] sm:$0xff]  ;;  %v3752_v18 = vld [vmem:[#allocation5 + $0x74] ss:$8 sps:$4 sm:$0xff]  }
  0xa7   : > { %v663_v3 = vmul.f32 %v599_v49, %v599_v49  ;;  %717 = vadd.xlane.f32.xlu0 %v716_v51  ;;  %v734_v8 = vadd.f32 %v661_v60, %v660_v59  ;;  %v672_v9 = vmul.f32 %v608_v50, %v608_v50  ;;  %v673_v10 = vmul.f32 %v609_v55, %v609_v55  ;;  %v614_v23 = vld [vmem:[%s4780_s29 + $0x1d0] sm:$0xff]  ;;  %v619_v28 = vld [vmem:[%s4780_s29 + $0x1f8] sm:$0xff]  ;;  %v3758_v36 = vld [vmem:[#allocation5 + $0x64] ss:$8 sps:$4 sm:$0xff]  }
  0xa8   : > { %v740_v7 = vadd.f32 %v739_v58, %v666_v54  ;;  %v731_v14 = vadd.f32 %v730_v52, %v659_v34  ;;  %v726_v15 = vadd.f32 %v725_v0, %v655_v45  ;;  %v674_v16 = vmul.f32 %v610_v56, %v610_v56  ;;  %v3754_v24 = vld [vmem:[#allocation5 + $0x174] ss:$8 sps:$4 sm:$0xff]   ;;  %v3756_v25 = vld [vmem:[#allocation5 + $0x70] ss:$8 sps:$4 sm:$0xff]   ;;  %1288 = vmatprep.subr.bf16.mxu0 %v3752_v18  ;;  %v3760_v42 = vld [vmem:[#allocation5 + $0x164] ss:$8 sps:$4 sm:$0xff]  }
  0xa9   : > { %722 = vadd.xlane.f32.xlu1 %v721_v37  ;;  %v668_v17 = vmul.f32 %v604_v61, %v604_v61  ;;  %v735_v19 = vadd.f32 %v734_v8, %v662_v2  ;;  %v675_v20 = vmul.f32 %v611_v57, %v611_v57  ;;  %v749_v21 = vadd.f32 %v673_v10, %v672_v9  ;;  %v3757_v31 = vld [vmem:[#allocation5 + $0x170] ss:$8 sps:$4 sm:$0xff]   ;;  %v3762_v46 = vld [vmem:[#allocation5 + $0x60] ss:$8 sps:$4 sm:$0xff]   ;;  %v3764_v51 = vld [vmem:[#allocation5 + $0x54] ss:$8 sps:$4 sm:$0xff]  }
  0xaa   : > { %v669_v22 = vmul.f32 %v605_v62, %v605_v62  ;;  %v741_v26 = vadd.f32 %v740_v7, %v667_v1  ;;  %v670_v27 = vmul.f32 %v606_v63, %v606_v63  ;;  %v680_v29 = vmul.f32 %v616_v5, %v616_v5  ;;  %v615_v39 = vld [vmem:[%s4780_s29 + $0x1d8] sm:$0xff]  ;;  %1401 = vmatprep.subr.bf16.mxu1 %v3754_v24  ;;  %v3763_v47 = vld [vmem:[#allocation5 + $0x160] ss:$8 sps:$4 sm:$0xff]   ;;  %v3770_v59 = vld [vmem:[#allocation5 + $0x44] ss:$8 sps:$4 sm:$0xff]  }
  0xab   : > { %v681_v30 = vmul.f32 %v617_v6, %v617_v6  ;;  %727 = vadd.xlane.f32.xlu0 %v726_v15  ;;  %v736_v32 = vadd.f32 %v735_v19, %v663_v3  ;;  %v750_v33 = vadd.f32 %v749_v21, %v674_v16  ;;  %v671_v34 = vmul.f32 %v607_v4, %v607_v4  ;;  %v3766_v55 = vld [vmem:[#allocation5 + $0x154] ss:$8 sps:$4 sm:$0xff]   ;;  %v3768_v56 = vld [vmem:[#allocation5 + $0x50] ss:$8 sps:$4 sm:$0xff]   ;;  %v3772_v61 = vld [vmem:[#allocation5 + $0x144] ss:$8 sps:$4 sm:$0xff]  }
  0xac   : > { %v744_v35 = vadd.f32 %v669_v22, %v668_v17  ;;  %v682_v37 = vmul.f32 %v618_v11, %v618_v11  ;;  %v676_v40 = vmul.f32 %v612_v12, %v612_v12  ;;  %v677_v41 = vmul.f32 %v613_v13, %v613_v13  ;;  %1289 = vmatpush1.bf16.msra.mxu0 %v3756_v25  ;;  %v3769_v57 = vld [vmem:[#allocation5 + $0x150] ss:$8 sps:$4 sm:$0xff]   ;;  %v3774_v62 = vld [vmem:[#allocation5 + $0x40] ss:$8 sps:$4 sm:$0xff]   ;;  %v3776_v0 = vld [vmem:[#allocation5 + $0x34] ss:$8 sps:$4 sm:$0xff]  }
  0xad   : > { %732 = vadd.xlane.f32.xlu1 %v731_v14  ;;  %v759_v38 = vadd.f32 %v681_v30, %v680_v29  ;;  %v678_v44 = vmul.f32 %v614_v23, %v614_v23  ;;  %1402 = vmatpush1.bf16.msra.mxu1 %v3757_v31  ;;  %v683_v49 = vmul.f32 %v619_v28, %v619_v28  ;;  %v3775_v63 = vld [vmem:[#allocation5 + $0x140] ss:$8 sps:$4 sm:$0xff]   ;;  %v3778_v1 = vld [vmem:[#allocation5 + $0x134] ss:$8 sps:$4 sm:$0xff]   ;;  %v3780_v2 = vld [vmem:[#allocation5 + $0x30] ss:$8 sps:$4 sm:$0xff]  }
  0xae   : > { %v745_v43 = vadd.f32 %v744_v35, %v670_v27  ;;  %v754_v45 = vadd.f32 %v677_v41, %v676_v40  ;;  %v679_v50 = vmul.f32 %v615_v39, %v615_v39  ;;  %1290 = vmatprep.subr.bf16.mxu0 %v3758_v36  ;;  %v751_v52 = vadd.f32 %v750_v33, %v675_v20  ;;  %v3781_v3 = vld [vmem:[#allocation5 + $0x130] ss:$8 sps:$4 sm:$0xff]   ;;  %v3782_v4 = vld [vmem:[#allocation5 + $0x24] ss:$8 sps:$4 sm:$0xff]   ;;  %v3786_v6 = vld [vmem:[#allocation5 + $0x20] ss:$8 sps:$4 sm:$0xff]  }
  0xaf   : > { %737 = vadd.xlane.f32.xlu0 %v736_v32  ;;  %v760_v53 = vadd.f32 %v759_v38, %v682_v37  ;;  %1403 = vmatprep.subr.bf16.mxu1 %v3760_v42  ;;  %v3784_v5 = vld [vmem:[#allocation5 + $0x124] ss:$8 sps:$4 sm:$0xff]   ;;  %v3787_v7 = vld [vmem:[#allocation5 + $0x120] ss:$8 sps:$4 sm:$0xff]   ;;  %v3788_v8 = vld [vmem:[#allocation5 + $0x14] ss:$8 sps:$4 sm:$0xff]  }
  0xb0   : > { %v746_v48 = vadd.f32 %v745_v43, %v671_v34  ;;  %v755_v54 = vadd.f32 %v754_v45, %v678_v44  ;;  %1291 = vmatpush1.bf16.msra.mxu0 %v3762_v46  ;;  %v3790_v9 = vld [vmem:[#allocation5 + $0x114] ss:$8 sps:$4 sm:$0xff]   ;;  %v3792_v10 = vld [vmem:[#allocation5 + $0x10] ss:$8 sps:$4 sm:$0xff]   ;;  %v3794_v12 = vld [vmem:[#allocation5 + $0x4] ss:$8 sps:$4 sm:$0xff]  }
  0xb1   : > { %742 = vadd.xlane.f32.xlu1 %v741_v26  ;;  %1404 = vmatpush1.bf16.msra.mxu1 %v3763_v47  ;;  %v761_v60 = vadd.f32 %v760_v53, %v683_v49  ;;  %v3793_v11 = vld [vmem:[#allocation5 + $0x110] ss:$8 sps:$4 sm:$0xff]   ;;  %v3796_v13 = vld [vmem:[#allocation5 + $0x104] ss:$8 sps:$4 sm:$0xff]   ;;  %v3798_v14 = vld [vmem:[#allocation5] ss:$8 sps:$4 sm:$0xff]  }
  0xb2   : > { %v756_v58 = vadd.f32 %v755_v54, %v679_v50  ;;  %1292 = vmatprep.subr.bf16.mxu0 %v3764_v51  ;;  %1405 = vmatprep.subr.bf16.mxu1 %v3766_v55  ;;  %v3799_v15 = vld [vmem:[#allocation5 + $0x100] ss:$8 sps:$4 sm:$0xff]   ;;  %v3800_v16 = vld [vmem:[#allocation5 + $0xf4] ss:$8 sps:$4 sm:$0xff]   ;;  %v3804_v18 = vld [vmem:[#allocation5 + $0xf0] ss:$8 sps:$4 sm:$0xff]  }
  0xb3   : > { %747 = vadd.xlane.f32.xlu0 %v746_v48  ;;  %v3802_v17 = vld [vmem:[#allocation5 + $0x1f4] ss:$8 sps:$4 sm:$0xff]   ;;  %v3805_v19 = vld [vmem:[#allocation5 + $0x1f0] ss:$8 sps:$4 sm:$0xff]   ;;  %v3806_v20 = vld [vmem:[#allocation5 + $0xe4] ss:$8 sps:$4 sm:$0xff]  }
  0xb4   : > { %1293 = vmatpush1.bf16.msra.mxu0 %v3768_v56  ;;  %v3808_v21 = vld [vmem:[#allocation5 + $0x1e4] ss:$8 sps:$4 sm:$0xff]   ;;  %v3810_v22 = vld [vmem:[#allocation5 + $0xe0] ss:$8 sps:$4 sm:$0xff]   ;;  %v3812_v24 = vld [vmem:[#allocation5 + $0xd4] ss:$8 sps:$4 sm:$0xff]  }
  0xb5   : > { %752 = vadd.xlane.f32.xlu1 %v751_v52  ;;  %1406 = vmatpush1.bf16.msra.mxu1 %v3769_v57  ;;  %v3811_v23 = vld [vmem:[#allocation5 + $0x1e0] ss:$8 sps:$4 sm:$0xff]   ;;  %v3814_v25 = vld [vmem:[#allocation5 + $0x1d4] ss:$8 sps:$4 sm:$0xff]   ;;  %v3816_v26 = vld [vmem:[#allocation5 + $0xd0] ss:$8 sps:$4 sm:$0xff]  }
  0xb6   : > { %1294 = vmatprep.subr.bf16.mxu0 %v3770_v59  ;;  %1407 = vmatprep.subr.bf16.mxu1 %v3772_v61  ;;  %v3817_v27 = vld [vmem:[#allocation5 + $0x1d0] ss:$8 sps:$4 sm:$0xff]   ;;  %v3818_v28 = vld [vmem:[#allocation5 + $0xc4] ss:$8 sps:$4 sm:$0xff]   ;;  %v3822_v30 = vld [vmem:[#allocation5 + $0xc0] ss:$8 sps:$4 sm:$0xff]  }
  0xb7   : > { %757 = vadd.xlane.f32.xlu0 %v756_v58  ;;  %v3820_v29 = vld [vmem:[#allocation5 + $0x1c4] ss:$8 sps:$4 sm:$0xff]   ;;  %v3823_v31 = vld [vmem:[#allocation5 + $0x1c0] ss:$8 sps:$4 sm:$0xff]   ;;  %v3824_v32 = vld [vmem:[#allocation5 + $0xb4] ss:$8 sps:$4 sm:$0xff]  }
  0xb8   : > { %1295 = vmatpush1.bf16.msra.mxu0 %v3774_v62  ;;  %v3826_v33 = vld [vmem:[#allocation5 + $0x1b4] ss:$8 sps:$4 sm:$0xff]   ;;  %v3828_v34 = vld [vmem:[#allocation5 + $0xb0] ss:$8 sps:$4 sm:$0xff]   ;;  %v3830_v36 = vld [vmem:[#allocation5 + $0xa4] ss:$8 sps:$4 sm:$0xff]  }
  0xb9   : > { %762 = vadd.xlane.f32.xlu1 %v761_v60  ;;  %1408 = vmatpush1.bf16.msra.mxu1 %v3775_v63  ;;  %v3829_v35 = vld [vmem:[#allocation5 + $0x1b0] ss:$8 sps:$4 sm:$0xff]   ;;  %v3832_v37 = vld [vmem:[#allocation5 + $0x1a4] ss:$8 sps:$4 sm:$0xff]   ;;  %v3834_v38 = vld [vmem:[#allocation5 + $0xa0] ss:$8 sps:$4 sm:$0xff]  }
  0xba   : > { %1296 = vmatprep.subr.bf16.mxu0 %v3776_v0  ;;  %1409 = vmatprep.subr.bf16.mxu1 %v3778_v1  ;;  %v3835_v39 = vld [vmem:[#allocation5 + $0x1a0] ss:$8 sps:$4 sm:$0xff]   ;;  %v3836_v40 = vld [vmem:[#allocation5 + $0x94] ss:$8 sps:$4 sm:$0xff]   ;;  %v3840_v42 = vld [vmem:[#allocation5 + $0x90] ss:$8 sps:$4 sm:$0xff]  }
  0xbb   : > { %v3838_v41 = vld [vmem:[#allocation5 + $0x194] ss:$8 sps:$4 sm:$0xff]   ;;  %v3841_v43 = vld [vmem:[#allocation5 + $0x190] ss:$8 sps:$4 sm:$0xff]   ;;  %v3842_v44 = vld [vmem:[#allocation5 + $0x84] ss:$8 sps:$4 sm:$0xff]  }
  0xbc   : > { %1297 = vmatpush1.bf16.msra.mxu0 %v3780_v2  ;;  %v3844_v45 = vld [vmem:[#allocation5 + $0x184] ss:$8 sps:$4 sm:$0xff]   ;;  %v3846_v46 = vld [vmem:[#allocation5 + $0x80] ss:$8 sps:$4 sm:$0xff]   ;;  %v3848_v48 = vld [vmem:[#allocation7 + $0x78] sm:$0xff]  }
  0xbd   : > { %1410 = vmatpush1.bf16.msra.mxu1 %v3781_v3  ;;  %1298 = vmatprep.subr.bf16.mxu0 %v3782_v4  ;;  %v3847_v47 = vld [vmem:[#allocation5 + $0x180] ss:$8 sps:$4 sm:$0xff]  }
  0xbe   : > { %1411 = vmatprep.subr.bf16.mxu1 %v3784_v5  ;;  %v4160_v3 = vld [vmem:[%s4780_s29 + $0x8] sm:$0xff]  ;;  %v4161_v5 = vld [vmem:[%s4780_s29 + $0x18] sm:$0xff] }
  0xc0   : > { %1299 = vmatpush1.bf16.msra.mxu0 %v3786_v6 }
  0xc1   : > { %1412 = vmatpush1.bf16.msra.mxu1 %v3787_v7  ;;  %1300 = vmatprep.subr.bf16.mxu0 %v3788_v8 }
  0xc2   : > { %1413 = vmatprep.subr.bf16.mxu1 %v3790_v9 }
  0xc4   : > { %1301 = vmatpush1.bf16.msra.mxu0 %v3792_v10  ;;  %v4162_v10 = vld [vmem:[%s4780_s29] sm:$0xff] }
  0xc5   : > { %1414 = vmatpush1.bf16.msra.mxu1 %v3793_v11  ;;  %1302 = vmatprep.subr.bf16.mxu0 %v3794_v12  ;;  %v4163_v12 = vld [vmem:[%s4780_s29 + $0x10] sm:$0xff] }
  0xc6   : > { %1415 = vmatprep.subr.bf16.mxu1 %v3796_v13 }
  0xc8   : > { %1303 = vmatpush1.bf16.msra.mxu0 %v3798_v14  ;;  %v4164_v14 = vld [vmem:[%s4780_s29 + $0x48] sm:$0xff] }
  0xc9   : > { %1416 = vmatpush1.bf16.msra.mxu1 %v3799_v15  ;;  %1304 = vmatprep.subr.bf16.mxu0 %v3800_v16  ;;  %v4165_v16 = vld [vmem:[%s4780_s29 + $0x58] sm:$0xff] }
  0xca   : > { %1417 = vmatprep.subr.bf16.mxu1 %v3802_v17 }
  0xcc   : > { %1305 = vmatpush2.bf16.msra.mxu0 %v3804_v18 }
  0xcd   : > { %1418 = vmatpush2.bf16.msra.mxu1 %v3805_v19  ;;  %1306 = vmatprep.subr.bf16.mxu0 %v3806_v20  ;;  %v4166_v19 = vld [vmem:[%s4780_s29 + $0x28] sm:$0xff] }
  0xce   : > { %1419 = vmatprep.subr.bf16.mxu1 %v3808_v21  ;;  %v4167_v21 = vld [vmem:[%s4780_s29 + $0x38] sm:$0xff] }
  0xd0   : > { %1307 = vmatpush2.bf16.msra.mxu0 %v3810_v22 }
  0xd1   : > { %1420 = vmatpush2.bf16.msra.mxu1 %v3811_v23  ;;  %1308 = vmatprep.subr.bf16.mxu0 %v3812_v24  ;;  %v4168_v23 = vld [vmem:[%s4780_s29 + $0x20] sm:$0xff] }
  0xd2   : > { %1421 = vmatprep.subr.bf16.mxu1 %v3814_v25  ;;  %v4169_v25 = vld [vmem:[%s4780_s29 + $0x30] sm:$0xff] }
  0xd4   : > { %1309 = vmatpush2.bf16.msra.mxu0 %v3816_v26 }
  0xd5   : > { %1422 = vmatpush2.bf16.msra.mxu1 %v3817_v27  ;;  %1310 = vmatprep.subr.bf16.mxu0 %v3818_v28  ;;  %v4170_v27 = vld [vmem:[%s4780_s29 + $0x68] sm:$0xff] }
  0xd6   : > { %1423 = vmatprep.subr.bf16.mxu1 %v3820_v29  ;;  %v4171_v29 = vld [vmem:[%s4780_s29 + $0x78] sm:$0xff] }
  0xd8   : > { %1311 = vmatpush2.bf16.msra.mxu0 %v3822_v30 }
  0xd9   : > { %1424 = vmatpush2.bf16.msra.mxu1 %v3823_v31  ;;  %1312 = vmatprep.subr.bf16.mxu0 %v3824_v32 }
  0xda   : > { %1425 = vmatprep.subr.bf16.mxu1 %v3826_v33 }
  0xdc   : > { %1313 = vmatpush2.bf16.msra.mxu0 %v3828_v34 }
  0xdd   : > { %1426 = vmatpush2.bf16.msra.mxu1 %v3829_v35  ;;  %1314 = vmatprep.subr.bf16.mxu0 %v3830_v36 }
  0xde   : > { %1427 = vmatprep.subr.bf16.mxu1 %v3832_v37 }
  0xe0   : > { %1315 = vmatpush2.bf16.msra.mxu0 %v3834_v38 }
  0xe1   : > { %1428 = vmatpush2.bf16.msra.mxu1 %v3835_v39  ;;  %1316 = vmatprep.subr.bf16.mxu0 %v3836_v40  ;;  %v3849_v40 = vld [vmem:[#allocation7 + $0x38] sm:$0xff]  }
  0xe2   : > { %1429 = vmatprep.subr.bf16.mxu1 %v3838_v41 }
  0xe4   : > { %1317 = vmatpush2.bf16.msra.mxu0 %v3840_v42  ;;  %v3850_v42 = vld [vmem:[#allocation7 + $0x70] sm:$0xff]  }
  0xe5   : > { %1430 = vmatpush2.bf16.msra.mxu1 %v3841_v43  ;;  %1318 = vmatprep.subr.bf16.mxu0 %v3842_v44  ;;  %v4172_v43 = vld [vmem:[%s4780_s29 + $0x40] sm:$0xff] }
  0xe6   : > { %1431 = vmatprep.subr.bf16.mxu1 %v3844_v45  ;;  %v4173_v45 = vld [vmem:[%s4780_s29 + $0x88] sm:$0xff] }
  0xe8   : > { %1319 = vmatpush2.bf16.msra.mxu0 %v3846_v46 }
  0xe9   : > { %1432 = vmatpush2.bf16.msra.mxu1 %v3847_v47  ;;  %3488 = vmatprep.subr.bf16.mxu0 %v3848_v48  ;;  %v4174_v47 = vld [vmem:[%s4780_s29 + $0xa8] sm:$0xff] }
  0xea   : > { %3616 = vmatprep.subr.bf16.mxu1 %v3848_v48 }
 0x124   : > { %v688_v49 = vpop.xlane.xlu0 %687 }
 0x125   : > { %v764_v50 = vmax.f32 %v688_v49, 1e-24  ;;  %v4175_v49 = vld [vmem:[%s4780_s29 + $0x98] sm:$0xff] }
 0x126   : > { %v698_v51 = vpop.xlane.xlu1 %697 }
 0x127   : > { %v766_v52 = vmax.f32 %v698_v51, 1e-24  ;;  %4000 = vrsqrt.f32 %v764_v50  ;;  %v4176_v51 = vld [vmem:[%s4780_s29 + $0xb8] sm:$0xff] }
 0x128   : > { %v693_v53 = vpop.xlane.xlu0 %692 }
 0x129   : > { %4002 = vrsqrt.f32 %v766_v52  ;;  %v765_v54 = vmax.f32 %v693_v53, 1e-24 }
 0x12a   : > { %v703_v55 = vpop.xlane.xlu1 %702 }
 0x12b   : > { %v767_v56 = vmax.f32 %v703_v55, 1e-24  ;;  %4004 = vrsqrt.f32 %v765_v54  ;;  %v4177_v54 = vld [vmem:[%s4780_s29 + $0x60] sm:$0xff] }
 0x12c   : > { %v708_v57 = vpop.xlane.xlu0 %707 }
 0x12d   : > { %4006 = vrsqrt.f32 %v767_v56  ;;  %v768_v59 = vmax.f32 %v708_v57, 1e-24  ;;  %v4178_v56 = vld [vmem:[%s4780_s29 + $0x50] sm:$0xff] }
 0x12e   : > { %v713_v58 = vpop.xlane.xlu1 %712 }
 0x12f   : > { %v769_v60 = vmax.f32 %v713_v58, 1e-24  ;;  %4008 = vrsqrt.f32 %v768_v59  ;;  %v4179_v58 = vld [vmem:[%s4780_s29 + $0x70] sm:$0xff] }
 0x130   : > { %v718_v61 = vpop.xlane.xlu0 %717 }
 0x131   : > { %4010 = vrsqrt.f32 %v769_v60  ;;  %v770_v63 = vmax.f32 %v718_v61, 1e-24  ;;  %v3851_v61 = vld [vmem:[#allocation7 + $0x30] sm:$0xff]  }
 0x132   : > { %v723_v62 = vpop.xlane.xlu1 %722 }
 0x133   : > { %v771_v0 = vmax.f32 %v723_v62, 1e-24  ;;  %4012 = vrsqrt.f32 %v770_v63  ;;  %v3852_v62 = vld [vmem:[#allocation7 + $0x68] sm:$0xff]  }
 0x134   : > { %v4001_v1 = vpop.eup %4000  ;;  %v728_v8 = vpop.xlane.xlu0 %727 }
 0x135   : > { %v797_v4 = vmul.f32 %v4160_v3, %v4001_v1  ;;  %v799_v6 = vmul.f32 %v4161_v5, %v4001_v1  ;;  %4014 = vrsqrt.f32 %v771_v0  ;;  %v796_v11 = vmul.f32 %v4162_v10, %v4001_v1  ;;  %v4181_v10 = vld [vmem:[%s4780_s29 + $0xa0] sm:$0xff] }
 0x136   : > { %v4862_v2 = vpop.eup %4002  ;;  %v733_v7 = vpop.xlane.xlu1 %732  ;;  %v798_v13 = vmul.f32 %v4163_v12, %v4001_v1  ;;  %v772_v32 = vmax.f32 %v728_v8, 1e-24  ;;  %v4180_v8 = vld [vmem:[%s4780_s29 + $0x80] sm:$0xff] }
 0x137   : > { %v805_v15 = vmul.f32 %v4164_v14, %v4862_v2  ;;  %v807_v17 = vmul.f32 %v4165_v16, %v4862_v2  ;;  %v773_v31 = vmax.f32 %v733_v7, 1e-24  ;;  %v804_v44 = vmul.f32 %v4172_v43, %v4862_v2  ;;  %v3853_v7 = vld [vmem:[#allocation7 + $0x28] sm:$0xff]   ;;  %v3854_v12 = vld [vmem:[#allocation7 + $0x60] sm:$0xff]  }
 0x138   : > { %v4005_v9 = vpop.eup %4004  ;;  %v806_v57 = vmul.f32 %v4178_v56, %v4862_v2  ;;  %v738_v60 = vpop.xlane.xlu0 %737 }
 0x139   : > { %v801_v20 = vmul.f32 %v4166_v19, %v4005_v9  ;;  %v803_v22 = vmul.f32 %v4167_v21, %v4005_v9  ;;  %v800_v24 = vmul.f32 %v4168_v23, %v4005_v9  ;;  %v802_v26 = vmul.f32 %v4169_v25, %v4005_v9  ;;  %v4185_v19 = vld [vmem:[%s4780_s29 + $0xe8] sm:$0xff]  ;;  %v4186_v21 = vld [vmem:[%s4780_s29 + $0xd8] sm:$0xff] }
 0x13a   : > { %v4007_v18 = vpop.eup %4006  ;;  %4016 = vrsqrt.f32 %v773_v31  ;;  %v743_v53 = vpop.xlane.xlu1 %742  ;;  %v4187_v23 = vld [vmem:[%s4780_s29 + $0xf8] sm:$0xff] }
 0x13b   : > { %v809_v28 = vmul.f32 %v4170_v27, %v4007_v18  ;;  %v811_v30 = vmul.f32 %v4171_v29, %v4007_v18  ;;  %v861_v33 = vpack.c.bf16 %v801_v20, %v797_v4  ;;  %v863_v34 = vpack.c.bf16 %v803_v22, %v799_v6  ;;  %v3855_v27 = vld [vmem:[#allocation7 + $0x20] sm:$0xff]  }
 0x13c   : > { %v860_v35 = vpack.c.bf16 %v800_v24, %v796_v11  ;;  %v862_v36 = vpack.c.bf16 %v802_v26, %v798_v13  ;;  %v4009_v37 = vpop.eup %4008  ;;  %4018 = vrsqrt.f32 %v772_v32  ;;  %v808_v55 = vmul.f32 %v4177_v54, %v4007_v18  ;;  %v4182_v13 = vld [vmem:[%s4780_s29 + $0x90] sm:$0xff]  ;;  %v748_v26 = vpop.xlane.xlu0 %747 }
 0x13d   : > { %v865_v38 = vpack.c.bf16 %v809_v28, %v805_v15  ;;  %v867_v39 = vpack.c.bf16 %v811_v30, %v807_v17  ;;  %1320 = vmatprep.mubr.bf16.mxu0 %v861_v33  ;;  %1433 = vmatprep.mubr.bf16.mxu1 %v863_v34  ;;  %v813_v46 = vmul.f32 %v4173_v45, %v4009_v37  ;;  %v775_v63 = vmax.f32 %v743_v53, 1e-24  ;;  %v4183_v15 = vld [vmem:[%s4780_s29 + $0xb0] sm:$0xff]  ;;  %v4184_v17 = vld [vmem:[%s4780_s29 + $0xc8] sm:$0xff]  ;;  %v3856_v28 = vld [vmem:[#allocation7 + $0x58] sm:$0xff]  }
 0x13e   : > { %v4011_v41 = vpop.eup %4010  ;;  %1321 = vmatmul.mubr.bf16.vlgmr.msra.gmra.mxu0 %v860_v35  ;;  %1434 = vmatmul.mubr.bf16.vlgmr.msra.gmra.mxu1 %v862_v36  ;;  %v815_v50 = vmul.f32 %v4175_v49, %v4009_v37  ;;  %v810_v59 = vmul.f32 %v4179_v58, %v4007_v18  ;;  %v774_v4 = vmax.f32 %v738_v60, 1e-24  ;;  %v864_v6 = vpack.c.bf16 %v808_v55, %v804_v44  ;;  %v753_v25 = vpop.xlane.xlu1 %752  ;;  %v4191_v44 = vld [vmem:[%s4780_s29 + $0xf0] sm:$0xff] }
 0x13f   : > { %1330 = vmatprep.mubr.bf16.mxu0 %v865_v38  ;;  %1443 = vmatprep.mubr.bf16.mxu1 %v867_v39  ;;  %v817_v48 = vmul.f32 %v4174_v47, %v4011_v41  ;;  %v819_v52 = vmul.f32 %v4176_v51, %v4011_v41  ;;  %v812_v9 = vmul.f32 %v4180_v8, %v4009_v37  ;;  %4020 = vrsqrt.f32 %v775_v63  ;;  %v4188_v38 = vld [vmem:[%s4780_s29 + $0xc0] sm:$0xff]  ;;  %v4200_v8 = vld [vmem:[%s4780_s29 + $0x168] sm:$0xff] }
 0x140   : > { %3489 = vmatpush3.bf16.msra.mxu0 %v3849_v40  ;;  %3624 = vmatpush3.bf16.msra.mxu1 %v3849_v40  ;;  %v4013_v0 = vpop.eup %4012  ;;  %v866_v2 = vpack.c.bf16 %v810_v59, %v806_v57  ;;  %v816_v11 = vmul.f32 %v4181_v10, %v4011_v41  ;;  %v814_v14 = vmul.f32 %v4182_v13, %v4009_v37  ;;  %4022 = vrsqrt.f32 %v774_v4  ;;  %v3857_v37 = vld [vmem:[#allocation7 + $0x18] sm:$0xff]   ;;  %v4189_v40 = vld [vmem:[%s4780_s29 + $0xe0] sm:$0xff]  ;;  %v758_v55 = vpop.xlane.xlu0 %757  ;;  %v4201_v10 = vld [vmem:[%s4780_s29 + $0x148] sm:$0xff] }
 0x141   : > { %3490 = vmatprep.subr.bf16.mxu0 %v3850_v42  ;;  %3617 = vmatprep.subr.bf16.mxu1 %v3850_v42  ;;  %v869_v1 = vpack.c.bf16 %v817_v48, %v813_v46  ;;  %v871_v3 = vpack.c.bf16 %v819_v52, %v815_v50  ;;  %v818_v16 = vmul.f32 %v4183_v15, %v4011_v41  ;;  %v777_v31 = vmax.f32 %v753_v25, 1e-24  ;;  %v4190_v42 = vld [vmem:[%s4780_s29 + $0xd0] sm:$0xff]  ;;  %v4192_v46 = vld [vmem:[%s4780_s29 + $0x128] sm:$0xff]  ;;  %v4194_v50 = vld [vmem:[%s4780_s29 + $0x118] sm:$0xff] }
 0x142   : > { %v4015_v5 = vpop.eup %4014  ;;  %v821_v18 = vmul.f32 %v4184_v17, %v4013_v0  ;;  %v823_v22 = vmul.f32 %v4186_v21, %v4013_v0  ;;  %v868_v29 = vpack.c.bf16 %v816_v11, %v812_v9  ;;  %v776_v35 = vmax.f32 %v748_v26, 1e-24  ;;  %v4193_v48 = vld [vmem:[%s4780_s29 + $0x108] sm:$0xff]  ;;  %v4195_v52 = vld [vmem:[%s4780_s29 + $0x138] sm:$0xff]  ;;  %v763_v54 = vpop.xlane.xlu1 %762  ;;  %v4206_v26 = vld [vmem:[%s4780_s29 + $0x150] sm:$0xff] }
 0x143   : > { %v825_v20 = vmul.f32 %v4185_v19, %v4015_v5  ;;  %v827_v24 = vmul.f32 %v4187_v23, %v4015_v5  ;;  %v870_v30 = vpack.c.bf16 %v818_v16, %v814_v14  ;;  %v820_v39 = vmul.f32 %v4188_v38, %v4013_v0  ;;  %v4203_v14 = vld [vmem:[%s4780_s29 + $0x178] sm:$0xff] }
 0x144   : > { %3491 = vmatpush3.bf16.msra.mxu0 %v3851_v61  ;;  %3625 = vmatpush3.bf16.msra.mxu1 %v3851_v61  ;;  %v824_v41 = vmul.f32 %v4189_v40, %v4015_v5  ;;  %v822_v43 = vmul.f32 %v4190_v42, %v4013_v0  ;;  %v826_v45 = vmul.f32 %v4191_v44, %v4015_v5  ;;  %4024 = vrsqrt.f32 %v777_v31  ;;  %v4196_v0 = vld [vmem:[%s4780_s29 + $0x120] sm:$0xff] }
 0x145   : > { %3492 = vmatprep.subr.bf16.mxu0 %v3852_v62  ;;  %3618 = vmatprep.subr.bf16.mxu1 %v3852_v62  ;;  %v873_v33 = vpack.c.bf16 %v825_v20, %v821_v18  ;;  %v875_v34 = vpack.c.bf16 %v827_v24, %v823_v22  ;;  %4026 = vrsqrt.f32 %v776_v35  ;;  %v779_v58 = vmax.f32 %v763_v54, 1e-24  ;;  %v4198_v5 = vld [vmem:[%s4780_s29 + $0x100] sm:$0xff]  ;;  %v4217_v54 = vld [vmem:[%s4780_s29 + $0x1c8] sm:$0xff] }
 0x146   : > { %1331 = vmatmul.mubr.bf16.gmra.mxu0 %v864_v6  ;;  %1444 = vmatmul.mubr.bf16.gmra.mxu1 %v866_v2  ;;  %v872_v56 = vpack.c.bf16 %v824_v41, %v820_v39  ;;  %v874_v57 = vpack.c.bf16 %v826_v45, %v822_v43  ;;  %v778_v62 = vmax.f32 %v758_v55, 1e-24  ;;  %v4199_v2 = vld [vmem:[%s4780_s29 + $0x110] sm:$0xff]  ;;  %v4204_v22 = vld [vmem:[%s4780_s29 + $0x140] sm:$0xff] }
 0x147   : > { %1340 = vmatprep.mubr.bf16.mxu0 %v869_v1  ;;  %1453 = vmatprep.mubr.bf16.mxu1 %v871_v3  ;;  %v4017_v32 = vpop.eup %4016  ;;  %v4197_v3 = vld [vmem:[%s4780_s29 + $0x130] sm:$0xff]  ;;  %4028 = vrsqrt.f32 %v779_v58  ;;  %v4205_v24 = vld [vmem:[%s4780_s29 + $0x160] sm:$0xff]  ;;  %v4219_v58 = vld [vmem:[%s4780_s29 + $0x1f8] sm:$0xff] }
 0x148   : > { %3493 = vmatpush3.bf16.msra.mxu0 %v3853_v7  ;;  %3626 = vmatpush3.bf16.msra.mxu1 %v3853_v7  ;;  %v833_v47 = vmul.f32 %v4192_v46, %v4017_v32  ;;  %v835_v53 = vmul.f32 %v4195_v52, %v4017_v32  ;;  %v832_v1 = vmul.f32 %v4196_v0, %v4017_v32  ;;  %4030 = vrsqrt.f32 %v778_v62  ;;  %v4212_v44 = vld [vmem:[%s4780_s29 + $0x1a0] sm:$0xff]  ;;  %v4213_v46 = vld [vmem:[%s4780_s29 + $0x1b0] sm:$0xff]  ;;  %v4216_v52 = vld [vmem:[%s4780_s29 + $0x1e8] sm:$0xff] }
 0x149   : > { %3494 = vmatprep.subr.bf16.mxu0 %v3854_v12  ;;  %3619 = vmatprep.subr.bf16.mxu1 %v3854_v12  ;;  %v4019_v36 = vpop.eup %4018  ;;  %v834_v4 = vmul.f32 %v4197_v3, %v4017_v32  ;;  %v4202_v12 = vld [vmem:[%s4780_s29 + $0x158] sm:$0xff]  ;;  %v4209_v32 = vld [vmem:[%s4780_s29 + $0x188] sm:$0xff]  ;;  %v4220_v0 = vld [vmem:[%s4780_s29 + $0x1e0] sm:$0xff] }
 0x14a   : > { %v829_v49 = vmul.f32 %v4193_v48, %v4019_v36  ;;  %v831_v51 = vmul.f32 %v4194_v50, %v4019_v36  ;;  %v828_v6 = vmul.f32 %v4198_v5, %v4019_v36  ;;  %v830_v7 = vmul.f32 %v4199_v2, %v4019_v36  ;;  %v4211_v36 = vld [vmem:[%s4780_s29 + $0x1b8] sm:$0xff]  ;;  %v4214_v48 = vld [vmem:[%s4780_s29 + $0x180] sm:$0xff]  ;;  %v4215_v50 = vld [vmem:[%s4780_s29 + $0x190] sm:$0xff] }
 0x14b   : > { %v4221_v3 = vld [vmem:[%s4780_s29 + $0x1c0] sm:$0xff]  ;;  %v4222_v5 = vld [vmem:[%s4780_s29 + $0x1d0] sm:$0xff] }
 0x14c   : > { %3495 = vmatpush3.bf16.msra.mxu0 %v3855_v27  ;;  %3627 = vmatpush3.bf16.msra.mxu1 %v3855_v27  ;;  %v4021_v59 = vpop.eup %4020  ;;  %v877_v60 = vpack.c.bf16 %v833_v47, %v829_v49  ;;  %v879_v61 = vpack.c.bf16 %v835_v53, %v831_v51  ;;  %v876_v16 = vpack.c.bf16 %v832_v1, %v828_v6  ;;  %v4223_v2 = vld [vmem:[%s4780_s29 + $0x1f0] sm:$0xff] }
 0x14d   : > { %3496 = vmatprep.subr.bf16.mxu0 %v3856_v28  ;;  %3620 = vmatprep.subr.bf16.mxu1 %v3856_v28  ;;  %v4023_v63 = vpop.eup %4022  ;;  %v841_v9 = vmul.f32 %v4200_v8, %v4021_v59  ;;  %v843_v15 = vmul.f32 %v4203_v14, %v4021_v59  ;;  %v878_v17 = vpack.c.bf16 %v834_v4, %v830_v7  ;;  %v4207_v28 = vld [vmem:[%s4780_s29 + $0x170] sm:$0xff]  ;;  %v3862_v14 = vld [vmem:[#allocation7 + $0x40] sm:$0xff]  }
 0x14e   : > { %1341 = vmatmul.mubr.bf16.gmra.mxu0 %v868_v29  ;;  %1454 = vmatmul.mubr.bf16.gmra.mxu1 %v870_v30  ;;  %v837_v11 = vmul.f32 %v4201_v10, %v4023_v63  ;;  %v839_v13 = vmul.f32 %v4202_v12, %v4023_v63  ;;  %v836_v23 = vmul.f32 %v4204_v22, %v4023_v63  ;;  %v4208_v30 = vld [vmem:[%s4780_s29 + $0x1a8] sm:$0xff]  ;;  %v3858_v10 = vld [vmem:[#allocation7 + $0x50] sm:$0xff]  }
 0x14f   : > { %1350 = vmatprep.mubr.bf16.mxu0 %v873_v33  ;;  %1463 = vmatprep.mubr.bf16.mxu1 %v875_v34  ;;  %v840_v25 = vmul.f32 %v4205_v24, %v4021_v59  ;;  %v838_v27 = vmul.f32 %v4206_v26, %v4023_v63  ;;  %v842_v29 = vmul.f32 %v4207_v28, %v4021_v59  ;;  %v4210_v34 = vld [vmem:[%s4780_s29 + $0x198] sm:$0xff]  ;;  %v3860_v12 = vld [vmem:[#allocation7 + $0x48] sm:$0xff]  }
 0x150   : > { %3497 = vmatpush3.bf16.msra.mxu0 %v3857_v37  ;;  %3628 = vmatpush3.bf16.msra.mxu1 %v3857_v37  ;;  %v881_v19 = vpack.c.bf16 %v841_v9, %v837_v11  ;;  %v883_v20 = vpack.c.bf16 %v843_v15, %v839_v13  ;;  %v3859_v11 = vld [vmem:[#allocation7 + $0x10] sm:$0xff]   ;;  %v3861_v13 = vld [vmem:[#allocation7 + $0x8] sm:$0xff]   ;;  %v3863_v15 = vld [vmem:[#allocation7] sm:$0xff]  }
 0x151   : > { %v4025_v18 = vpop.eup %4024  ;;  %v880_v38 = vpack.c.bf16 %v840_v25, %v836_v23  ;;  %v882_v39 = vpack.c.bf16 %v842_v29, %v838_v27  ;;  %3498 = vmatprep.subr.bf16.mxu0 %v3858_v10  ;;  %3621 = vmatprep.subr.bf16.mxu1 %v3858_v10 }
 0x152   : > { %v4027_v21 = vpop.eup %4026  ;;  %v849_v31 = vmul.f32 %v4208_v30, %v4025_v18  ;;  %v851_v37 = vmul.f32 %v4211_v36, %v4025_v18  ;;  %v848_v45 = vmul.f32 %v4212_v44, %v4025_v18  ;;  %v850_v47 = vmul.f32 %v4213_v46, %v4025_v18 }
 0x153   : > { %v845_v33 = vmul.f32 %v4209_v32, %v4027_v21  ;;  %v847_v35 = vmul.f32 %v4210_v34, %v4027_v21  ;;  %v844_v49 = vmul.f32 %v4214_v48, %v4027_v21  ;;  %v846_v51 = vmul.f32 %v4215_v50, %v4027_v21  ;;  %v956_v21 = vld [vmem:[%s5428_s2] sm:$0x3] }
 0x154   : > { %v4029_v40 = vpop.eup %4028  ;;  %3499 = vmatpush3.bf16.msra.mxu0 %v3859_v11  ;;  %3629 = vmatpush3.bf16.msra.mxu1 %v3859_v11 }
 0x155   : > { %v885_v41 = vpack.c.bf16 %v849_v31, %v845_v33  ;;  %v887_v42 = vpack.c.bf16 %v851_v37, %v847_v35  ;;  %v4031_v43 = vpop.eup %4030  ;;  %v857_v53 = vmul.f32 %v4216_v52, %v4029_v40  ;;  %v859_v59 = vmul.f32 %v4219_v58, %v4029_v40  ;;  %3500 = vmatprep.subr.bf16.mxu0 %v3860_v12 }
 0x156   : > { %1351 = vmatmul.mubr.bf16.gmra.mxu0 %v872_v56  ;;  %1464 = vmatmul.mubr.bf16.gmra.mxu1 %v874_v57  ;;  %v853_v55 = vmul.f32 %v4217_v54, %v4031_v43  ;;  %v4218_v56 = vld [vmem:[%s4780_s29 + $0x1d8] sm:$0xff]  ;;  %v856_v1 = vmul.f32 %v4220_v0, %v4029_v40  ;;  %v852_v4 = vmul.f32 %v4221_v3, %v4031_v43  ;;  %s3486_s29 = sshll.u32 %s4629_s14, 11 }
 0x157   : > { %1360 = vmatprep.mubr.bf16.mxu0 %v877_v60  ;;  %1473 = vmatprep.mubr.bf16.mxu1 %v879_v61  ;;  %v855_v57 = vmul.f32 %v4218_v56, %v4031_v43  ;;  %v884_v60 = vpack.c.bf16 %v848_v45, %v844_v49  ;;  %v886_v61 = vpack.c.bf16 %v850_v47, %v846_v51  ;;  %v3882_v0 = vld [vmem:[#allocation10 + $0x74] ss:$8 sps:$4 sm:$0xff]   ;;  %s5168_s15 = scalar_lea.hbm %s5438_s12, %s3486_s29 }
 0x158   : > { %v889_v62 = vpack.c.bf16 %v857_v53, %v853_v55  ;;  %v854_v6 = vmul.f32 %v4222_v5, %v4031_v43  ;;  %v858_v7 = vmul.f32 %v4223_v2, %v4029_v40  ;;  %v888_v8 = vpack.c.bf16 %v856_v1, %v852_v4  ;;  %3622 = vmatprep.subr.bf16.mxu1 %v3860_v12 }
 0x159   : > { %v891_v63 = vpack.c.bf16 %v859_v59, %v855_v57  ;;  %3501 = vmatpush3.bf16.msra.mxu0 %v3861_v13  ;;  %3630 = vmatpush3.bf16.msra.mxu1 %v3861_v13 }
 0x15a   : > { %v890_v9 = vpack.c.bf16 %v858_v7, %v854_v6  ;;  %3502 = vmatprep.subr.bf16.mxu0 %v3862_v14  ;;  %3623 = vmatprep.subr.bf16.mxu1 %v3862_v14 }
 0x15d   : > { %3503 = vmatpush3.bf16.msra.mxu0 %v3863_v15  ;;  %3631 = vmatpush3.bf16.msra.mxu1 %v3863_v15 }
 0x15e   : > { %1361 = vmatmul.mubr.bf16.gmra.mxu0 %v876_v16  ;;  %1474 = vmatmul.mubr.bf16.gmra.mxu1 %v878_v17  ;;  %v3864_v16 = vld [vmem:[#allocation8 + $0x78] sm:$0xff]   ;;  %v958_v17 = vlaneseq }
 0x15f   : > { %1370 = vmatprep.mubr.bf16.mxu0 %v881_v19  ;;  %1483 = vmatprep.mubr.bf16.mxu1 %v883_v20 }
 0x160   : > { %3552 = vmatprep.subr.bf16.mxu1 %v3864_v16  ;;  %v4932_v18 = vshrl.u32 %v958_v17, 7  ;;  %2174 = vmatprep.subr.bf16.mxu0 %v3882_v0  ;;  %v3880_v16 = vld [vmem:[#allocation10 + $0x70] ss:$8 sps:$4 sm:$0xff]  }
 0x162   : > { %v4935_v19 = vsub.s32 1, %v4932_v18  ;;  %v4938_v20 = vsub.s32 0, %v4932_v18 }
 0x164   : > { %v4944_v22 = vrot.slane %v956_v21, %v4935_v19  ;;  %v4947_v23 = vrot.slane %v956_v21, %v4938_v20 }
 0x166   : > { %1371 = vmatmul.mubr.bf16.gmra.mxu0 %v880_v38  ;;  %1484 = vmatmul.mubr.bf16.gmra.mxu1 %v882_v39 }
 0x167   : > { %1380 = vmatprep.mubr.bf16.mxu0 %v885_v41  ;;  %1493 = vmatprep.mubr.bf16.mxu1 %v887_v42 }
 0x16e   : > { %1381 = vmatmul.mubr.bf16.gmra.mxu0 %v884_v60  ;;  %1494 = vmatmul.mubr.bf16.gmra.mxu1 %v886_v61 }
 0x16f   : > { %1390 = vmatprep.mubr.bf16.mxu0 %v889_v62  ;;  %1503 = vmatprep.mubr.bf16.mxu1 %v891_v63 }
 0x176   : > { %1391 = vmatmul.mubr.bf16.gmra.mxu0 %v888_v8  ;;  %1504 = vmatmul.mubr.bf16.gmra.mxu1 %v890_v9 }
 0x1fe   : > { %v1322_v24 = vpop.f32.mrf.mxu0  ;;  %v1435_v25 = vpop.f32.mrf.mxu1 }
 0x1ff   : > { %v1323_v29 = vadd.f32 %v1322_v24, %v4947_v23 }
 0x200   : > { %v1324_v26 = vpop.f32.mrf.mxu0  ;;  %v1437_v27 = vpop.f32.mrf.mxu1 }
 0x201   : > { %v1325_v28 = vadd.f32 %v1324_v26, %v4944_v22  ;;  %v1436_v38 = vadd.f32 %v1435_v25, %v1323_v29  ;;  %v3885_v25 = vld [vmem:[#allocation10 + $0x64] ss:$8 sps:$4 sm:$0xff]  }
 0x202   : > { %v1326_v30 = vpop.f32.mrf.mxu0  ;;  %v1439_v31 = vpop.f32.mrf.mxu1 }
 0x203   : > { %v1438_v32 = vadd.f32 %v1437_v27, %v1325_v28  ;;  %v1327_v33 = vadd.f32 %v1326_v30, %v4947_v23 }
 0x204   : > { %v1328_v34 = vpop.f32.mrf.mxu0  ;;  %v1441_v35 = vpop.f32.mrf.mxu1 }
 0x205   : > { %v1440_v36 = vadd.f32 %v1439_v31, %v1327_v33  ;;  %v1329_v37 = vadd.f32 %v1328_v34, %v4944_v22  ;;  %4032 = vtanh.f32 %v1438_v32  ;;  %v3883_v32 = vld [vmem:[#allocation10 + $0x60] ss:$8 sps:$4 sm:$0xff]  }
 0x206   : > { %v1332_v39 = vpop.f32.mrf.mxu0  ;;  %v1445_v40 = vpop.f32.mrf.mxu1 }
 0x207   : > { %v1442_v41 = vadd.f32 %v1441_v35, %v1329_v37  ;;  %4034 = vtanh.f32 %v1440_v36  ;;  %v1333_v45 = vadd.f32 %v1332_v39, %v4947_v23  ;;  %v3888_v36 = vld [vmem:[#allocation10 + $0x54] ss:$8 sps:$4 sm:$0xff]  }
 0x208   : > { %v1334_v42 = vpop.f32.mrf.mxu0  ;;  %v1447_v43 = vpop.f32.mrf.mxu1 }
 0x209   : > { %4036 = vtanh.f32 %v1442_v41  ;;  %v1335_v44 = vadd.f32 %v1334_v42, %v4944_v22  ;;  %v1446_v54 = vadd.f32 %v1445_v40, %v1333_v45 }
 0x20a   : > { %4038 = vtanh.f32 %v1436_v38  ;;  %v1336_v46 = vpop.f32.mrf.mxu0  ;;  %v1449_v47 = vpop.f32.mrf.mxu1 }
 0x20b   : > { %v1448_v48 = vadd.f32 %v1447_v43, %v1335_v44  ;;  %v1337_v49 = vadd.f32 %v1336_v46, %v4947_v23 }
 0x20c   : > { %v1338_v50 = vpop.f32.mrf.mxu0  ;;  %v1451_v51 = vpop.f32.mrf.mxu1 }
 0x20d   : > { %v1450_v52 = vadd.f32 %v1449_v47, %v1337_v49  ;;  %v1339_v53 = vadd.f32 %v1338_v50, %v4944_v22  ;;  %4040 = vtanh.f32 %v1448_v48  ;;  %v3886_v47 = vld [vmem:[#allocation10 + $0x50] ss:$8 sps:$4 sm:$0xff]  }
 0x20e   : > { %v1342_v55 = vpop.f32.mrf.mxu0  ;;  %v1455_v56 = vpop.f32.mrf.mxu1 }
 0x20f   : > { %v1452_v57 = vadd.f32 %v1451_v51, %v1339_v53  ;;  %4042 = vtanh.f32 %v1450_v52  ;;  %v1343_v61 = vadd.f32 %v1342_v55, %v4947_v23  ;;  %v3891_v51 = vld [vmem:[#allocation10 + $0x44] ss:$8 sps:$4 sm:$0xff]  }
 0x210   : > { %v1344_v58 = vpop.f32.mrf.mxu0  ;;  %v1457_v59 = vpop.f32.mrf.mxu1 }
 0x211   : > { %4044 = vtanh.f32 %v1452_v57  ;;  %v1345_v60 = vadd.f32 %v1344_v58, %v4944_v22  ;;  %v1456_v10 = vadd.f32 %v1455_v56, %v1343_v61  ;;  %v3889_v58 = vld [vmem:[#allocation10 + $0x40] ss:$8 sps:$4 sm:$0xff]  }
 0x212   : > { %4046 = vtanh.f32 %v1446_v54  ;;  %v1346_v62 = vpop.f32.mrf.mxu0  ;;  %v1459_v63 = vpop.f32.mrf.mxu1 }
 0x213   : > { %v1458_v1 = vadd.f32 %v1457_v59, %v1345_v60  ;;  %v1347_v3 = vadd.f32 %v1346_v62, %v4947_v23  ;;  %v4033_v4 = vpop.eup %4032  ;;  %v3894_v62 = vld [vmem:[#allocation10 + $0x34] ss:$8 sps:$4 sm:$0xff]  }
 0x214   : > { %v1348_v5 = vpop.f32.mrf.mxu0  ;;  %v1461_v6 = vpop.f32.mrf.mxu1 }
 0x215   : > { %v4035_v2 = vpop.eup %4034  ;;  %v1460_v7 = vadd.f32 %v1459_v63, %v1347_v3  ;;  %v1349_v8 = vadd.f32 %v1348_v5, %v4944_v22  ;;  %4048 = vtanh.f32 %v1458_v1 }
 0x216   : > { %v4037_v9 = vpop.eup %4036  ;;  %v1352_v11 = vpop.f32.mrf.mxu0 }
 0x217   : > { %v1465_v12 = vpop.f32.mrf.mxu1  ;;  %v4039_v13 = vpop.eup %4038  ;;  %v1462_v14 = vadd.f32 %v1461_v6, %v1349_v8  ;;  %v4961_v15 = vpack.c.bf16 %v4037_v9, %v4033_v4  ;;  %4050 = vtanh.f32 %v1460_v7  ;;  %v1353_v27 = vadd.f32 %v1352_v11, %v4947_v23  ;;  %v3892_v9 = vld [vmem:[#allocation10 + $0x30] ss:$8 sps:$4 sm:$0xff]  }
 0x218   : > { %v1354_v17 = vpop.f32.mrf.mxu0  ;;  %v4963_v24 = vpack.c.bf16 %v4035_v2, %v4039_v13 }
 0x219   : > { %v1467_v21 = vpop.f32.mrf.mxu1  ;;  %4052 = vtanh.f32 %v1462_v14  ;;  %v1355_v26 = vadd.f32 %v1354_v17, %v4944_v22  ;;  %1729 = vmatprep.mubr.bf16.mxu0 %v4961_v15  ;;  %v1466_v41 = vadd.f32 %v1465_v12, %v1353_v27 }
 0x21a   : > { %4054 = vtanh.f32 %v1456_v10  ;;  %v1356_v28 = vpop.f32.mrf.mxu0  ;;  %1730 = vmatmul.mubr.bf16.vlgmr.msra.gmra.mxu0 %v4963_v24  ;;  %v4041_v33 = vpop.eup %4040 }
 0x21b   : > { %v1469_v29 = vpop.f32.mrf.mxu1  ;;  %v1468_v30 = vadd.f32 %v1467_v21, %v1355_v26  ;;  %v1357_v31 = vadd.f32 %v1356_v28, %v4947_v23  ;;  %2175 = vmatpush1.bf16.msra.mxu0 %v3880_v16 }
 0x21c   : > { %v1358_v34 = vpop.f32.mrf.mxu0  ;;  %2176 = vmatprep.subr.bf16.mxu0 %v3885_v25  ;;  %v4043_v37 = vpop.eup %4042 }
 0x21d   : > { %v1471_v35 = vpop.f32.mrf.mxu1  ;;  %v1470_v38 = vadd.f32 %v1469_v29, %v1357_v31  ;;  %v1359_v39 = vadd.f32 %v1358_v34, %v4944_v22  ;;  %4056 = vtanh.f32 %v1468_v30 }
 0x21e   : > { %v4045_v40 = vpop.eup %4044  ;;  %v1362_v42 = vpop.f32.mrf.mxu0 }
 0x21f   : > { %v1475_v43 = vpop.f32.mrf.mxu1  ;;  %v4047_v44 = vpop.eup %4046  ;;  %v1472_v45 = vadd.f32 %v1471_v35, %v1359_v39  ;;  %v4971_v46 = vpack.c.bf16 %v4045_v40, %v4041_v33  ;;  %2177 = vmatpush1.bf16.msra.mxu0 %v3883_v32  ;;  %4058 = vtanh.f32 %v1470_v38  ;;  %v1363_v53 = vadd.f32 %v1362_v42, %v4947_v23 }
 0x220   : > { %v1364_v48 = vpop.f32.mrf.mxu0  ;;  %v4973_v50 = vpack.c.bf16 %v4043_v37, %v4047_v44  ;;  %2178 = vmatprep.subr.bf16.mxu0 %v3888_v36 }
 0x221   : > { %v1477_v49 = vpop.f32.mrf.mxu1  ;;  %4060 = vtanh.f32 %v1472_v45  ;;  %v1365_v52 = vadd.f32 %v1364_v48, %v4944_v22  ;;  %1737 = vmatprep.mubr.bf16.mxu0 %v4971_v46  ;;  %v1476_v4 = vadd.f32 %v1475_v43, %v1363_v53 }
 0x222   : > { %4062 = vtanh.f32 %v1466_v41  ;;  %v1366_v54 = vpop.f32.mrf.mxu0  ;;  %1738 = vmatmul.mubr.bf16.gmra.mxu0 %v4973_v50  ;;  %v4049_v59 = vpop.eup %4048 }
 0x223   : > { %v1479_v55 = vpop.f32.mrf.mxu1  ;;  %v1478_v56 = vadd.f32 %v1477_v49, %v1365_v52  ;;  %v1367_v57 = vadd.f32 %v1366_v54, %v4947_v23  ;;  %2179 = vmatpush1.bf16.msra.mxu0 %v3886_v47 }
 0x224   : > { %v1368_v60 = vpop.f32.mrf.mxu0  ;;  %2180 = vmatprep.subr.bf16.mxu0 %v3891_v51  ;;  %v4051_v63 = vpop.eup %4050 }
 0x225   : > { %v1481_v61 = vpop.f32.mrf.mxu1  ;;  %v1480_v0 = vadd.f32 %v1479_v55, %v1367_v57  ;;  %v1369_v1 = vadd.f32 %v1368_v60, %v4944_v22  ;;  %4064 = vtanh.f32 %v1478_v56 }
 0x226   : > { %v4053_v3 = vpop.eup %4052  ;;  %v1372_v5 = vpop.f32.mrf.mxu0 }
 0x227   : > { %v1485_v6 = vpop.f32.mrf.mxu1  ;;  %v4055_v2 = vpop.eup %4054  ;;  %v1482_v7 = vadd.f32 %v1481_v61, %v1369_v1  ;;  %v4981_v8 = vpack.c.bf16 %v4053_v3, %v4049_v59  ;;  %2181 = vmatpush1.bf16.msra.mxu0 %v3889_v58  ;;  %4066 = vtanh.f32 %v1480_v0  ;;  %v1373_v14 = vadd.f32 %v1372_v5, %v4947_v23 }
 0x228   : > { %v1374_v10 = vpop.f32.mrf.mxu0  ;;  %v4983_v12 = vpack.c.bf16 %v4051_v63, %v4055_v2  ;;  %2182 = vmatprep.subr.bf16.mxu0 %v3894_v62  ;;  %v3865_v63 = vld [vmem:[#allocation8 + $0x38] sm:$0xff]  }
 0x229   : > { %v1487_v11 = vpop.f32.mrf.mxu1  ;;  %4068 = vtanh.f32 %v1482_v7  ;;  %v1375_v13 = vadd.f32 %v1374_v10, %v4944_v22  ;;  %1745 = vmatprep.mubr.bf16.mxu0 %v4981_v8  ;;  %v1486_v33 = vadd.f32 %v1485_v6, %v1373_v14 }
 0x22a   : > { %4070 = vtanh.f32 %v1476_v4  ;;  %v1376_v16 = vpop.f32.mrf.mxu0  ;;  %1746 = vmatmul.mubr.bf16.gmra.mxu0 %v4983_v12  ;;  %v4057_v26 = vpop.eup %4056  ;;  %v3866_v4 = vld [vmem:[#allocation8 + $0x70] sm:$0xff]  }
 0x22b   : > { %v1489_v17 = vpop.f32.mrf.mxu1  ;;  %v1488_v21 = vadd.f32 %v1487_v11, %v1375_v13  ;;  %v1377_v25 = vadd.f32 %v1376_v16, %v4947_v23  ;;  %2183 = vmatpush1.bf16.msra.mxu0 %v3892_v9  ;;  %v3867_v11 = vld [vmem:[#allocation8 + $0x30] sm:$0xff]   ;;  %v3868_v16 = vld [vmem:[#allocation8 + $0x68] sm:$0xff]  }
 0x22c   : > { %v1378_v27 = vpop.f32.mrf.mxu0  ;;  %v4059_v29 = vpop.eup %4058 }
 0x22d   : > { %v1491_v28 = vpop.f32.mrf.mxu1  ;;  %v1490_v30 = vadd.f32 %v1489_v17, %v1377_v25  ;;  %v1379_v31 = vadd.f32 %v1378_v27, %v4944_v22  ;;  %4072 = vtanh.f32 %v1488_v21 }
 0x22e   : > { %v4061_v32 = vpop.eup %4060  ;;  %v1382_v34 = vpop.f32.mrf.mxu0 }
 0x22f   : > { %v1495_v35 = vpop.f32.mrf.mxu1  ;;  %v4063_v36 = vpop.eup %4062  ;;  %v1492_v37 = vadd.f32 %v1491_v28, %v1379_v31  ;;  %v4991_v38 = vpack.c.bf16 %v4061_v32, %v4057_v26  ;;  %4074 = vtanh.f32 %v1490_v30  ;;  %v1383_v43 = vadd.f32 %v1382_v34, %v4947_v23 }
 0x230   : > { %v1384_v39 = vpop.f32.mrf.mxu0  ;;  %v4993_v41 = vpack.c.bf16 %v4059_v29, %v4063_v36 }
 0x231   : > { %v1497_v40 = vpop.f32.mrf.mxu1  ;;  %4076 = vtanh.f32 %v1492_v37  ;;  %v1385_v42 = vadd.f32 %v1384_v39, %v4944_v22  ;;  %1753 = vmatprep.mubr.bf16.mxu0 %v4991_v38  ;;  %v1496_v57 = vadd.f32 %v1495_v35, %v1383_v43  ;;  %v3872_v35 = vld [vmem:[#allocation8 + $0x58] sm:$0xff]  }
 0x232   : > { %4078 = vtanh.f32 %v1486_v33  ;;  %v1386_v44 = vpop.f32.mrf.mxu0  ;;  %1754 = vmatmul.mubr.bf16.gmra.mxu0 %v4993_v41  ;;  %v4065_v49 = vpop.eup %4064  ;;  %v3870_v33 = vld [vmem:[#allocation8 + $0x60] sm:$0xff]  }
 0x233   : > { %v1499_v45 = vpop.f32.mrf.mxu1  ;;  %v1498_v47 = vadd.f32 %v1497_v40, %v1385_v42  ;;  %v1387_v48 = vadd.f32 %v1386_v44, %v4947_v23  ;;  %v3873_v42 = vld [vmem:[#allocation8 + $0x18] sm:$0xff]   ;;  %v3874_v44 = vld [vmem:[#allocation8 + $0x50] sm:$0xff]  }
 0x234   : > { %v1388_v51 = vpop.f32.mrf.mxu0  ;;  %v4067_v53 = vpop.eup %4066 }
 0x235   : > { %v1501_v52 = vpop.f32.mrf.mxu1  ;;  %v1500_v54 = vadd.f32 %v1499_v45, %v1387_v48  ;;  %v1389_v55 = vadd.f32 %v1388_v51, %v4944_v22  ;;  %4080 = vtanh.f32 %v1498_v47  ;;  %v3875_v45 = vld [vmem:[#allocation8 + $0x10] sm:$0xff]   ;;  %v3876_v48 = vld [vmem:[#allocation8 + $0x48] sm:$0xff]  }
 0x236   : > { %v4069_v56 = vpop.eup %4068  ;;  %v1392_v58 = vpop.f32.mrf.mxu0 }
 0x237   : > { %v1505_v59 = vpop.f32.mrf.mxu1  ;;  %v4071_v60 = vpop.eup %4070  ;;  %v1502_v61 = vadd.f32 %v1501_v52, %v1389_v55  ;;  %v5001_v62 = vpack.c.bf16 %v4069_v56, %v4065_v49  ;;  %4082 = vtanh.f32 %v1500_v54  ;;  %v1393_v6 = vadd.f32 %v1392_v58, %v4947_v23  ;;  %v3877_v54 = vld [vmem:[#allocation8 + $0x8] sm:$0xff]   ;;  %v3878_v56 = vld [vmem:[#allocation8 + $0x40] sm:$0xff]  }
 0x238   : > { %v1394_v0 = vpop.f32.mrf.mxu0  ;;  %v5003_v3 = vpack.c.bf16 %v4067_v53, %v4071_v60  ;;  %v3897_v58 = vld [vmem:[#allocation10 + $0x24] ss:$8 sps:$4 sm:$0xff]   ;;  %v3900_v60 = vld [vmem:[#allocation10 + $0x14] ss:$8 sps:$4 sm:$0xff]  }
 0x239   : > { %v1507_v1 = vpop.f32.mrf.mxu1  ;;  %4084 = vtanh.f32 %v1502_v61  ;;  %v1395_v5 = vadd.f32 %v1394_v0, %v4944_v22  ;;  %1761 = vmatprep.mubr.bf16.mxu1 %v5001_v62  ;;  %v1506_v27 = vadd.f32 %v1505_v59, %v1393_v6  ;;  %v3895_v59 = vld [vmem:[#allocation10 + $0x20] ss:$8 sps:$4 sm:$0xff]   ;;  %2184 = vmatprep.subr.bf16.mxu0 %v3897_v58  ;;  %v3898_v61 = vld [vmem:[#allocation10 + $0x10] ss:$8 sps:$4 sm:$0xff]   ;;  %v3939_v58 = vld [vmem:[#allocation11 + $0x4c] ss:$16 sps:$4 sm:$0xff]  }
 0x23a   : > { %4086 = vtanh.f32 %v1496_v57  ;;  %v1396_v2 = vpop.f32.mrf.mxu0  ;;  %1762 = vmatmul.mubr.bf16.vlgmr.msra.gmra.mxu1 %v5003_v3  ;;  %v4073_v13 = vpop.eup %4072  ;;  %v3879_v57 = vld [vmem:[#allocation8] sm:$0xff]   ;;  %2185 = vmatpush1.bf16.msra.mxu0 %v3895_v59 }
 0x23b   : > { %v1509_v7 = vpop.f32.mrf.mxu1  ;;  %v1508_v9 = vadd.f32 %v1507_v1, %v1395_v5  ;;  %v1397_v10 = vadd.f32 %v1396_v2, %v4947_v23  ;;  %3553 = vmatpush3.bf16.msra.mxu1 %v3865_v63  ;;  %v3869_v23 = vld [vmem:[#allocation8 + $0x28] sm:$0xff]   ;;  %2186 = vmatprep.subr.bf16.mxu0 %v3900_v60  ;;  %v3912_v1 = vld [vmem:[#allocation11 + $0xc4] ss:$16 sps:$4 sm:$0xff]   ;;  %v3910_v5 = vld [vmem:[#allocation11 + $0xc0] ss:$16 sps:$4 sm:$0xff]  }
 0x23c   : > { %v1398_v14 = vpop.f32.mrf.mxu0  ;;  %3554 = vmatprep.subr.bf16.mxu1 %v3866_v4  ;;  %v4075_v17 = vpop.eup %4074  ;;  %v3903_v63 = vld [vmem:[#allocation10 + $0x4] ss:$8 sps:$4 sm:$0xff]   ;;  %v3901_v0 = vld [vmem:[#allocation10] ss:$8 sps:$4 sm:$0xff]  }
 0x23d   : > { %v1510_v21 = vadd.f32 %v1509_v7, %v1397_v10  ;;  %v1399_v25 = vadd.f32 %v1398_v14, %v4944_v22  ;;  %v1511_v28 = vpop.f32.mrf.mxu1  ;;  %4088 = vtanh.f32 %v1508_v9  ;;  %v3871_v22 = vld [vmem:[#allocation8 + $0x20] sm:$0xff]  }
 0x23e   : > { %v4077_v26 = vpop.eup %4076  ;;  %2187 = vmatpush1.bf16.msra.mxu0 %v3898_v61  ;;  %v3918_v2 = vld [vmem:[#allocation11 + $0xa4] ss:$16 sps:$4 sm:$0xff]   ;;  %v3940_v59 = vld [vmem:[#allocation11 + $0x20] ss:$16 sps:$4 sm:$0xff]  }
 0x23f   : > { %v4079_v29 = vpop.eup %4078  ;;  %v1512_v30 = vadd.f32 %v1511_v28, %v1399_v25  ;;  %3555 = vmatpush3.bf16.msra.mxu1 %v3867_v11  ;;  %v5011_v31 = vpack.c.bf16 %v4077_v26, %v4073_v13  ;;  %4090 = vtanh.f32 %v1510_v21  ;;  %2188 = vmatprep.subr.bf16.mxu0 %v3903_v63  ;;  %v3907_v11 = vld [vmem:[#allocation11 + $0xe8] ss:$16 sps:$4 sm:$0xff]   ;;  %v3924_v25 = vld [vmem:[#allocation11 + $0x84] ss:$16 sps:$4 sm:$0xff]  }
 0x240   : > { %v5013_v32 = vpack.c.bf16 %v4075_v17, %v4079_v29  ;;  %3556 = vmatprep.subr.bf16.mxu1 %v3868_v16  ;;  %v3915_v16 = vld [vmem:[#allocation11 + $0xcc] ss:$16 sps:$4 sm:$0xff]   ;;  %v3916_v17 = vld [vmem:[#allocation11 + $0xa0] ss:$16 sps:$4 sm:$0xff]   ;;  %v3913_v28 = vld [vmem:[#allocation11 + $0xc8] ss:$16 sps:$4 sm:$0xff]  }
 0x241   : > { %4092 = vtanh.f32 %v1512_v30  ;;  %1769 = vmatprep.mubr.bf16.mxu1 %v5011_v31  ;;  %v3921_v30 = vld [vmem:[#allocation11 + $0xac] ss:$16 sps:$4 sm:$0xff]   ;;  %v3948_v61 = vld [vmem:[#allocation11 + $0x4] ss:$16 sps:$4 sm:$0xff]  }
 0x242   : > { %4094 = vtanh.f32 %v1506_v27  ;;  %1770 = vmatmul.mubr.bf16.gmra.mxu1 %v5013_v32  ;;  %v4081_v34 = vpop.eup %4080  ;;  %2189 = vmatpush1.bf16.msra.mxu0 %v3901_v0 }
 0x243   : > { %3557 = vmatpush3.bf16.msra.mxu1 %v3869_v23 }
 0x244   : > { %3558 = vmatprep.subr.bf16.mxu1 %v3870_v33  ;;  %v4083_v36 = vpop.eup %4082 }
 0x246   : > { %v4085_v37 = vpop.eup %4084 }
 0x247   : > { %v4087_v39 = vpop.eup %4086  ;;  %3559 = vmatpush3.bf16.msra.mxu1 %v3871_v22  ;;  %v1559_v40 = vpack.c.bf16 %v4085_v37, %v4081_v34  ;;  %v3919_v34 = vld [vmem:[#allocation11 + $0xa8] ss:$16 sps:$4 sm:$0xff]   ;;  %v3927_v37 = vld [vmem:[#allocation11 + $0x8c] ss:$16 sps:$4 sm:$0xff]  }
 0x248   : > { %v1558_v43 = vpack.c.bf16 %v4083_v36, %v4087_v39  ;;  %3560 = vmatprep.subr.bf16.mxu1 %v3872_v35  ;;  %v3928_v39 = vld [vmem:[#allocation11 + $0x60] ss:$16 sps:$4 sm:$0xff]  }
 0x249   : > { %1777 = vmatprep.mubr.bf16.mxu1 %v1559_v40 }
 0x24a   : > { %1778 = vmatmul.mubr.bf16.gmra.mxu1 %v1558_v43  ;;  %v4089_v47 = vpop.eup %4088 }
 0x24b   : > { %3561 = vmatpush3.bf16.msra.mxu1 %v3873_v42  ;;  %v3936_v42 = vld [vmem:[#allocation11 + $0x44] ss:$16 sps:$4 sm:$0xff]  }
 0x24c   : > { %3562 = vmatprep.subr.bf16.mxu1 %v3874_v44  ;;  %v4091_v49 = vpop.eup %4090 }
 0x24e   : > { %v4093_v51 = vpop.eup %4092 }
 0x24f   : > { %v4095_v52 = vpop.eup %4094  ;;  %3563 = vmatpush3.bf16.msra.mxu1 %v3875_v45  ;;  %v1561_v53 = vpack.c.bf16 %v4093_v51, %v4089_v47  ;;  %v3925_v45 = vld [vmem:[#allocation11 + $0x88] ss:$16 sps:$4 sm:$0xff]  }
 0x250   : > { %v1560_v55 = vpack.c.bf16 %v4091_v49, %v4095_v52  ;;  %3564 = vmatprep.subr.bf16.mxu1 %v3876_v48  ;;  %v3933_v48 = vld [vmem:[#allocation11 + $0x6c] ss:$16 sps:$4 sm:$0xff]   ;;  %v3934_v49 = vld [vmem:[#allocation11 + $0x40] ss:$16 sps:$4 sm:$0xff]   ;;  %v3942_v52 = vld [vmem:[#allocation11 + $0x24] ss:$16 sps:$4 sm:$0xff]  }
 0x251   : > { %1785 = vmatprep.mubr.bf16.mxu1 %v1561_v53 }
 0x252   : > { %1786 = vmatmul.mubr.bf16.gmra.mxu1 %v1560_v55 }
 0x253   : > { %3565 = vmatpush3.bf16.msra.mxu1 %v3877_v54  ;;  %1961 = vmatprep.mubr.bf16.mxu1 %v4961_v15  ;;  %v4530_v15 = vmov 0  }
 0x254   : > { %3566 = vmatprep.subr.bf16.mxu1 %v3878_v56  ;;  %2206 = vmatprep.mubr.bf16.mxu0 %v4530_v15 }
 0x257   : > { %3567 = vmatpush3.bf16.msra.mxu1 %v3879_v57 }
 0x25a   : > { %1962 = vmatmul.mubr.bf16.vlgmr.msra.gmra.mxu1 %v4963_v24 }
 0x25b   : > { %1969 = vmatprep.mubr.bf16.mxu1 %v4971_v46  ;;  %v5034_v46 = vld [vmem:[%s5430_s4] ss:$0 sm:$0xff] }
 0x262   : > { %1970 = vmatmul.mubr.bf16.gmra.mxu1 %v4973_v50 }
 0x263   : > { %1977 = vmatprep.mubr.bf16.mxu1 %v4981_v8 }
 0x26a   : > { %1978 = vmatmul.mubr.bf16.gmra.mxu1 %v4983_v12  ;;  %v3904_v12 = vld [vmem:[#allocation11 + $0xe0] ss:$16 sps:$4 sm:$0xff]  }
 0x26b   : > { %1985 = vmatprep.mubr.bf16.mxu1 %v4991_v38  ;;  %v3906_v38 = vld [vmem:[#allocation11 + $0xe4] ss:$16 sps:$4 sm:$0xff]  }
 0x26c   : > { %2741 = vmatprep.subr.bf16.mxu1 %v3906_v38 }
 0x26d   : > { %2742 = vmatpush1.bf16.msra.mxu1 %v3904_v12  ;;  %v3946_v12 = vld [vmem:[#allocation11] ss:$16 sps:$4 sm:$0xff]  }
 0x26e   : > { %2743 = vmatprep.subr.bf16.mxu1 %v3912_v1 }
 0x271   : > { %2744 = vmatpush1.bf16.msra.mxu1 %v3910_v5 }
 0x272   : > { %1986 = vmatmul.mubr.bf16.gmra.mxu1 %v4993_v41  ;;  %2745 = vmatprep.subr.bf16.mxu1 %v3918_v2  ;;  %v3952_v2 = vld [vmem:[#allocation11 + $0x1e0] ss:$16 sps:$4 sm:$0xff]  }
 0x273   : > { %1993 = vmatprep.mubr.bf16.mxu1 %v5001_v62  ;;  %v3909_v62 = vld [vmem:[#allocation11 + $0xec] ss:$16 sps:$4 sm:$0xff]  }
 0x274   : > { %2854 = vmatprep.subr.bf16.mxu0 %v3909_v62 }
 0x275   : > { %2746 = vmatpush1.bf16.msra.mxu1 %v3916_v17  ;;  %v3958_v17 = vld [vmem:[#allocation11 + $0x1c0] ss:$16 sps:$4 sm:$0xff]  }
 0x276   : > { %2747 = vmatprep.subr.bf16.mxu1 %v3924_v25 }
 0x27a   : > { %1994 = vmatmul.mubr.bf16.gmra.mxu1 %v5003_v3 }
 0x27b   : > { %2001 = vmatprep.mubr.bf16.mxu1 %v5011_v31  ;;  %v3922_v31 = vld [vmem:[#allocation11 + $0x80] ss:$16 sps:$4 sm:$0xff]  }
 0x27c   : > { %2748 = vmatpush1.bf16.msra.mxu1 %v3922_v31 }
 0x282   : > { %2002 = vmatmul.mubr.bf16.gmra.mxu1 %v5013_v32  ;;  %v3930_v32 = vld [vmem:[#allocation11 + $0x64] ss:$16 sps:$4 sm:$0xff]  }
 0x283   : > { %2009 = vmatprep.mubr.bf16.mxu1 %v1559_v40  ;;  %2749 = vmatprep.subr.bf16.mxu1 %v3930_v32 }
 0x284   : > { %2750 = vmatpush1.bf16.msra.mxu1 %v3928_v39 }
 0x285   : > { %2751 = vmatprep.subr.bf16.mxu1 %v3936_v42 }
 0x288   : > { %2752 = vmatpush1.bf16.msra.mxu1 %v3934_v49 }
 0x289   : > { %2753 = vmatprep.subr.bf16.mxu1 %v3942_v52 }
 0x28a   : > { %2010 = vmatmul.mubr.bf16.gmra.mxu1 %v1558_v43 }
 0x28b   : > { %2017 = vmatprep.mubr.bf16.mxu1 %v1561_v53 }
 0x28c   : > { %2754 = vmatpush1.bf16.msra.mxu1 %v3940_v59 }
 0x28d   : > { %2755 = vmatprep.subr.bf16.mxu1 %v3948_v61 }
 0x290   : > { %2756 = vmatpush1.bf16.msra.mxu1 %v3946_v12 }
 0x292   : > { %2018 = vmatmul.mubr.bf16.gmra.mxu1 %v1560_v55  ;;  %v3931_v55 = vld [vmem:[#allocation11 + $0x68] ss:$16 sps:$4 sm:$0xff]  }
 0x2da   : > { %v3504_v24 = vpop.f32.mrf.mxu0 }
 0x2dc   : > { %v3505_v50 = vpop.f32.mrf.mxu0 }
 0x2dd   : > { %v3506_v8 = vadd.f32 %v3505_v50, %v3504_v24  ;;  %v3937_v24 = vld [vmem:[#allocation11 + $0x48] ss:$16 sps:$4 sm:$0xff]  }
 0x2de   : > { %v3507_v41 = vpop.f32.mrf.mxu0 }
 0x2df   : > { %v1732_v3 = vadd.f32 %v3506_v8, %v5034_v46  ;;  %v3945_v8 = vld [vmem:[#allocation11 + $0x2c] ss:$16 sps:$4 sm:$0xff]  }
 0x2e0   : > { %v3508_v4 = vpop.f32.mrf.mxu0 }
 0x2e1   : > { %2026 = vst [vmem:[%s5039_s23] sm:$0xff] %v1732_v3  ;;  %v3509_v6 = vadd.f32 %v3508_v4, %v3507_v41  ;;  %v3954_v41 = vld [vmem:[#allocation11 + $0x1e4] ss:$16 sps:$4 sm:$0xff]  }
 0x2e2   : > { %v3510_v7 = vpop.f32.mrf.mxu0  ;;  %2757 = vmatprep.subr.bf16.mxu1 %v3954_v41 }
 0x2e3   : > { %v1735_v9 = vadd.f32 %v3509_v6, %v5034_v46  ;;  %v3951_v6 = vld [vmem:[#allocation11 + $0xc] ss:$16 sps:$4 sm:$0xff]   ;;  %2758 = vmatpush2.bf16.msra.mxu1 %v3952_v2 }
 0x2e4   : > { %v3511_v10 = vpop.f32.mrf.mxu0 }
 0x2e5   : > { %2027 = vst [vmem:[%s5039_s23 + $0x8] sm:$0xff] %v1735_v9  ;;  %v2058_v13 = vpack.c.bf16 %v1735_v9, %v1732_v3  ;;  %v3512_v14 = vadd.f32 %v3511_v10, %v3510_v7  ;;  %v3943_v3 = vld [vmem:[#allocation11 + $0x28] ss:$16 sps:$4 sm:$0xff]   ;;  %v3960_v9 = vld [vmem:[#allocation11 + $0x1c4] ss:$16 sps:$4 sm:$0xff]  }
 0x2e6   : > { %v3513_v21 = vpop.f32.mrf.mxu0  ;;  %2759 = vmatprep.subr.bf16.mxu1 %v3960_v9  ;;  %v3972_v9 = vld [vmem:[#allocation11 + $0x184] ss:$16 sps:$4 sm:$0xff]  }
 0x2e7   : > { %v1740_v26 = vadd.f32 %v3512_v14, %v5034_v46  ;;  %2207 = vmatmul.mubr.bf16.vlgmr.msra.gmra.mxu0 %v2058_v13  ;;  %v3949_v13 = vld [vmem:[#allocation11 + $0x8] ss:$16 sps:$4 sm:$0xff]   ;;  %2760 = vmatpush2.bf16.msra.mxu1 %v3958_v17 }
 0x2e8   : > { %v3514_v27 = vpop.f32.mrf.mxu0  ;;  %2216 = vmatprep.mubr.bf16.mxu0 %v4530_v15  ;;  %2855 = vmatpush1.bf16.msra.mxu0 %v3907_v11 }
 0x2e9   : > { %2028 = vst [vmem:[%s5039_s23 + $0x10] sm:$0xff] %v1740_v26  ;;  %v3515_v29 = vadd.f32 %v3514_v27, %v3513_v21  ;;  %2856 = vmatprep.subr.bf16.mxu0 %v3915_v16  ;;  %v3957_v16 = vld [vmem:[#allocation11 + $0x1ec] ss:$16 sps:$4 sm:$0xff]   ;;  %v3955_v27 = vld [vmem:[#allocation11 + $0x1e8] ss:$16 sps:$4 sm:$0xff]  }
 0x2ea   : > { %v3516_v23 = vpop.f32.mrf.mxu0 }
 0x2eb   : > { %v1743_v33 = vadd.f32 %v3515_v29, %v5034_v46 }
 0x2ec   : > { %v3517_v22 = vpop.f32.mrf.mxu0  ;;  %2857 = vmatpush1.bf16.msra.mxu0 %v3913_v28 }
 0x2ed   : > { %2029 = vst [vmem:[%s5039_s23 + $0x18] sm:$0xff] %v1743_v33  ;;  %v3518_v35 = vadd.f32 %v3517_v22, %v3516_v23  ;;  %v2059_v36 = vpack.c.bf16 %v1743_v33, %v1740_v26  ;;  %2858 = vmatprep.subr.bf16.mxu0 %v3921_v30  ;;  %v3963_v30 = vld [vmem:[#allocation11 + $0x1cc] ss:$16 sps:$4 sm:$0xff]   ;;  %v3961_v33 = vld [vmem:[#allocation11 + $0x1c8] ss:$16 sps:$4 sm:$0xff]  }
 0x2ee   : > { %v3519_v40 = vpop.f32.mrf.mxu0 }
 0x2ef   : > { %v1748_v43 = vadd.f32 %v3518_v35, %v5034_v46  ;;  %2217 = vmatmul.mubr.bf16.gmra.mxu0 %v2059_v36 }
 0x2f0   : > { %v3520_v44 = vpop.f32.mrf.mxu0  ;;  %2226 = vmatprep.mubr.bf16.mxu0 %v4530_v15  ;;  %2859 = vmatpush1.bf16.msra.mxu0 %v3919_v34 }
 0x2f1   : > { %2030 = vst [vmem:[%s5039_s23 + $0x20] sm:$0xff] %v1748_v43  ;;  %v3521_v47 = vadd.f32 %v3520_v44, %v3519_v40  ;;  %2860 = vmatprep.subr.bf16.mxu0 %v3927_v37 }
 0x2f2   : > { %v3522_v51 = vpop.f32.mrf.mxu0 }
 0x2f3   : > { %v1751_v53 = vadd.f32 %v3521_v47, %v5034_v46 }
 0x2f4   : > { %v3523_v54 = vpop.f32.mrf.mxu0  ;;  %2861 = vmatpush1.bf16.msra.mxu0 %v3925_v45 }
 0x2f5   : > { %2031 = vst [vmem:[%s5039_s23 + $0x28] sm:$0xff] %v1751_v53  ;;  %v3524_v56 = vadd.f32 %v3523_v54, %v3522_v51  ;;  %v2060_v57 = vpack.c.bf16 %v1751_v53, %v1748_v43  ;;  %2862 = vmatprep.subr.bf16.mxu0 %v3933_v48 }
 0x2f6   : > { %v3525_v60 = vpop.f32.mrf.mxu0 }
 0x2f7   : > { %v1756_v63 = vadd.f32 %v3524_v56, %v5034_v46  ;;  %2227 = vmatmul.mubr.bf16.gmra.mxu0 %v2060_v57 }
 0x2f8   : > { %v3526_v0 = vpop.f32.mrf.mxu0  ;;  %2236 = vmatprep.mubr.bf16.mxu0 %v4530_v15  ;;  %2863 = vmatpush1.bf16.msra.mxu0 %v3931_v55 }
 0x2f9   : > { %2032 = vst [vmem:[%s5039_s23 + $0x30] sm:$0xff] %v1756_v63  ;;  %v3527_v50 = vadd.f32 %v3526_v0, %v3525_v60  ;;  %2864 = vmatprep.subr.bf16.mxu0 %v3939_v58  ;;  %v5081_v58 = vld [vmem:[%s5432_s6] ss:$0 sm:$0xff] }
 0x2fa   : > { %v3528_v38 = vpop.f32.mrf.mxu1 }
 0x2fb   : > { %v1759_v62 = vadd.f32 %v3527_v50, %v5034_v46 }
 0x2fc   : > { %v3529_v1 = vpop.f32.mrf.mxu1  ;;  %2865 = vmatpush1.bf16.msra.mxu0 %v3937_v24 }
 0x2fd   : > { %2033 = vst [vmem:[%s5039_s23 + $0x38] sm:$0xff] %v1759_v62  ;;  %v3530_v4 = vadd.f32 %v3529_v1, %v3528_v38  ;;  %v2061_v5 = vpack.c.bf16 %v1759_v62, %v1756_v63  ;;  %2866 = vmatprep.subr.bf16.mxu0 %v3945_v8  ;;  %v3966_v62 = vld [vmem:[#allocation11 + $0x1a4] ss:$16 sps:$4 sm:$0xff]   ;;  %v3969_v1 = vld [vmem:[#allocation11 + $0x1ac] ss:$16 sps:$4 sm:$0xff]  }
 0x2fe   : > { %v3531_v7 = vpop.f32.mrf.mxu1  ;;  %2761 = vmatprep.subr.bf16.mxu1 %v3966_v62 }
 0x2ff   : > { %v1764_v10 = vadd.f32 %v3530_v4, %v5034_v46  ;;  %2237 = vmatmul.mubr.bf16.gmra.mxu0 %v2061_v5  ;;  %v3964_v4 = vld [vmem:[#allocation11 + $0x1a0] ss:$16 sps:$4 sm:$0xff]   ;;  %v3967_v5 = vld [vmem:[#allocation11 + $0x1a8] ss:$16 sps:$4 sm:$0xff]  }
 0x300   : > { %v3532_v11 = vpop.f32.mrf.mxu1  ;;  %2246 = vmatprep.mubr.bf16.mxu0 %v4530_v15  ;;  %2867 = vmatpush1.bf16.msra.mxu0 %v3943_v3 }
 0x301   : > { %2034 = vst [vmem:[%s5039_s23 + $0x40] sm:$0xff] %v1764_v10  ;;  %v3533_v14 = vadd.f32 %v3532_v11, %v3531_v7  ;;  %2868 = vmatprep.subr.bf16.mxu0 %v3951_v6  ;;  %2762 = vmatpush2.bf16.msra.mxu1 %v3964_v4 }
 0x302   : > { %v3534_v21 = vpop.f32.mrf.mxu1  ;;  %2763 = vmatprep.subr.bf16.mxu1 %v3972_v9 }
 0x303   : > { %v1767_v25 = vadd.f32 %v3533_v14, %v5034_v46  ;;  %v3973_v14 = vld [vmem:[#allocation11 + $0x188] ss:$16 sps:$4 sm:$0xff]  }
 0x304   : > { %v3535_v26 = vpop.f32.mrf.mxu1  ;;  %2869 = vmatpush1.bf16.msra.mxu0 %v3949_v13  ;;  %v3970_v13 = vld [vmem:[#allocation11 + $0x180] ss:$16 sps:$4 sm:$0xff]  }
 0x305   : > { %2035 = vst [vmem:[%s5039_s23 + $0x48] sm:$0xff] %v1767_v25  ;;  %v3536_v28 = vadd.f32 %v3535_v26, %v3534_v21  ;;  %v2062_v29 = vpack.c.bf16 %v1767_v25, %v1764_v10  ;;  %2870 = vmatprep.subr.bf16.mxu0 %v3957_v16  ;;  %v3975_v10 = vld [vmem:[#allocation11 + $0x18c] ss:$16 sps:$4 sm:$0xff]   ;;  %2764 = vmatpush2.bf16.msra.mxu1 %v3970_v13  ;;  %v3978_v25 = vld [vmem:[#allocation11 + $0x164] ss:$16 sps:$4 sm:$0xff]  }
 0x306   : > { %v3537_v31 = vpop.f32.mrf.mxu1  ;;  %v3981_v26 = vld [vmem:[#allocation11 + $0x16c] ss:$16 sps:$4 sm:$0xff]   ;;  %2765 = vmatprep.subr.bf16.mxu1 %v3978_v25 }
 0x307   : > { %v1772_v23 = vadd.f32 %v3536_v28, %v5034_v46  ;;  %2247 = vmatmul.mubr.bf16.gmra.mxu0 %v2062_v29  ;;  %v3976_v28 = vld [vmem:[#allocation11 + $0x160] ss:$16 sps:$4 sm:$0xff]   ;;  %v3979_v29 = vld [vmem:[#allocation11 + $0x168] ss:$16 sps:$4 sm:$0xff]  }
 0x308   : > { %v3538_v32 = vpop.f32.mrf.mxu1  ;;  %2256 = vmatprep.mubr.bf16.mxu0 %v4530_v15  ;;  %2871 = vmatpush2.bf16.msra.mxu0 %v3955_v27 }
 0x309   : > { %2036 = vst [vmem:[%s5039_s23 + $0x50] sm:$0xff] %v1772_v23  ;;  %v3539_v22 = vadd.f32 %v3538_v32, %v3537_v31  ;;  %2872 = vmatprep.subr.bf16.mxu0 %v3963_v30  ;;  %2766 = vmatpush2.bf16.msra.mxu1 %v3976_v28  ;;  %v3984_v32 = vld [vmem:[#allocation11 + $0x144] ss:$16 sps:$4 sm:$0xff]  }
 0x30a   : > { %v3540_v34 = vpop.f32.mrf.mxu1  ;;  %2767 = vmatprep.subr.bf16.mxu1 %v3984_v32 }
 0x30b   : > { %v1775_v35 = vadd.f32 %v3539_v22, %v5034_v46 }
 0x30c   : > { %v3541_v36 = vpop.f32.mrf.mxu1  ;;  %2873 = vmatpush2.bf16.msra.mxu0 %v3961_v33  ;;  %v3987_v33 = vld [vmem:[#allocation11 + $0x14c] ss:$16 sps:$4 sm:$0xff]  }
 0x30d   : > { %2037 = vst [vmem:[%s5039_s23 + $0x58] sm:$0xff] %v1775_v35  ;;  %v3542_v37 = vadd.f32 %v3541_v36, %v3540_v34  ;;  %v2063_v39 = vpack.c.bf16 %v1775_v35, %v1772_v23  ;;  %2874 = vmatprep.subr.bf16.mxu0 %v3969_v1  ;;  %v3982_v34 = vld [vmem:[#allocation11 + $0x140] ss:$16 sps:$4 sm:$0xff]   ;;  %v3985_v35 = vld [vmem:[#allocation11 + $0x148] ss:$16 sps:$4 sm:$0xff]  }
 0x30e   : > { %v3543_v40 = vpop.f32.mrf.mxu1  ;;  %2768 = vmatpush2.bf16.msra.mxu1 %v3982_v34 }
 0x30f   : > { %v1780_v42 = vadd.f32 %v3542_v37, %v5034_v46  ;;  %2257 = vmatmul.mubr.bf16.gmra.mxu0 %v2063_v39 }
 0x310   : > { %v3544_v43 = vpop.f32.mrf.mxu1  ;;  %2266 = vmatprep.mubr.bf16.mxu0 %v4530_v15  ;;  %2875 = vmatpush2.bf16.msra.mxu0 %v3967_v5 }
 0x311   : > { %2038 = vst [vmem:[%s5039_s23 + $0x60] sm:$0xff] %v1780_v42  ;;  %v3545_v44 = vadd.f32 %v3544_v43, %v3543_v40  ;;  %2876 = vmatprep.subr.bf16.mxu0 %v3975_v10  ;;  %v3990_v40 = vld [vmem:[#allocation11 + $0x124] ss:$16 sps:$4 sm:$0xff]  }
 0x312   : > { %v3546_v45 = vpop.f32.mrf.mxu1  ;;  %2769 = vmatprep.subr.bf16.mxu1 %v3990_v40 }
 0x313   : > { %v1783_v47 = vadd.f32 %v3545_v44, %v5034_v46  ;;  %v3988_v44 = vld [vmem:[#allocation11 + $0x120] ss:$16 sps:$4 sm:$0xff]  }
 0x314   : > { %v3547_v48 = vpop.f32.mrf.mxu1  ;;  %2877 = vmatpush2.bf16.msra.mxu0 %v3973_v14  ;;  %2770 = vmatpush2.bf16.msra.mxu1 %v3988_v44 }
 0x315   : > { %2039 = vst [vmem:[%s5039_s23 + $0x68] sm:$0xff] %v1783_v47  ;;  %v3548_v49 = vadd.f32 %v3547_v48, %v3546_v45  ;;  %v2064_v51 = vpack.c.bf16 %v1783_v47, %v1780_v42  ;;  %2878 = vmatprep.subr.bf16.mxu0 %v3981_v26  ;;  %v3993_v42 = vld [vmem:[#allocation11 + $0x12c] ss:$16 sps:$4 sm:$0xff]   ;;  %v3991_v45 = vld [vmem:[#allocation11 + $0x128] ss:$16 sps:$4 sm:$0xff]  }
 0x316   : > { %v3549_v52 = vpop.f32.mrf.mxu1 }
 0x317   : > { %v1788_v53 = vadd.f32 %v3548_v49, %v5034_v46  ;;  %2267 = vmatmul.mubr.bf16.gmra.mxu0 %v2064_v51  ;;  %v3996_v51 = vld [vmem:[#allocation11 + $0x104] ss:$16 sps:$4 sm:$0xff]  }
 0x318   : > { %v3550_v54 = vpop.f32.mrf.mxu1  ;;  %2276 = vmatprep.mubr.bf16.mxu0 %v4530_v15  ;;  %2879 = vmatpush2.bf16.msra.mxu0 %v3979_v29 }
 0x319   : > { %2040 = vst [vmem:[%s5039_s23 + $0x70] sm:$0xff] %v1788_v53  ;;  %v3551_v55 = vadd.f32 %v3550_v54, %v3549_v52  ;;  %2880 = vmatprep.subr.bf16.mxu0 %v3987_v33  ;;  %v3999_v52 = vld [vmem:[#allocation11 + $0x10c] ss:$16 sps:$4 sm:$0xff]   ;;  %v3994_v54 = vld [vmem:[#allocation11 + $0x100] ss:$16 sps:$4 sm:$0xff]   ;;  %2771 = vmatprep.subr.bf16.mxu1 %v3996_v51 }
 0x31a   : > { %v3568_v56 = vpop.f32.mrf.mxu1  ;;  %2772 = vmatpush2.bf16.msra.mxu1 %v3994_v54 }
 0x31b   : > { %v1791_v57 = vadd.f32 %v3551_v55, %v5034_v46  ;;  %v3997_v55 = vld [vmem:[#allocation11 + $0x108] ss:$16 sps:$4 sm:$0xff]  }
 0x31c   : > { %v3569_v59 = vpop.f32.mrf.mxu1  ;;  %2881 = vmatpush2.bf16.msra.mxu0 %v3985_v35 }
 0x31d   : > { %2041 = vst [vmem:[%s5039_s23 + $0x78] sm:$0xff] %v1791_v57  ;;  %v3570_v60 = vadd.f32 %v3569_v59, %v3568_v56  ;;  %v2065_v61 = vpack.c.bf16 %v1791_v57, %v1788_v53  ;;  %2882 = vmatprep.subr.bf16.mxu0 %v3993_v42 }
 0x31e   : > { %v3571_v63 = vpop.f32.mrf.mxu1 }
 0x31f   : > { %v1964_v0 = vadd.f32 %v3570_v60, %v5081_v58  ;;  %2277 = vmatmul.mubr.bf16.gmra.mxu0 %v2065_v61 }
 0x320   : > { %v3572_v24 = vpop.f32.mrf.mxu1  ;;  %2883 = vmatpush2.bf16.msra.mxu0 %v3991_v45 }
 0x321   : > { %2042 = vst [vmem:[%s5087_s21] sm:$0xff] %v1964_v0  ;;  %v3573_v15 = vadd.f32 %v3572_v24, %v3571_v63  ;;  %2884 = vmatprep.subr.bf16.mxu0 %v3999_v52 }
 0x322   : > { %v3574_v46 = vpop.f32.mrf.mxu1 }
 0x323   : > { %v1967_v50 = vadd.f32 %v3573_v15, %v5081_v58 }
 0x324   : > { %v3575_v8 = vpop.f32.mrf.mxu1  ;;  %2885 = vmatpush2.bf16.msra.mxu0 %v3997_v55 }
 0x325   : > { %2043 = vst [vmem:[%s5087_s21 + $0x8] sm:$0xff] %v1967_v50  ;;  %v3576_v12 = vadd.f32 %v3575_v8, %v3574_v46 }
 0x326   : > { %v3577_v38 = vpop.f32.mrf.mxu1 }
 0x327   : > { %v1972_v41 = vadd.f32 %v3576_v12, %v5081_v58 }
 0x328   : > { %v3578_v3 = vpop.f32.mrf.mxu1 }
 0x329   : > { %2044 = vst [vmem:[%s5087_s21 + $0x10] sm:$0xff] %v1972_v41  ;;  %v3579_v6 = vadd.f32 %v3578_v3, %v3577_v38 }
 0x32a   : > { %v3580_v2 = vpop.f32.mrf.mxu1 }
 0x32b   : > { %v1975_v7 = vadd.f32 %v3579_v6, %v5081_v58 }
 0x32c   : > { %v3581_v11 = vpop.f32.mrf.mxu1 }
 0x32d   : > { %2045 = vst [vmem:[%s5087_s21 + $0x18] sm:$0xff] %v1975_v7  ;;  %v3582_v16 = vadd.f32 %v3581_v11, %v3580_v2 }
 0x32e   : > { %v3583_v17 = vpop.f32.mrf.mxu1 }
 0x32f   : > { %v1980_v21 = vadd.f32 %v3582_v16, %v5081_v58 }
 0x330   : > { %v3584_v27 = vpop.f32.mrf.mxu1 }
 0x331   : > { %2046 = vst [vmem:[%s5087_s21 + $0x20] sm:$0xff] %v1980_v21  ;;  %v3585_v30 = vadd.f32 %v3584_v27, %v3583_v17  ;;  %v2082_v21 = vld [vmem:[%s5434_s8] sm:$0x3] }
 0x332   : > { %v3586_v31 = vpop.f32.mrf.mxu1  ;;  %v5124_v25 = vrot.slane %v2082_v21, %v4935_v19  ;;  %v5127_v27 = vrot.slane %v2082_v21, %v4938_v20 }
 0x333   : > { %v1983_v23 = vadd.f32 %v3585_v30, %v5081_v58 }
 0x334   : > { %v3587_v22 = vpop.f32.mrf.mxu1 }
 0x335   : > { %2047 = vst [vmem:[%s5087_s21 + $0x28] sm:$0xff] %v1983_v23  ;;  %v3588_v36 = vadd.f32 %v3587_v22, %v3586_v31 }
 0x336   : > { %v3589_v37 = vpop.f32.mrf.mxu1 }
 0x337   : > { %v1988_v39 = vadd.f32 %v3588_v36, %v5081_v58 }
 0x338   : > { %v3590_v43 = vpop.f32.mrf.mxu1 }
 0x339   : > { %2048 = vst [vmem:[%s5087_s21 + $0x30] sm:$0xff] %v1988_v39  ;;  %v3591_v47 = vadd.f32 %v3590_v43, %v3589_v37 }
 0x33a   : > { %v3592_v48 = vpop.f32.mrf.mxu1 }
 0x33b   : > { %v1991_v49 = vadd.f32 %v3591_v47, %v5081_v58 }
 0x33c   : > { %v3593_v53 = vpop.f32.mrf.mxu1 }
 0x33d   : > { %2049 = vst [vmem:[%s5087_s21 + $0x38] sm:$0xff] %v1991_v49  ;;  %v3594_v56 = vadd.f32 %v3593_v53, %v3592_v48 }
 0x33e   : > { %v3595_v57 = vpop.f32.mrf.mxu1 }
 0x33f   : > { %v1996_v59 = vadd.f32 %v3594_v56, %v5081_v58 }
 0x340   : > { %v3596_v60 = vpop.f32.mrf.mxu1 }
 0x341   : > { %2050 = vst [vmem:[%s5087_s21 + $0x40] sm:$0xff] %v1996_v59  ;;  %v3597_v61 = vadd.f32 %v3596_v60, %v3595_v57 }
 0x342   : > { %v3598_v63 = vpop.f32.mrf.mxu1 }
 0x343   : > { %v1999_v0 = vadd.f32 %v3597_v61, %v5081_v58 }
 0x344   : > { %v3599_v24 = vpop.f32.mrf.mxu1 }
 0x345   : > { %2051 = vst [vmem:[%s5087_s21 + $0x48] sm:$0xff] %v1999_v0  ;;  %v3600_v15 = vadd.f32 %v3599_v24, %v3598_v63 }
 0x346   : > { %v3601_v46 = vpop.f32.mrf.mxu1 }
 0x347   : > { %v2004_v50 = vadd.f32 %v3600_v15, %v5081_v58 }
 0x348   : > { %v3602_v8 = vpop.f32.mrf.mxu1 }
 0x349   : > { %2052 = vst [vmem:[%s5087_s21 + $0x50] sm:$0xff] %v2004_v50  ;;  %v3603_v12 = vadd.f32 %v3602_v8, %v3601_v46 }
 0x34a   : > { %v3604_v38 = vpop.f32.mrf.mxu1 }
 0x34b   : > { %v2007_v41 = vadd.f32 %v3603_v12, %v5081_v58 }
 0x34c   : > { %v3605_v62 = vpop.f32.mrf.mxu1 }
 0x34d   : > { %2053 = vst [vmem:[%s5087_s21 + $0x58] sm:$0xff] %v2007_v41  ;;  %v3606_v1 = vadd.f32 %v3605_v62, %v3604_v38 }
 0x34e   : > { %v3607_v3 = vpop.f32.mrf.mxu1 }
 0x34f   : > { %v2012_v4 = vadd.f32 %v3606_v1, %v5081_v58 }
 0x350   : > { %v3608_v5 = vpop.f32.mrf.mxu1 }
 0x351   : > { %2054 = vst [vmem:[%s5087_s21 + $0x60] sm:$0xff] %v2012_v4  ;;  %v3609_v6 = vadd.f32 %v3608_v5, %v3607_v3 }
 0x352   : > { %v3610_v2 = vpop.f32.mrf.mxu1 }
 0x353   : > { %v2015_v7 = vadd.f32 %v3609_v6, %v5081_v58 }
 0x354   : > { %v3611_v9 = vpop.f32.mrf.mxu1 }
 0x355   : > { %2055 = vst [vmem:[%s5087_s21 + $0x68] sm:$0xff] %v2015_v7  ;;  %v3612_v10 = vadd.f32 %v3611_v9, %v3610_v2 }
 0x356   : > { %v3613_v11 = vpop.f32.mrf.mxu1 }
 0x357   : > { %v2020_v13 = vadd.f32 %v3612_v10, %v5081_v58 }
 0x358   : > { %v3614_v14 = vpop.f32.mrf.mxu1 }
 0x359   : > { %2056 = vst [vmem:[%s5087_s21 + $0x70] sm:$0xff] %v2020_v13  ;;  %v3615_v16 = vadd.f32 %v3614_v14, %v3613_v11 }
 0x35b   : > { %v2023_v17 = vadd.f32 %v3615_v16, %v5081_v58 }
 0x35d   : > { %2057 = vst [vmem:[%s5087_s21 + $0x78] sm:$0xff] %v2023_v17 }
 0x3a7   : > { %v2208_v26 = vpop.f32.mrf.mxu0 }
 0x3a8   : > { %v2209_v58 = vadd.f32 %v2208_v26, %v5127_v27 }
 0x3a9   : > { %v2210_v28 = vpop.f32.mrf.mxu0 }
 0x3aa   : > { %v2211_v29 = vadd.f32 %v2210_v28, %v5124_v25 }
 0x3ab   : > { %v2212_v30 = vpop.f32.mrf.mxu0 }
 0x3ac   : > { %v2213_v31 = vadd.f32 %v2212_v30, %v5127_v27  ;;  %4096 = vtanh.f32 %v2211_v29 }
 0x3ad   : > { %v2214_v23 = vpop.f32.mrf.mxu0 }
 0x3ae   : > { %v2215_v32 = vadd.f32 %v2214_v23, %v5124_v25  ;;  %4098 = vtanh.f32 %v2213_v31 }
 0x3af   : > { %v2218_v33 = vpop.f32.mrf.mxu0 }
 0x3b0   : > { %4100 = vtanh.f32 %v2215_v32  ;;  %v2219_v37 = vadd.f32 %v2218_v33, %v5127_v27 }
 0x3b1   : > { %4102 = vtanh.f32 %v2209_v58  ;;  %v2220_v22 = vpop.f32.mrf.mxu0 }
 0x3b2   : > { %v2221_v34 = vadd.f32 %v2220_v22, %v5124_v25 }
 0x3b3   : > { %v2222_v35 = vpop.f32.mrf.mxu0 }
 0x3b4   : > { %v2223_v36 = vadd.f32 %v2222_v35, %v5127_v27  ;;  %4104 = vtanh.f32 %v2221_v34 }
 0x3b5   : > { %v2224_v39 = vpop.f32.mrf.mxu0 }
 0x3b6   : > { %v2225_v40 = vadd.f32 %v2224_v39, %v5124_v25  ;;  %4106 = vtanh.f32 %v2223_v36 }
 0x3b7   : > { %v2228_v42 = vpop.f32.mrf.mxu0 }
 0x3b8   : > { %4108 = vtanh.f32 %v2225_v40  ;;  %v2229_v52 = vadd.f32 %v2228_v42, %v5127_v27 }
 0x3b9   : > { %4110 = vtanh.f32 %v2219_v37  ;;  %v2230_v43 = vpop.f32.mrf.mxu0  ;;  %v4097_v45 = vpop.eup %4096 }
 0x3ba   : > { %v2231_v44 = vadd.f32 %v2230_v43, %v5124_v25 }
 0x3bb   : > { %v2232_v47 = vpop.f32.mrf.mxu0  ;;  %v4099_v48 = vpop.eup %4098 }
 0x3bc   : > { %v2233_v49 = vadd.f32 %v2232_v47, %v5127_v27  ;;  %4112 = vtanh.f32 %v2231_v44 }
 0x3bd   : > { %v4101_v51 = vpop.eup %4100  ;;  %v2234_v53 = vpop.f32.mrf.mxu0 }
 0x3be   : > { %v4103_v54 = vpop.eup %4102  ;;  %v2235_v55 = vadd.f32 %v2234_v53, %v5124_v25  ;;  %v2320_v56 = vpack.c.bf16 %v4101_v51, %v4097_v45  ;;  %4114 = vtanh.f32 %v2233_v49 }
 0x3bf   : > { %v2238_v57 = vpop.f32.mrf.mxu0  ;;  %v2319_v59 = vpack.c.bf16 %v4099_v48, %v4103_v54 }
 0x3c0   : > { %4116 = vtanh.f32 %v2235_v55  ;;  %2773 = vmatprep.mubr.bf16.mxu1 %v2320_v56  ;;  %2886 = vmatprep.mubr.bf16.mxu0 %v2320_v56  ;;  %v2239_v50 = vadd.f32 %v2238_v57, %v5127_v27 }
 0x3c1   : > { %4118 = vtanh.f32 %v2229_v52  ;;  %v2240_v60 = vpop.f32.mrf.mxu0  ;;  %2774 = vmatmul.mubr.bf16.vlgmr.msra.gmra.mxu1 %v2319_v59  ;;  %2887 = vmatmul.mubr.bf16.vlgmr.msra.gmra.mxu0 %v2319_v59  ;;  %v4105_v63 = vpop.eup %4104 }
 0x3c2   : > { %v2241_v61 = vadd.f32 %v2240_v60, %v5124_v25 }
 0x3c3   : > { %v2242_v0 = vpop.f32.mrf.mxu0  ;;  %v4107_v24 = vpop.eup %4106 }
 0x3c4   : > { %v2243_v15 = vadd.f32 %v2242_v0, %v5127_v27  ;;  %4120 = vtanh.f32 %v2241_v61 }
 0x3c5   : > { %v4109_v46 = vpop.eup %4108  ;;  %v2244_v8 = vpop.f32.mrf.mxu0 }
 0x3c6   : > { %v4111_v12 = vpop.eup %4110  ;;  %v2245_v38 = vadd.f32 %v2244_v8, %v5124_v25  ;;  %v2322_v41 = vpack.c.bf16 %v4109_v46, %v4105_v63  ;;  %4122 = vtanh.f32 %v2243_v15 }
 0x3c7   : > { %v2248_v62 = vpop.f32.mrf.mxu0  ;;  %v2321_v1 = vpack.c.bf16 %v4107_v24, %v4111_v12 }
 0x3c8   : > { %4124 = vtanh.f32 %v2245_v38  ;;  %2783 = vmatprep.mubr.bf16.mxu1 %v2322_v41  ;;  %2896 = vmatprep.mubr.bf16.mxu0 %v2322_v41  ;;  %v2249_v10 = vadd.f32 %v2248_v62, %v5127_v27 }
 0x3c9   : > { %4126 = vtanh.f32 %v2239_v50  ;;  %v2250_v3 = vpop.f32.mrf.mxu0  ;;  %2784 = vmatmul.mubr.bf16.gmra.mxu1 %v2321_v1  ;;  %2897 = vmatmul.mubr.bf16.gmra.mxu0 %v2321_v1  ;;  %v4113_v5 = vpop.eup %4112 }
 0x3ca   : > { %v2251_v4 = vadd.f32 %v2250_v3, %v5124_v25 }
 0x3cb   : > { %v2252_v6 = vpop.f32.mrf.mxu0  ;;  %v4115_v2 = vpop.eup %4114 }
 0x3cc   : > { %v2253_v7 = vadd.f32 %v2252_v6, %v5127_v27  ;;  %4128 = vtanh.f32 %v2251_v4 }
 0x3cd   : > { %v4117_v9 = vpop.eup %4116  ;;  %v2254_v11 = vpop.f32.mrf.mxu0 }
 0x3ce   : > { %v4119_v13 = vpop.eup %4118  ;;  %v2255_v14 = vadd.f32 %v2254_v11, %v5124_v25  ;;  %v2324_v16 = vpack.c.bf16 %v4117_v9, %v4113_v5  ;;  %4130 = vtanh.f32 %v2253_v7 }
 0x3cf   : > { %v2258_v17 = vpop.f32.mrf.mxu0  ;;  %v2323_v21 = vpack.c.bf16 %v4115_v2, %v4119_v13 }
 0x3d0   : > { %4132 = vtanh.f32 %v2255_v14  ;;  %2793 = vmatprep.mubr.bf16.mxu1 %v2324_v16  ;;  %2906 = vmatprep.mubr.bf16.mxu0 %v2324_v16  ;;  %v2259_v32 = vadd.f32 %v2258_v17, %v5127_v27 }
 0x3d1   : > { %4134 = vtanh.f32 %v2249_v10  ;;  %v2260_v26 = vpop.f32.mrf.mxu0  ;;  %2794 = vmatmul.mubr.bf16.gmra.mxu1 %v2323_v21  ;;  %2907 = vmatmul.mubr.bf16.gmra.mxu0 %v2323_v21  ;;  %v4121_v29 = vpop.eup %4120 }
 0x3d2   : > { %v2261_v28 = vadd.f32 %v2260_v26, %v5124_v25 }
 0x3d3   : > { %v2262_v30 = vpop.f32.mrf.mxu0  ;;  %v4123_v31 = vpop.eup %4122 }
 0x3d4   : > { %v2263_v58 = vadd.f32 %v2262_v30, %v5127_v27  ;;  %4136 = vtanh.f32 %v2261_v28 }
 0x3d5   : > { %v4125_v23 = vpop.eup %4124  ;;  %v2264_v33 = vpop.f32.mrf.mxu0 }
 0x3d6   : > { %v4127_v22 = vpop.eup %4126  ;;  %v2265_v34 = vadd.f32 %v2264_v33, %v5124_v25  ;;  %v2326_v35 = vpack.c.bf16 %v4125_v23, %v4121_v29  ;;  %4138 = vtanh.f32 %v2263_v58 }
 0x3d7   : > { %v2268_v36 = vpop.f32.mrf.mxu0  ;;  %v2325_v37 = vpack.c.bf16 %v4123_v31, %v4127_v22 }
 0x3d8   : > { %4140 = vtanh.f32 %v2265_v34  ;;  %2803 = vmatprep.mubr.bf16.mxu1 %v2326_v35  ;;  %2916 = vmatprep.mubr.bf16.mxu0 %v2326_v35  ;;  %v2269_v48 = vadd.f32 %v2268_v36, %v5127_v27 }
 0x3d9   : > { %4142 = vtanh.f32 %v2259_v32  ;;  %v2270_v39 = vpop.f32.mrf.mxu0  ;;  %2804 = vmatmul.mubr.bf16.gmra.mxu1 %v2325_v37  ;;  %2917 = vmatmul.mubr.bf16.gmra.mxu0 %v2325_v37  ;;  %v4129_v42 = vpop.eup %4128 }
 0x3da   : > { %v2271_v40 = vadd.f32 %v2270_v39, %v5124_v25 }
 0x3db   : > { %v2272_v43 = vpop.f32.mrf.mxu0  ;;  %v4131_v44 = vpop.eup %4130 }
 0x3dc   : > { %v2273_v45 = vadd.f32 %v2272_v43, %v5127_v27  ;;  %4144 = vtanh.f32 %v2271_v40 }
 0x3dd   : > { %v4133_v47 = vpop.eup %4132  ;;  %v2274_v49 = vpop.f32.mrf.mxu0 }
 0x3de   : > { %v4135_v51 = vpop.eup %4134  ;;  %v2275_v52 = vadd.f32 %v2274_v49, %v5124_v25  ;;  %v2328_v53 = vpack.c.bf16 %v4133_v47, %v4129_v42  ;;  %4146 = vtanh.f32 %v2273_v45 }
 0x3df   : > { %v2278_v54 = vpop.f32.mrf.mxu0  ;;  %v2327_v55 = vpack.c.bf16 %v4131_v44, %v4135_v51 }
 0x3e0   : > { %4148 = vtanh.f32 %v2275_v52  ;;  %2813 = vmatprep.mubr.bf16.mxu1 %v2328_v53  ;;  %2926 = vmatprep.mubr.bf16.mxu0 %v2328_v53  ;;  %v2279_v24 = vadd.f32 %v2278_v54, %v5127_v27 }
 0x3e1   : > { %4150 = vtanh.f32 %v2269_v48  ;;  %v2280_v56 = vpop.f32.mrf.mxu0  ;;  %2814 = vmatmul.mubr.bf16.gmra.mxu1 %v2327_v55  ;;  %2927 = vmatmul.mubr.bf16.gmra.mxu0 %v2327_v55  ;;  %v4137_v59 = vpop.eup %4136 }
 0x3e2   : > { %v2281_v57 = vadd.f32 %v2280_v56, %v5124_v25 }
 0x3e3   : > { %v2282_v60 = vpop.f32.mrf.mxu0  ;;  %v4139_v61 = vpop.eup %4138 }
 0x3e4   : > { %v2283_v63 = vadd.f32 %v2282_v60, %v5127_v27  ;;  %4152 = vtanh.f32 %v2281_v57 }
 0x3e5   : > { %v4141_v0 = vpop.eup %4140  ;;  %v2284_v15 = vpop.f32.mrf.mxu0 }
 0x3e6   : > { %v4143_v46 = vpop.eup %4142  ;;  %v2285_v50 = vadd.f32 %v2284_v15, %v5124_v25  ;;  %v2330_v8 = vpack.c.bf16 %v4141_v0, %v4137_v59  ;;  %4154 = vtanh.f32 %v2283_v63 }
 0x3e7   : > { %v2329_v12 = vpack.c.bf16 %v4139_v61, %v4143_v46 }
 0x3e8   : > { %4156 = vtanh.f32 %v2285_v50  ;;  %2823 = vmatprep.mubr.bf16.mxu1 %v2330_v8  ;;  %2936 = vmatprep.mubr.bf16.mxu0 %v2330_v8 }
 0x3e9   : > { %4158 = vtanh.f32 %v2279_v24  ;;  %2824 = vmatmul.mubr.bf16.gmra.mxu1 %v2329_v12  ;;  %2937 = vmatmul.mubr.bf16.gmra.mxu0 %v2329_v12  ;;  %v4145_v38 = vpop.eup %4144 }
 0x3eb   : > { %v4147_v41 = vpop.eup %4146 }
 0x3ed   : > { %v4149_v62 = vpop.eup %4148 }
 0x3ee   : > { %v4151_v1 = vpop.eup %4150  ;;  %v2332_v3 = vpack.c.bf16 %v4149_v62, %v4145_v38 }
 0x3ef   : > { %v2331_v27 = vpack.c.bf16 %v4147_v41, %v4151_v1 }
 0x3f0   : > { %2833 = vmatprep.mubr.bf16.mxu1 %v2332_v3  ;;  %2946 = vmatprep.mubr.bf16.mxu0 %v2332_v3 }
 0x3f1   : > { %2834 = vmatmul.mubr.bf16.gmra.mxu1 %v2331_v27  ;;  %2947 = vmatmul.mubr.bf16.gmra.mxu0 %v2331_v27  ;;  %v4153_v25 = vpop.eup %4152 }
 0x3f3   : > { %v4155_v4 = vpop.eup %4154 }
 0x3f5   : > { %v4157_v5 = vpop.eup %4156 }
 0x3f6   : > { %v4159_v6 = vpop.eup %4158  ;;  %v2334_v2 = vpack.c.bf16 %v4157_v5, %v4153_v25 }
 0x3f7   : > { %v2333_v7 = vpack.c.bf16 %v4155_v4, %v4159_v6 }
 0x3f8   : > { %2843 = vmatprep.mubr.bf16.mxu1 %v2334_v2  ;;  %2956 = vmatprep.mubr.bf16.mxu0 %v2334_v2 }
 0x3f9   : > { %2844 = vmatmul.mubr.bf16.gmra.mxu1 %v2333_v7  ;;  %2957 = vmatmul.mubr.bf16.gmra.mxu0 %v2333_v7 }
 0x3fa   : > { %4395 = shalt.err (!%p4392_p3)
}
 0x3fb   : > { %s4396_s23 = scalar_lea.hbm %s5168_s15, 2048  ;;  %s4400_s5 = scalar_lea.hbm %s5438_s12, 4096 }
 0x3fc   : > { %p4397_p4 = scmp.ne.s32.totalorder %s5168_s15, %s4396_s23  ;;  %p4401_p2 = scmp.lt.s32.totalorder %s5168_s15, %s5438_s12 }
 0x3fd   : > { %p4402_p7 = scmp.lt.s32.totalorder %s4400_s5, %s4396_s23 }
 0x3fe   : > { %p4398_p12 = pnand %p4397_p4, %p5480_p11 }
 0x3ff   : > { %p4403_p8 = por %p4402_p7, %p4401_p2 }
 0x400   : > { %p4399_p6 = pneg %p4398_p12 }
 0x402   : > { %p4404_p10 = pnand %p4403_p8, %p4399_p6 }
 0x404   : > { %4407 = shalt.err (!%p4404_p10)
}
 0x405   : > { %s4532_s17 = smov 128   ;;  %s4533_s7 = smov 8  }
 0x406   : > { %3655 = dma.vmem_to_hbm [thread:$0]  (%p5480_p11), %s5171_s18, 2048, %s5168_s15, %s5173_s16, %s4532_s17, %s4532_s17, %s4533_s7  }
 0x407   : > { %s5204_s23 = scalar_lea.hbm %s5439_s13, %s3486_s29  ;;  %s3088_s1 = sshll.u32 %s5087_s21, 4  ;;  %s3089_s1 = int_to_ptr.vmem [resolvable:$true] %s3088_s1 }
 0x408   : > { %s4408_s3 = scalar_lea.vmem %s3089_s1, 2048  ;;  %s4534_s5 = smov [#allocation16]  }
 0x409   : > { %p4409_p0 = scmp.ne.s32.totalorder %s3089_s1, %s4408_s3  ;;  %s4412_s20 = sshll.u32 %s4534_s5, 4  ;;  %s4413_s20 = int_to_ptr.vmem [resolvable:$false] %s4412_s20 }
 0x40a   : > { %s4414_s0 = scalar_lea.vmem %s4413_s20, 4096  ;;  %p4415_p9 = scmp.lt.s32.totalorder %s3089_s1, %s4413_s20 }
 0x40b   : > { %p4410_p13 = pnand %p4409_p0, %p5480_p11  ;;  %p4416_p1 = scmp.lt.s32.totalorder %s4414_s0, %s4408_s3 }
 0x40d   : > { %p4411_p5 = pneg %p4410_p13  ;;  %p4417_p3 = por %p4416_p1, %p4415_p9 }
 0x40f   : > { %p4418_p4 = pnand %p4417_p3, %p4411_p5 }
 0x411   : > { %4421 = shalt.err (!%p4418_p4)
}
 0x412   : > { %s4422_s21 = scalar_lea.hbm %s5204_s23, 2048  ;;  %s4426_s18 = scalar_lea.hbm %s5439_s13, 4096 }
 0x413   : > { %p4423_p12 = scmp.ne.s32.totalorder %s5204_s23, %s4422_s21  ;;  %p4427_p7 = scmp.lt.s32.totalorder %s5204_s23, %s5439_s13 }
 0x414   : > { %p4428_p8 = scmp.lt.s32.totalorder %s4426_s18, %s4422_s21 }
 0x415   : > { %p4424_p6 = pnand %p4423_p12, %p5480_p11 }
 0x416   : > { %p4429_p10 = por %p4428_p8, %p4427_p7 }
 0x417   : > { %p4425_p2 = pneg %p4424_p6 }
 0x419   : > { %p4430_p0 = pnand %p4429_p10, %p4425_p2 }
 0x41b   : > { %4433 = shalt.err (!%p4430_p0)
}
 0x41c   : > { %3656 = dma.vmem_to_hbm [thread:$0]  (%p5480_p11), %s3089_s1, 2048, %s5204_s23, %s5173_s16, %s4532_s17, %s4532_s17, %s4533_s7   ;;  %v2411_v9 = vsub.s32 2, %v4932_v18  ;;  %v2415_v11 = vsub.s32 3, %v4932_v18 }
 0x41d   : > { %v2399_v10 = vld [vmem:[%s5436_s10] sm:$0xf]  ;;  %s5481_s16 = sshll.u32 %s4774_s9, 9  ;;  %s3485_s7 = sshll.u32 %s4629_s14, 13 }
 0x41e   : > { %v5233_v13 = vrot.slane %v2399_v10, %v4938_v20  ;;  %v5235_v14 = vrot.slane %v2399_v10, %v2411_v9  ;;  %v5238_v16 = vrot.slane %v2399_v10, %v4935_v19  ;;  %v5240_v17 = vrot.slane %v2399_v10, %v2415_v11  ;;  %s5246_s17 = scalar_lea.vmem [#allocation13], %s5481_s16  ;;  %s5482_s20 = sld [smem:[#allocation30_spill]] }
 0x41f   : > { %s3056_s23 = sshll.u32 %s5246_s17, 4  ;;  %s3032_s14 = scalar_lea.sflag [#allocation4], %s4774_s9  ;;  %s5375_s23 = int_to_ptr.vmem [resolvable:$true] %s3056_s23 }
 0x420   : > { %s4434_s29 = scalar_lea.vmem %s5375_s23, 8192  ;;  %s4535_s15 = smov [#allocation13]  }
 0x421   : > { %p4435_p13 = scmp.ne.s32.totalorder %s5375_s23, %s4434_s29  ;;  %s4438_s18 = sshll.u32 %s4535_s15, 4  ;;  %s4439_s18 = int_to_ptr.vmem [resolvable:$false] %s4438_s18 }
 0x422   : > { %s4440_s11 = scalar_lea.vmem %s4439_s18, 16384  ;;  %p4441_p1 = scmp.lt.s32.totalorder %s5375_s23, %s4439_s18 }
 0x423   : > { %p4436_p5 = pnand %p4435_p13, %p5480_p11  ;;  %p4442_p3 = scmp.lt.s32.totalorder %s4440_s11, %s4434_s29 }
 0x424   : > { %s5373_s21 = scalar_lea.hbm %s5482_s20, %s3485_s7 }
 0x425   : > { %p4437_p9 = pneg %p4436_p5  ;;  %p4443_p4 = por %p4442_p3, %p4441_p1 }
 0x427   : > { %p4444_p12 = pnand %p4443_p4, %p4437_p9 }
 0x481   : > { %v2775_v21 = vpop.f32.mrf.mxu1  ;;  %v2888_v26 = vpop.f32.mrf.mxu0 }
 0x482   : > { %v2776_v28 = vadd.f32 %v2775_v21, %v5233_v13  ;;  %v2889_v29 = vadd.f32 %v2888_v26, %v5235_v14 }
 0x483   : > { %v2777_v30 = vpop.f32.mrf.mxu1  ;;  %v2890_v31 = vpop.f32.mrf.mxu0 }
 0x484   : > { %2967 = vst [vmem:[%s5246_s17] sm:$0xff] %v2776_v28  ;;  %2969 = vst [vmem:[%s5246_s17 + $0x10] sm:$0xff] %v2889_v29  ;;  %v2778_v18 = vadd.f32 %v2777_v30, %v5238_v16  ;;  %v2891_v19 = vadd.f32 %v2890_v31, %v5240_v17 }
 0x485   : > { %v2779_v20 = vpop.f32.mrf.mxu1  ;;  %v2892_v58 = vpop.f32.mrf.mxu0 }
 0x486   : > { %2968 = vst [vmem:[%s5246_s17 + $0x8] sm:$0xff] %v2778_v18  ;;  %2970 = vst [vmem:[%s5246_s17 + $0x18] sm:$0xff] %v2891_v19  ;;  %v2780_v23 = vadd.f32 %v2779_v20, %v5233_v13  ;;  %v2893_v32 = vadd.f32 %v2892_v58, %v5235_v14 }
 0x487   : > { %v2781_v33 = vpop.f32.mrf.mxu1  ;;  %v2894_v22 = vpop.f32.mrf.mxu0 }
 0x488   : > { %2971 = vst [vmem:[%s5246_s17 + $0x20] sm:$0xff] %v2780_v23  ;;  %2973 = vst [vmem:[%s5246_s17 + $0x30] sm:$0xff] %v2893_v32  ;;  %v2782_v34 = vadd.f32 %v2781_v33, %v5238_v16  ;;  %v2895_v35 = vadd.f32 %v2894_v22, %v5240_v17 }
 0x489   : > { %v2785_v36 = vpop.f32.mrf.mxu1  ;;  %v2898_v37 = vpop.f32.mrf.mxu0 }
 0x48a   : > { %2972 = vst [vmem:[%s5246_s17 + $0x28] sm:$0xff] %v2782_v34  ;;  %2974 = vst [vmem:[%s5246_s17 + $0x38] sm:$0xff] %v2895_v35  ;;  %v2786_v39 = vadd.f32 %v2785_v36, %v5233_v13  ;;  %v2899_v40 = vadd.f32 %v2898_v37, %v5235_v14 }
 0x48b   : > { %v2787_v42 = vpop.f32.mrf.mxu1  ;;  %v2900_v43 = vpop.f32.mrf.mxu0 }
 0x48c   : > { %2975 = vst [vmem:[%s5246_s17 + $0x40] sm:$0xff] %v2786_v39  ;;  %2977 = vst [vmem:[%s5246_s17 + $0x50] sm:$0xff] %v2899_v40  ;;  %v2788_v44 = vadd.f32 %v2787_v42, %v5238_v16  ;;  %v2901_v45 = vadd.f32 %v2900_v43, %v5240_v17 }
 0x48d   : > { %v2789_v47 = vpop.f32.mrf.mxu1  ;;  %v2902_v48 = vpop.f32.mrf.mxu0 }
 0x48e   : > { %2976 = vst [vmem:[%s5246_s17 + $0x48] sm:$0xff] %v2788_v44  ;;  %2978 = vst [vmem:[%s5246_s17 + $0x58] sm:$0xff] %v2901_v45  ;;  %v2790_v49 = vadd.f32 %v2789_v47, %v5233_v13  ;;  %v2903_v51 = vadd.f32 %v2902_v48, %v5235_v14 }
 0x48f   : > { %v2791_v52 = vpop.f32.mrf.mxu1  ;;  %v2904_v53 = vpop.f32.mrf.mxu0 }
 0x490   : > { %2979 = vst [vmem:[%s5246_s17 + $0x60] sm:$0xff] %v2790_v49  ;;  %2981 = vst [vmem:[%s5246_s17 + $0x70] sm:$0xff] %v2903_v51  ;;  %v2792_v54 = vadd.f32 %v2791_v52, %v5238_v16  ;;  %v2905_v55 = vadd.f32 %v2904_v53, %v5240_v17 }
 0x491   : > { %v2795_v56 = vpop.f32.mrf.mxu1  ;;  %v2908_v57 = vpop.f32.mrf.mxu0 }
 0x492   : > { %2980 = vst [vmem:[%s5246_s17 + $0x68] sm:$0xff] %v2792_v54  ;;  %2982 = vst [vmem:[%s5246_s17 + $0x78] sm:$0xff] %v2905_v55  ;;  %v2796_v59 = vadd.f32 %v2795_v56, %v5233_v13  ;;  %v2909_v60 = vadd.f32 %v2908_v57, %v5235_v14 }
 0x493   : > { %v2797_v61 = vpop.f32.mrf.mxu1  ;;  %v2910_v63 = vpop.f32.mrf.mxu0 }
 0x494   : > { %2983 = vst [vmem:[%s5246_s17 + $0x80] sm:$0xff] %v2796_v59  ;;  %2985 = vst [vmem:[%s5246_s17 + $0x90] sm:$0xff] %v2909_v60  ;;  %v2798_v0 = vadd.f32 %v2797_v61, %v5238_v16  ;;  %v2911_v24 = vadd.f32 %v2910_v63, %v5240_v17 }
 0x495   : > { %v2799_v15 = vpop.f32.mrf.mxu1  ;;  %v2912_v46 = vpop.f32.mrf.mxu0 }
 0x496   : > { %2984 = vst [vmem:[%s5246_s17 + $0x88] sm:$0xff] %v2798_v0  ;;  %2986 = vst [vmem:[%s5246_s17 + $0x98] sm:$0xff] %v2911_v24  ;;  %v2800_v50 = vadd.f32 %v2799_v15, %v5233_v13  ;;  %v2913_v8 = vadd.f32 %v2912_v46, %v5235_v14 }
 0x497   : > { %v2801_v12 = vpop.f32.mrf.mxu1  ;;  %v2914_v38 = vpop.f32.mrf.mxu0 }
 0x498   : > { %2987 = vst [vmem:[%s5246_s17 + $0xa0] sm:$0xff] %v2800_v50  ;;  %2989 = vst [vmem:[%s5246_s17 + $0xb0] sm:$0xff] %v2913_v8  ;;  %v2802_v41 = vadd.f32 %v2801_v12, %v5238_v16  ;;  %v2915_v62 = vadd.f32 %v2914_v38, %v5240_v17 }
 0x499   : > { %v2805_v1 = vpop.f32.mrf.mxu1  ;;  %v2918_v3 = vpop.f32.mrf.mxu0 }
 0x49a   : > { %2988 = vst [vmem:[%s5246_s17 + $0xa8] sm:$0xff] %v2802_v41  ;;  %2990 = vst [vmem:[%s5246_s17 + $0xb8] sm:$0xff] %v2915_v62  ;;  %v2806_v27 = vadd.f32 %v2805_v1, %v5233_v13  ;;  %v2919_v25 = vadd.f32 %v2918_v3, %v5235_v14 }
 0x49b   : > { %v2807_v4 = vpop.f32.mrf.mxu1  ;;  %v2920_v5 = vpop.f32.mrf.mxu0 }
 0x49c   : > { %2991 = vst [vmem:[%s5246_s17 + $0xc0] sm:$0xff] %v2806_v27  ;;  %2993 = vst [vmem:[%s5246_s17 + $0xd0] sm:$0xff] %v2919_v25  ;;  %v2808_v6 = vadd.f32 %v2807_v4, %v5238_v16  ;;  %v2921_v2 = vadd.f32 %v2920_v5, %v5240_v17 }
 0x49d   : > { %v2809_v7 = vpop.f32.mrf.mxu1  ;;  %v2922_v9 = vpop.f32.mrf.mxu0 }
 0x49e   : > { %2992 = vst [vmem:[%s5246_s17 + $0xc8] sm:$0xff] %v2808_v6  ;;  %2994 = vst [vmem:[%s5246_s17 + $0xd8] sm:$0xff] %v2921_v2  ;;  %v2810_v10 = vadd.f32 %v2809_v7, %v5233_v13  ;;  %v2923_v11 = vadd.f32 %v2922_v9, %v5235_v14 }
 0x49f   : > { %v2811_v21 = vpop.f32.mrf.mxu1  ;;  %v2924_v26 = vpop.f32.mrf.mxu0 }
 0x4a0   : > { %2995 = vst [vmem:[%s5246_s17 + $0xe0] sm:$0xff] %v2810_v10  ;;  %2997 = vst [vmem:[%s5246_s17 + $0xf0] sm:$0xff] %v2923_v11  ;;  %v2812_v28 = vadd.f32 %v2811_v21, %v5238_v16  ;;  %v2925_v29 = vadd.f32 %v2924_v26, %v5240_v17 }
 0x4a1   : > { %v2815_v30 = vpop.f32.mrf.mxu1  ;;  %v2928_v31 = vpop.f32.mrf.mxu0 }
 0x4a2   : > { %2996 = vst [vmem:[%s5246_s17 + $0xe8] sm:$0xff] %v2812_v28  ;;  %2998 = vst [vmem:[%s5246_s17 + $0xf8] sm:$0xff] %v2925_v29  ;;  %v2816_v18 = vadd.f32 %v2815_v30, %v5233_v13  ;;  %v2929_v19 = vadd.f32 %v2928_v31, %v5235_v14 }
 0x4a3   : > { %v2817_v20 = vpop.f32.mrf.mxu1  ;;  %v2930_v58 = vpop.f32.mrf.mxu0 }
 0x4a4   : > { %2999 = vst [vmem:[%s5246_s17 + $0x100] sm:$0xff] %v2816_v18  ;;  %3001 = vst [vmem:[%s5246_s17 + $0x110] sm:$0xff] %v2929_v19  ;;  %v2818_v23 = vadd.f32 %v2817_v20, %v5238_v16  ;;  %v2931_v32 = vadd.f32 %v2930_v58, %v5240_v17 }
 0x4a5   : > { %v2819_v33 = vpop.f32.mrf.mxu1  ;;  %v2932_v22 = vpop.f32.mrf.mxu0 }
 0x4a6   : > { %3000 = vst [vmem:[%s5246_s17 + $0x108] sm:$0xff] %v2818_v23  ;;  %3002 = vst [vmem:[%s5246_s17 + $0x118] sm:$0xff] %v2931_v32  ;;  %v2820_v34 = vadd.f32 %v2819_v33, %v5233_v13  ;;  %v2933_v35 = vadd.f32 %v2932_v22, %v5235_v14 }
 0x4a7   : > { %v2821_v36 = vpop.f32.mrf.mxu1  ;;  %v2934_v37 = vpop.f32.mrf.mxu0 }
 0x4a8   : > { %3003 = vst [vmem:[%s5246_s17 + $0x120] sm:$0xff] %v2820_v34  ;;  %3005 = vst [vmem:[%s5246_s17 + $0x130] sm:$0xff] %v2933_v35  ;;  %v2822_v39 = vadd.f32 %v2821_v36, %v5238_v16  ;;  %v2935_v40 = vadd.f32 %v2934_v37, %v5240_v17 }
 0x4a9   : > { %v2825_v42 = vpop.f32.mrf.mxu1  ;;  %v2938_v43 = vpop.f32.mrf.mxu0 }
 0x4aa   : > { %3004 = vst [vmem:[%s5246_s17 + $0x128] sm:$0xff] %v2822_v39  ;;  %3006 = vst [vmem:[%s5246_s17 + $0x138] sm:$0xff] %v2935_v40  ;;  %v2826_v44 = vadd.f32 %v2825_v42, %v5233_v13  ;;  %v2939_v45 = vadd.f32 %v2938_v43, %v5235_v14 }
 0x4ab   : > { %v2827_v47 = vpop.f32.mrf.mxu1  ;;  %v2940_v48 = vpop.f32.mrf.mxu0 }
 0x4ac   : > { %3007 = vst [vmem:[%s5246_s17 + $0x140] sm:$0xff] %v2826_v44  ;;  %3009 = vst [vmem:[%s5246_s17 + $0x150] sm:$0xff] %v2939_v45  ;;  %v2828_v49 = vadd.f32 %v2827_v47, %v5238_v16  ;;  %v2941_v51 = vadd.f32 %v2940_v48, %v5240_v17 }
 0x4ad   : > { %v2829_v52 = vpop.f32.mrf.mxu1  ;;  %v2942_v53 = vpop.f32.mrf.mxu0 }
 0x4ae   : > { %3008 = vst [vmem:[%s5246_s17 + $0x148] sm:$0xff] %v2828_v49  ;;  %3010 = vst [vmem:[%s5246_s17 + $0x158] sm:$0xff] %v2941_v51  ;;  %v2830_v54 = vadd.f32 %v2829_v52, %v5233_v13  ;;  %v2943_v55 = vadd.f32 %v2942_v53, %v5235_v14 }
 0x4af   : > { %v2831_v56 = vpop.f32.mrf.mxu1  ;;  %v2944_v57 = vpop.f32.mrf.mxu0 }
 0x4b0   : > { %3011 = vst [vmem:[%s5246_s17 + $0x160] sm:$0xff] %v2830_v54  ;;  %3013 = vst [vmem:[%s5246_s17 + $0x170] sm:$0xff] %v2943_v55  ;;  %v2832_v59 = vadd.f32 %v2831_v56, %v5238_v16  ;;  %v2945_v60 = vadd.f32 %v2944_v57, %v5240_v17 }
 0x4b1   : > { %v2835_v61 = vpop.f32.mrf.mxu1  ;;  %v2948_v63 = vpop.f32.mrf.mxu0 }
 0x4b2   : > { %3012 = vst [vmem:[%s5246_s17 + $0x168] sm:$0xff] %v2832_v59  ;;  %3014 = vst [vmem:[%s5246_s17 + $0x178] sm:$0xff] %v2945_v60  ;;  %v2836_v0 = vadd.f32 %v2835_v61, %v5233_v13  ;;  %v2949_v24 = vadd.f32 %v2948_v63, %v5235_v14 }
 0x4b3   : > { %v2837_v15 = vpop.f32.mrf.mxu1  ;;  %v2950_v46 = vpop.f32.mrf.mxu0 }
 0x4b4   : > { %3015 = vst [vmem:[%s5246_s17 + $0x180] sm:$0xff] %v2836_v0  ;;  %3017 = vst [vmem:[%s5246_s17 + $0x190] sm:$0xff] %v2949_v24  ;;  %v2838_v50 = vadd.f32 %v2837_v15, %v5238_v16  ;;  %v2951_v8 = vadd.f32 %v2950_v46, %v5240_v17 }
 0x4b5   : > { %v2839_v12 = vpop.f32.mrf.mxu1  ;;  %v2952_v38 = vpop.f32.mrf.mxu0 }
 0x4b6   : > { %3016 = vst [vmem:[%s5246_s17 + $0x188] sm:$0xff] %v2838_v50  ;;  %3018 = vst [vmem:[%s5246_s17 + $0x198] sm:$0xff] %v2951_v8  ;;  %v2840_v41 = vadd.f32 %v2839_v12, %v5233_v13  ;;  %v2953_v62 = vadd.f32 %v2952_v38, %v5235_v14 }
 0x4b7   : > { %v2841_v1 = vpop.f32.mrf.mxu1  ;;  %v2954_v3 = vpop.f32.mrf.mxu0 }
 0x4b8   : > { %3019 = vst [vmem:[%s5246_s17 + $0x1a0] sm:$0xff] %v2840_v41  ;;  %3021 = vst [vmem:[%s5246_s17 + $0x1b0] sm:$0xff] %v2953_v62  ;;  %v2842_v27 = vadd.f32 %v2841_v1, %v5238_v16  ;;  %v2955_v25 = vadd.f32 %v2954_v3, %v5240_v17 }
 0x4b9   : > { %v2845_v4 = vpop.f32.mrf.mxu1  ;;  %v2958_v5 = vpop.f32.mrf.mxu0 }
 0x4ba   : > { %3020 = vst [vmem:[%s5246_s17 + $0x1a8] sm:$0xff] %v2842_v27  ;;  %3022 = vst [vmem:[%s5246_s17 + $0x1b8] sm:$0xff] %v2955_v25  ;;  %v2846_v6 = vadd.f32 %v2845_v4, %v5233_v13  ;;  %v2959_v2 = vadd.f32 %v2958_v5, %v5235_v14 }
 0x4bb   : > { %v2847_v7 = vpop.f32.mrf.mxu1  ;;  %v2960_v9 = vpop.f32.mrf.mxu0 }
 0x4bc   : > { %3023 = vst [vmem:[%s5246_s17 + $0x1c0] sm:$0xff] %v2846_v6  ;;  %3025 = vst [vmem:[%s5246_s17 + $0x1d0] sm:$0xff] %v2959_v2  ;;  %v2848_v10 = vadd.f32 %v2847_v7, %v5238_v16  ;;  %v2961_v11 = vadd.f32 %v2960_v9, %v5240_v17 }
 0x4bd   : > { %v2849_v21 = vpop.f32.mrf.mxu1  ;;  %v2962_v26 = vpop.f32.mrf.mxu0 }
 0x4be   : > { %3024 = vst [vmem:[%s5246_s17 + $0x1c8] sm:$0xff] %v2848_v10  ;;  %3026 = vst [vmem:[%s5246_s17 + $0x1d8] sm:$0xff] %v2961_v11  ;;  %v2850_v28 = vadd.f32 %v2849_v21, %v5233_v13  ;;  %v2963_v29 = vadd.f32 %v2962_v26, %v5235_v14 }
 0x4bf   : > { %v2851_v30 = vpop.f32.mrf.mxu1  ;;  %v2964_v31 = vpop.f32.mrf.mxu0 }
 0x4c0   : > { %3027 = vst [vmem:[%s5246_s17 + $0x1e0] sm:$0xff] %v2850_v28  ;;  %3029 = vst [vmem:[%s5246_s17 + $0x1f0] sm:$0xff] %v2963_v29  ;;  %v2852_v18 = vadd.f32 %v2851_v30, %v5238_v16  ;;  %v2965_v13 = vadd.f32 %v2964_v31, %v5240_v17 }
 0x4c2   : > { %3028 = vst [vmem:[%s5246_s17 + $0x1e8] sm:$0xff] %v2852_v18  ;;  %3030 = vst [vmem:[%s5246_s17 + $0x1f8] sm:$0xff] %v2965_v13 }
 0x4c3   : > { %4447 = shalt.err (!%p4444_p12)
}
 0x4c4   : > { %s4448_s19 = scalar_lea.hbm %s5373_s21, 8192  ;;  %s4452_s16 = scalar_lea.hbm %s5482_s20, 16384 }
 0x4c5   : > { %p4449_p6 = scmp.ne.s32.totalorder %s5373_s21, %s4448_s19  ;;  %p4453_p8 = scmp.lt.s32.totalorder %s5373_s21, %s5482_s20 }
 0x4c6   : > { %p4454_p10 = scmp.lt.s32.totalorder %s4452_s16, %s4448_s19 }
 0x4c7   : > { %p4450_p2 = pnand %p4449_p6, %p5480_p11 }
 0x4c8   : > { %p4455_p0 = por %p4454_p10, %p4453_p8 }
 0x4c9   : > { %p4451_p7 = pneg %p4450_p2 }
 0x4cb   : > { %p4456_p13 = pnand %p4455_p0, %p4451_p7 }
 0x4cd   : > { %4459 = shalt.err (!%p4456_p13)
}
 0x4ce   : > { %s4536_s1 = smov 512   ;;  %s4537_s5 = smov 32  }
 0x4cf   : > { %3654 = dma.vmem_to_hbm [thread:$0]  (%p5480_p11), %s5375_s23, 8192, %s5373_s21, %s3032_s14, %s4536_s1, %s4536_s1, %s4537_s5  }
 0x4d0 PF: > { %s3103_s29 = sand.u32 1, %s4502_s25   ;;  %p5483_p5 = scmp.ne.s32.totalorder %s5469_s22, 0 }
 0x4d1   : > { %p5484_p9 = scmp.ge.s32.totalorder %s4514_s28, 2  ;;  %s3104_s15 = scalar_lea.sflag [#allocation4], %s3103_s29 }
 0x4d3   : > { %p3681_p1 = pnand %p5484_p9, %p5483_p5 }
 0x4d5   : > { %p3682_p3 = pneg %p3681_p1 }
 0x4d7   : > { %4493 = dma.done.wait (%p3682_p3), %s3104_s15, 8192  }
 0x4d8   : > { %4495 = vsyncadd (%p3682_p3), %s3104_s15, 4294959104  ;;  %s5485_s18 = sadd.s32 4294967294, %s4514_s28  }
 0x4d9   : > { %s3112_s11 = sand.u32 1, %s5485_s18  }
 0x4da   : > { %s3113_s19 = scalar_lea.sflag [#allocation15], %s3112_s11 }
 0x4db   : > { %4497 = dma.done.wait (%p3682_p3), %s3113_s19, 4096  }
 0x4dc   : > { %4499 = vsyncadd (%p3682_p3), %s3113_s19, 4294963200  ;;  %s5486_s24 = sld [smem:[#allocation23_spill]]  ;;  %p33_p11 = scmp.ge.s32.totalorder %s4706_s30, 4  }
 0x4dd   : > { %s5487_s25 = smov %s4506_s26  ;;  %s5488_s26 = smov %s4510_s27 }
 0x4de   : > { %s5490_s28 = smov %s4706_s30  ;;  %35 = sbr.rel (!%p33_p11) target bundleno = 18 (0x12), region = 161 }
 0x4e2   : > { %s5489_s27 = smov %s5486_s24 }
 0x4e3   :  { %3127 = vsyncpa [#allocation3], 1 }
 0x4e4   :  { %3129 = vsyncpa [#allocation3 + $0x1], 1 }
 0x4e5   :  { %3130 = vsyncpa [#allocation6], 1 }
 0x4e6   :  { %3131 = vsyncpa [#allocation9], 1 }
 0x4e7   :  { %3132 = vsyncpa [#allocation12], 1 }
 0x4e8   :  { %3133 = vsyncpa [#allocation4], 1 }
 0x4e9   :  { %3135 = vsyncpa [#allocation4 + $0x1], 1 }
 0x4ea   :  { %3136 = vsyncpa [#allocation15], 1 }
 0x4eb   :  { %3138 = vsyncpa [#allocation15 + $0x1], 1 }

</bundles_post_ra>
